<compile_context>
chip_gen: v5e
topology: v5e:2x2
jax: 0.10.0
libtpu: 0.0.40
codegen_flags: <defaults>
</compile_context>

<pallas_src>
import functools

import numpy as np
import jax
import jax.numpy as jnp
from jax.experimental import pallas as pl
from jax.experimental.pallas import tpu as pltpu


def _ceil8(n):
    return ((n + 7) // 8) * 8


def _voxel_index_rows(N, D, H, W):
    """(8, N*D*H*W) int32: rows 0/1/2 hold each voxel's (d, h, w) coordinates
    (repeated per batch element); rows 3..7 are padding so the operand is a
    full 8-sublane tile."""
    dd = np.broadcast_to(np.arange(D)[:, None, None], (D, H, W)).reshape(-1)
    hh = np.broadcast_to(np.arange(H)[None, :, None], (D, H, W)).reshape(-1)
    ww = np.broadcast_to(np.arange(W)[None, None, :], (D, H, W)).reshape(-1)
    base = np.stack([dd, hh, ww]).astype(np.int32)          # (3, L)
    rows = np.zeros((8, N * D * H * W), np.int32)
    rows[:3] = np.tile(base, (1, N))
    return jnp.asarray(rows)


# ---------------------------------------------------------------------------
# Fused [optional BN-apply+ReLU on input] -> Conv3d(3x3x3, pad=1) -> BN stats.
# One grid step per batch block; one MXU GEMM per step.
# ---------------------------------------------------------------------------
def _conv_kernel(apply_affine, relu_input, Cpad, NL, D, H, W, padl, *refs):
    if apply_affine:
        (x_ref, w_ref, b_ref, idx_ref, s_ref, t_ref,
         y_ref, sum_ref, sq_ref, pad_ref, xs_ref) = refs
    else:
        (x_ref, w_ref, b_ref, idx_ref,
         y_ref, sum_ref, sq_ref, pad_ref, xs_ref) = refs
    HW = H * W

    v = x_ref[...].astype(jnp.float32)                      # (Cpad, NL)
    if apply_affine:
        v = v * s_ref[...] + t_ref[...]                      # fused prev-stage BN
    if relu_input:
        v = jnp.maximum(v, 0.0)

    # Halo padding: zero only the two pad slabs; the middle NL lanes are fully
    # overwritten by the aligned store of v (padl is a multiple of 128).
    pad_ref[:, 0:padl] = jnp.zeros((Cpad, padl), jnp.float32)
    pad_ref[:, padl + NL:padl + NL + padl] = jnp.zeros((Cpad, padl), jnp.float32)
    pad_ref[:, padl:padl + NL] = v

    # Tap-validity predicates from per-voxel coordinates (cheap VPU compares,
    # shared by all 27 taps).  They also zero cross-batch-element bleed.
    dd = idx_ref[0:1, :]
    hh = idx_ref[1:2, :]
    ww = idx_ref[2:3, :]
    alltrue = dd >= 0
    d_ok = (dd >= 1, alltrue, dd <= D - 2)
    h_ok = (hh >= 1, alltrue, hh <= H - 2)
    w_ok = (ww >= 1, alltrue, ww <= W - 2)

    # Masked im2col: one flat-shifted window per (kd,kh,kw) tap, full-tile
    # (8-sublane, NL-lane) stores.
    for t in range(27):
        kd, kh, kw = t // 9, (t // 3) % 3, t % 3
        off = (kd - 1) * HW + (kh - 1) * W + (kw - 1)
        win = pad_ref[:, padl + off:padl + off + NL]         # (Cpad, NL)
        m = d_ok[kd] & h_ok[kh] & w_ok[kw]                   # (1, NL) bool
        xs_ref[t * Cpad:(t + 1) * Cpad, :] = jnp.where(m, win, 0.0)

    # Single GEMM: (Cout, 27*Cpad) @ (27*Cpad, NL) -> (Cout, NL), f32 accumulation.
    acc = jnp.dot(w_ref[...], xs_ref[...], preferred_element_type=jnp.float32)
    acc = acc + b_ref[...]                                   # (Cout, 1) broadcast
    y_ref[...] = acc.astype(y_ref.dtype)

    # Fused per-channel BN batch statistics (per-step partials; reduced outside).
    sum_ref[0] = jnp.sum(acc, axis=1, keepdims=True)
    sq_ref[0] = jnp.sum(acc * acc, axis=1, keepdims=True)


def conv3x3x3_stats(x, w_mat, bias, idx, *, dims, num_blocks,
                    scale=None, shift=None, relu_input=False):
    """x (Cpad, N*L) -> y (Cout, N*L), per-step channel sum/sumsq (GB, Cout, 1)."""
    Cpad, NLtot = x.shape
    Cout = w_mat.shape[0]
    D, H, W = dims
    GB = num_blocks
    NL = NLtot // GB
    padl = ((H * W + W + 1 + 127) // 128) * 128   # lane-aligned halo >= max |offset|

    apply_affine = scale is not None
    kernel = functools.partial(_conv_kernel, apply_affine, relu_input,
                               Cpad, NL, D, H, W, padl)

    in_specs = [
        pl.BlockSpec((Cpad, NL), lambda g: (0, g)),             # activations
        pl.BlockSpec((Cout, 27 * Cpad), lambda g: (0, 0)),      # weights (im2col form)
        pl.BlockSpec((Cout, 1), lambda g: (0, 0)),              # bias
        pl.BlockSpec((8, NL), lambda g: (0, g)),                # voxel coordinates
    ]
    args = [x, w_mat, bias, idx]
    if apply_affine:
        in_specs += [pl.BlockSpec((Cpad, 1), lambda g: (0, 0)),  # input BN scale
                     pl.BlockSpec((Cpad, 1), lambda g: (0, 0))]  # input BN shift
        args += [scale, shift]

    y, s, q = pl.pallas_call(
        kernel,
        out_shape=(jax.ShapeDtypeStruct((Cout, NLtot), x.dtype),
                   jax.ShapeDtypeStruct((GB, Cout, 1), jnp.float32),
                   jax.ShapeDtypeStruct((GB, Cout, 1), jnp.float32)),
        grid=(GB,),
        in_specs=in_specs,
        out_specs=(pl.BlockSpec((Cout, NL), lambda g: (0, g)),
                   pl.BlockSpec((1, Cout, 1), lambda g: (g, 0, 0)),
                   pl.BlockSpec((1, Cout, 1), lambda g: (g, 0, 0))),
        scratch_shapes=[pltpu.VMEM((Cpad, NL + 2 * padl), jnp.float32),  # halo slab
                        pltpu.VMEM((27 * Cpad, NL), jnp.float32)],       # im2col
        compiler_params=pltpu.CompilerParams(dimension_semantics=("parallel",)),
    )(*args)
    return y, s, q


def _bn_affine(s, q, gamma, beta, count, eps=1e-5):
    """Turn per-step (GB, C, 1) sum / sumsq partials into per-channel scale/shift."""
    s = jnp.sum(s, axis=0)[:, 0]
    q = jnp.sum(q, axis=0)[:, 0]
    mean = s / count
    var = jnp.maximum(q / count - mean * mean, 0.0)   # biased (training-mode BN)
    scale = gamma / jnp.sqrt(var + eps)
    shift = beta - mean * scale
    return (scale.reshape(-1, 1).astype(jnp.float32),
            shift.reshape(-1, 1).astype(jnp.float32))


@functools.partial(jax.jit, static_argnames=("num_blocks",))
def down_forward(x, params, num_blocks=1):
    """x: (N, Cin, D, H, W) NCDHW (PyTorch layout) -> (N, Cout, D, H//2, W//2)."""
    N, Cin, D, H, W = x.shape
    H2, W2 = H // 2, W // 2
    x = x[..., :2 * H2, :2 * W2]          # PyTorch MaxPool3d floor-truncation
    L = D * H2 * W2

    GB = int(num_blocks)
    if GB < 1 or N % GB or (GB > 1 and ((N // GB) * L) % 128):
        GB = 1

    Cinp = _ceil8(Cin)
    Cout = params["w1"].shape[-1]
    Coutp = _ceil8(Cout)

    # MaxPool3d((1,2,2)): fused strided-slice max in XLA (not worth a dispatch).
    xp = jnp.maximum(
        jnp.maximum(x[..., 0::2, 0::2], x[..., 0::2, 1::2]),
        jnp.maximum(x[..., 1::2, 0::2], x[..., 1::2, 1::2]))
    # Channel-major flat layout (C, N*L); channels zero-padded to a full 8-sublane tile.
    xcm = jnp.transpose(xp, (1, 0, 2, 3, 4)).reshape(Cin, N * L).astype(jnp.float32)
    xcm = jnp.pad(xcm, ((0, Cinp - Cin), (0, 0)))

    idx = _voxel_index_rows(N, D, H2, W2)                    # (8, N*L) int32

    def pack_w(w, ci, cip, co, cop):
        wp = jnp.zeros((3, 3, 3, cip, cop), jnp.float32)
        wp = wp.at[:, :, :, :ci, :co].set(w.astype(jnp.float32))
        return wp.reshape(27 * cip, cop).T                   # (cop, 27*cip)

    def pad_vec(v, cop):
        return jnp.pad(v.astype(jnp.float32), (0, cop - v.shape[0]))

    w1 = pack_w(params["w1"], Cin, Cinp, Cout, Coutp)
    w2 = pack_w(params["w2"], Cout, Coutp, Cout, Coutp)
    b1 = pad_vec(params["b1"], Coutp).reshape(Coutp, 1)
    b2 = pad_vec(params["b2"], Coutp).reshape(Coutp, 1)
    g1, bt1 = pad_vec(params["g1"], Coutp), pad_vec(params["bt1"], Coutp)
    g2, bt2 = pad_vec(params["g2"], Coutp), pad_vec(params["bt2"], Coutp)

    # Stage 1: conv1 + fused BN1 batch stats (no input affine/ReLU).
    y1, s1, q1 = conv3x3x3_stats(xcm, w1, b1, idx, dims=(D, H2, W2),
                                 num_blocks=GB, relu_input=False)
    sc1, sh1 = _bn_affine(s1, q1, g1, bt1, N * L)

    # Stage 2: BN1-apply + ReLU fused into conv2's input load; conv2 + BN2 stats.
    y2, s2, q2 = conv3x3x3_stats(y1, w2, b2, idx, dims=(D, H2, W2),
                                 num_blocks=GB, relu_input=True,
                                 scale=sc1, shift=sh1)
    sc2, sh2 = _bn_affine(s2, q2, g2, bt2, N * L)

    # Final BN2-apply + ReLU in plain jnp (XLA fuses it with the layout restore).
    out = jnp.maximum(y2 * sc2 + sh2, 0.0)[:Cout]
    out = out.reshape(Cout, N, D, H2, W2).transpose(1, 0, 2, 3, 4)
    return out


def _default_num_blocks(N):
    """2-way 'parallel' batch split on v7x (2 TensorCores/chip); collapsed otherwise."""
    try:
        kind = jax.devices()[0].device_kind.lower()
    except Exception:
        kind = ""
    nb = 2 if "7" in kind else 1
    nb = min(nb, max(N, 1))
    while nb > 1 and N % nb:
        nb -= 1
    return nb


# ---------------------------------------------------------------------------
# Pure-JAX reference (same math, NCDHW) for a correctness check.
# ---------------------------------------------------------------------------
def ref_forward(x, params, eps=1e-5):
    N, C, D, H, W = x.shape
    x = x.reshape(N, C, D, H // 2, 2, W // 2, 2).max(axis=(4, 6))

    def stage(x, w, b, g, bt):
        wt = jnp.transpose(w, (4, 3, 0, 1, 2))  # OIDHW
        y = jax.lax.conv_general_dilated(
            x, wt, window_strides=(1, 1, 1), padding=[(1, 1)] * 3,
            dimension_numbers=("NCDHW", "OIDHW", "NCDHW"))
        y = y + b.reshape(1, -1, 1, 1, 1)
        mean = y.mean(axis=(0, 2, 3, 4), keepdims=True)
        var = y.var(axis=(0, 2, 3, 4), keepdims=True)
        y = (y - mean) / jnp.sqrt(var + eps)
        y = y * g.reshape(1, -1, 1, 1, 1) + bt.reshape(1, -1, 1, 1, 1)
        return jnp.maximum(y, 0.0)

    x = stage(x, params["w1"], params["b1"], params["g1"], params["bt1"])
    x = stage(x, params["w2"], params["b2"], params["g2"], params["bt2"])
    return x


if __name__ == "__main__":
    key = jax.random.PRNGKey(0)
    ks = jax.random.split(key, 10)

    # Down(in_channels=4, out_channels=8, kernel=3); input NCDHW
    N, Cin, D, H, W = 2, 4, 4, 16, 16
    Cout = 8

    x = jax.random.normal(ks[0], (N, Cin, D, H, W), jnp.float32)

    params = {
        "w1": jax.random.normal(ks[1], (3, 3, 3, Cin, Cout), jnp.float32)
              * (1.0 / (27 * Cin) ** 0.5),
        "b1": 0.1 * jax.random.normal(ks[2], (Cout,), jnp.float32),
        "g1": 1.0 + 0.1 * jax.random.normal(ks[3], (Cout,), jnp.float32),
        "bt1": 0.1 * jax.random.normal(ks[4], (Cout,), jnp.float32),
        "w2": jax.random.normal(ks[5], (3, 3, 3, Cout, Cout), jnp.float32)
              * (1.0 / (27 * Cout) ** 0.5),
        "b2": 0.1 * jax.random.normal(ks[6], (Cout,), jnp.float32),
        "g2": 1.0 + 0.1 * jax.random.normal(ks[7], (Cout,), jnp.float32),
        "bt2": 0.1 * jax.random.normal(ks[8], (Cout,), jnp.float32),
    }

    gb = _default_num_blocks(N)
    out = jax.block_until_ready(down_forward(x, params, num_blocks=gb))
    assert out.shape == (N, Cout, D, H // 2, W // 2), out.shape

    ref = jax.block_until_ready(ref_forward(x, params))
    max_err = float(jnp.max(jnp.abs(out - ref)))
    if max_err > 5e-3:
        raise AssertionError(f"mismatch vs reference, max abs err = {max_err}")

    print("KERNEL_OK")
</pallas_src>

<mosaic_0001>
module attributes {stable_mosaic.version = 11 : i64} {
  func.func @_conv_kernel(%arg0: i32, %arg1: memref<8x512xf32, #tpu.memory_space<vmem>>, %arg2: memref<8x216xf32, #tpu.memory_space<vmem>>, %arg3: memref<8x1xf32, #tpu.memory_space<vmem>>, %arg4: memref<8x512xi32, #tpu.memory_space<vmem>>, %arg5: memref<8x512xf32, #tpu.memory_space<vmem>>, %arg6: memref<1x8x1xf32, #tpu.memory_space<vmem>>, %arg7: memref<1x8x1xf32, #tpu.memory_space<vmem>>, %arg8: memref<8x768xf32, #tpu.memory_space<vmem>>, %arg9: memref<216x512xf32, #tpu.memory_space<vmem>>) attributes {dimension_semantics = [#tpu.dimension_semantics<parallel>], iteration_bounds = array<i64: 1>, scalar_prefetch = 0 : i64, scratch_operands = 2 : i64, tpu.core_type = #tpu.core_type<tc>, window_params = [{transform_indices = @transform_0, window_bounds = array<i64: 8, 512>}, {pipeline_mode = #tpu.pipeline_mode<synchronous>, transform_indices = @transform_1, window_bounds = array<i64: 8, 216>}, {pipeline_mode = #tpu.pipeline_mode<synchronous>, transform_indices = @transform_2, window_bounds = array<i64: 8, 1>}, {transform_indices = @transform_3, window_bounds = array<i64: 8, 512>}, {transform_indices = @transform_4, window_bounds = array<i64: 8, 512>}, {transform_indices = @transform_5, window_bounds = array<i64: 1, 8, 1>}, {transform_indices = @transform_6, window_bounds = array<i64: 1, 8, 1>}]} {
    %c0 = arith.constant 0 : index
    %c0_0 = arith.constant 0 : index
    %0 = vector.load %arg1[%c0, %c0_0] : memref<8x512xf32, #tpu.memory_space<vmem>>, vector<8x512xf32>
    %cst = arith.constant 0.000000e+00 : f32
    %1 = vector.broadcast %cst : f32 to vector<8x128xf32>
    %c0_1 = arith.constant 0 : index
    %c0_2 = arith.constant 0 : index
    %2 = vector.load %arg8[%c0_1, %c0_2] : memref<8x768xf32, #tpu.memory_space<vmem>>, vector<8x128xf32>
    tpu.vector_store %arg8[%c0_1, %c0_2], %1 {strides = array<i32>} : memref<8x768xf32, #tpu.memory_space<vmem>>, vector<8x128xf32>,
    %cst_3 = arith.constant 0.000000e+00 : f32
    %3 = vector.broadcast %cst_3 : f32 to vector<8x128xf32>
    %c0_4 = arith.constant 0 : index
    %c640 = arith.constant 640 : index
    %4 = vector.load %arg8[%c0_4, %c640] : memref<8x768xf32, #tpu.memory_space<vmem>>, vector<8x128xf32>
    tpu.vector_store %arg8[%c0_4, %c640], %3 {strides = array<i32>} : memref<8x768xf32, #tpu.memory_space<vmem>>, vector<8x128xf32>,
    %c0_5 = arith.constant 0 : index
    %c128 = arith.constant 128 : index
    %5 = vector.load %arg8[%c0_5, %c128] : memref<8x768xf32, #tpu.memory_space<vmem>>, vector<8x512xf32>
    tpu.vector_store %arg8[%c0_5, %c128], %0 {strides = array<i32>} : memref<8x768xf32, #tpu.memory_space<vmem>>, vector<8x512xf32>,
    %c0_6 = arith.constant 0 : index
    %c0_7 = arith.constant 0 : index
    %6 = vector.load %arg4[%c0_6, %c0_7] : memref<8x512xi32, #tpu.memory_space<vmem>>, vector<1x512xi32>
    %c1 = arith.constant 1 : index
    %c0_8 = arith.constant 0 : index
    %7 = vector.load %arg4[%c1, %c0_8] : memref<8x512xi32, #tpu.memory_space<vmem>>, vector<1x512xi32>
    %c2 = arith.constant 2 : index
    %c0_9 = arith.constant 0 : index
    %8 = vector.load %arg4[%c2, %c0_9] : memref<8x512xi32, #tpu.memory_space<vmem>>, vector<1x512xi32>
    %c0_i32 = arith.constant 0 : i32
    %9 = vector.broadcast %c0_i32 : i32 to vector<1x512xi32>
    %10 = arith.cmpi sge, %6, %9 : vector<1x512xi32>
    %c1_i32 = arith.constant 1 : i32
    %11 = vector.broadcast %c1_i32 : i32 to vector<1x512xi32>
    %12 = arith.cmpi sge, %6, %11 : vector<1x512xi32>
    %c2_i32 = arith.constant 2 : i32
    %13 = vector.broadcast %c2_i32 : i32 to vector<1x512xi32>
    %14 = arith.cmpi sle, %6, %13 : vector<1x512xi32>
    %c1_i32_10 = arith.constant 1 : i32
    %15 = vector.broadcast %c1_i32_10 : i32 to vector<1x512xi32>
    %16 = arith.cmpi sge, %7, %15 : vector<1x512xi32>
    %c6_i32 = arith.constant 6 : i32
    %17 = vector.broadcast %c6_i32 : i32 to vector<1x512xi32>
    %18 = arith.cmpi sle, %7, %17 : vector<1x512xi32>
    %c1_i32_11 = arith.constant 1 : i32
    %19 = vector.broadcast %c1_i32_11 : i32 to vector<1x512xi32>
    %20 = arith.cmpi sge, %8, %19 : vector<1x512xi32>
    %c6_i32_12 = arith.constant 6 : i32
    %21 = vector.broadcast %c6_i32_12 : i32 to vector<1x512xi32>
    %22 = arith.cmpi sle, %8, %21 : vector<1x512xi32>
    %c0_13 = arith.constant 0 : index
    %c55 = arith.constant 55 : index
    %23 = vector.load %arg8[%c0_13, %c55] : memref<8x768xf32, #tpu.memory_space<vmem>>, vector<8x512xf32>
    %24 = arith.andi %12, %16 : vector<1x512xi1>
    %25 = arith.andi %24, %20 : vector<1x512xi1>
    %cst_14 = arith.constant 0.000000e+00 : f32
    %26 = vector.shape_cast %25 : vector<1x512xi1> to vector<1x512xi1>
    %27 = vector.broadcast %26 : vector<1x512xi1> to vector<8x512xi1>
    %28 = vector.broadcast %cst_14 : f32 to vector<8x512xf32>
    %29 = arith.select %27, %23, %28 : vector<8x512xi1>, vector<8x512xf32>
    %c0_15 = arith.constant 0 : index
    %c0_16 = arith.constant 0 : index
    %30 = vector.load %arg9[%c0_15, %c0_16] : memref<216x512xf32, #tpu.memory_space<vmem>>, vector<8x512xf32>
    tpu.vector_store %arg9[%c0_15, %c0_16], %29 {strides = array<i32>} : memref<216x512xf32, #tpu.memory_space<vmem>>, vector<8x512xf32>,
    %c0_17 = arith.constant 0 : index
    %c56 = arith.constant 56 : index
    %31 = vector.load %arg8[%c0_17, %c56] : memref<8x768xf32, #tpu.memory_space<vmem>>, vector<8x512xf32>
    %32 = arith.andi %12, %16 : vector<1x512xi1>
    %33 = arith.andi %32, %10 : vector<1x512xi1>
    %cst_18 = arith.constant 0.000000e+00 : f32
    %34 = vector.shape_cast %33 : vector<1x512xi1> to vector<1x512xi1>
    %35 = vector.broadcast %34 : vector<1x512xi1> to vector<8x512xi1>
    %36 = vector.broadcast %cst_18 : f32 to vector<8x512xf32>
    %37 = arith.select %35, %31, %36 : vector<8x512xi1>, vector<8x512xf32>
    %c8 = arith.constant 8 : index
    %c0_19 = arith.constant 0 : index
    %38 = vector.load %arg9[%c8, %c0_19] : memref<216x512xf32, #tpu.memory_space<vmem>>, vector<8x512xf32>
    tpu.vector_store %arg9[%c8, %c0_19], %37 {strides = array<i32>} : memref<216x512xf32, #tpu.memory_space<vmem>>, vector<8x512xf32>,
    %c0_20 = arith.constant 0 : index
    %c57 = arith.constant 57 : index
    %39 = vector.load %arg8[%c0_20, %c57] : memref<8x768xf32, #tpu.memory_space<vmem>>, vector<8x512xf32>
    %40 = arith.andi %12, %16 : vector<1x512xi1>
    %41 = arith.andi %40, %22 : vector<1x512xi1>
    %cst_21 = arith.constant 0.000000e+00 : f32
    %42 = vector.shape_cast %41 : vector<1x512xi1> to vector<1x512xi1>
    %43 = vector.broadcast %42 : vector<1x512xi1> to vector<8x512xi1>
    %44 = vector.broadcast %cst_21 : f32 to vector<8x512xf32>
    %45 = arith.select %43, %39, %44 : vector<8x512xi1>, vector<8x512xf32>
    %c16 = arith.constant 16 : index
    %c0_22 = arith.constant 0 : index
    %46 = vector.load %arg9[%c16, %c0_22] : memref<216x512xf32, #tpu.memory_space<vmem>>, vector<8x512xf32>
    tpu.vector_store %arg9[%c16, %c0_22], %45 {strides = array<i32>} : memref<216x512xf32, #tpu.memory_space<vmem>>, vector<8x512xf32>,
    %c0_23 = arith.constant 0 : index
    %c63 = arith.constant 63 : index
    %47 = vector.load %arg8[%c0_23, %c63] : memref<8x768xf32, #tpu.memory_space<vmem>>, vector<8x512xf32>
    %48 = arith.andi %12, %10 : vector<1x512xi1>
    %49 = arith.andi %48, %20 : vector<1x512xi1>
    %cst_24 = arith.constant 0.000000e+00 : f32
    %50 = vector.shape_cast %49 : vector<1x512xi1> to vector<1x512xi1>
    %51 = vector.broadcast %50 : vector<1x512xi1> to vector<8x512xi1>
    %52 = vector.broadcast %cst_24 : f32 to vector<8x512xf32>
    %53 = arith.select %51, %47, %52 : vector<8x512xi1>, vector<8x512xf32>
    %c24 = arith.constant 24 : index
    %c0_25 = arith.constant 0 : index
    %54 = vector.load %arg9[%c24, %c0_25] : memref<216x512xf32, #tpu.memory_space<vmem>>, vector<8x512xf32>
    tpu.vector_store %arg9[%c24, %c0_25], %53 {strides = array<i32>} : memref<216x512xf32, #tpu.memory_space<vmem>>, vector<8x512xf32>,
    %c0_26 = arith.constant 0 : index
    %c64 = arith.constant 64 : index
    %55 = vector.load %arg8[%c0_26, %c64] : memref<8x768xf32, #tpu.memory_space<vmem>>, vector<8x512xf32>
    %56 = arith.andi %12, %10 : vector<1x512xi1>
    %57 = arith.andi %56, %10 : vector<1x512xi1>
    %cst_27 = arith.constant 0.000000e+00 : f32
    %58 = vector.shape_cast %57 : vector<1x512xi1> to vector<1x512xi1>
    %59 = vector.broadcast %58 : vector<1x512xi1> to vector<8x512xi1>
    %60 = vector.broadcast %cst_27 : f32 to vector<8x512xf32>
    %61 = arith.select %59, %55, %60 : vector<8x512xi1>, vector<8x512xf32>
    %c32 = arith.constant 32 : index
    %c0_28 = arith.constant 0 : index
    %62 = vector.load %arg9[%c32, %c0_28] : memref<216x512xf32, #tpu.memory_space<vmem>>, vector<8x512xf32>
    tpu.vector_store %arg9[%c32, %c0_28], %61 {strides = array<i32>} : memref<216x512xf32, #tpu.memory_space<vmem>>, vector<8x512xf32>,
    %c0_29 = arith.constant 0 : index
    %c65 = arith.constant 65 : index
    %63 = vector.load %arg8[%c0_29, %c65] : memref<8x768xf32, #tpu.memory_space<vmem>>, vector<8x512xf32>
    %64 = arith.andi %12, %10 : vector<1x512xi1>
    %65 = arith.andi %64, %22 : vector<1x512xi1>
    %cst_30 = arith.constant 0.000000e+00 : f32
    %66 = vector.shape_cast %65 : vector<1x512xi1> to vector<1x512xi1>
    %67 = vector.broadcast %66 : vector<1x512xi1> to vector<8x512xi1>
    %68 = vector.broadcast %cst_30 : f32 to vector<8x512xf32>
    %69 = arith.select %67, %63, %68 : vector<8x512xi1>, vector<8x512xf32>
    %c40 = arith.constant 40 : index
    %c0_31 = arith.constant 0 : index
    %70 = vector.load %arg9[%c40, %c0_31] : memref<216x512xf32, #tpu.memory_space<vmem>>, vector<8x512xf32>
    tpu.vector_store %arg9[%c40, %c0_31], %69 {strides = array<i32>} : memref<216x512xf32, #tpu.memory_space<vmem>>, vector<8x512xf32>,
    %c0_32 = arith.constant 0 : index
    %c71 = arith.constant 71 : index
    %71 = vector.load %arg8[%c0_32, %c71] : memref<8x768xf32, #tpu.memory_space<vmem>>, vector<8x512xf32>
    %72 = arith.andi %12, %18 : vector<1x512xi1>
    %73 = arith.andi %72, %20 : vector<1x512xi1>
    %cst_33 = arith.constant 0.000000e+00 : f32
    %74 = vector.shape_cast %73 : vector<1x512xi1> to vector<1x512xi1>
    %75 = vector.broadcast %74 : vector<1x512xi1> to vector<8x512xi1>
    %76 = vector.broadcast %cst_33 : f32 to vector<8x512xf32>
    %77 = arith.select %75, %71, %76 : vector<8x512xi1>, vector<8x512xf32>
    %c48 = arith.constant 48 : index
    %c0_34 = arith.constant 0 : index
    %78 = vector.load %arg9[%c48, %c0_34] : memref<216x512xf32, #tpu.memory_space<vmem>>, vector<8x512xf32>
    tpu.vector_store %arg9[%c48, %c0_34], %77 {strides = array<i32>} : memref<216x512xf32, #tpu.memory_space<vmem>>, vector<8x512xf32>,
    %c0_35 = arith.constant 0 : index
    %c72 = arith.constant 72 : index
    %79 = vector.load %arg8[%c0_35, %c72] : memref<8x768xf32, #tpu.memory_space<vmem>>, vector<8x512xf32>
    %80 = arith.andi %12, %18 : vector<1x512xi1>
    %81 = arith.andi %80, %10 : vector<1x512xi1>
    %cst_36 = arith.constant 0.000000e+00 : f32
    %82 = vector.shape_cast %81 : vector<1x512xi1> to vector<1x512xi1>
    %83 = vector.broadcast %82 : vector<1x512xi1> to vector<8x512xi1>
    %84 = vector.broadcast %cst_36 : f32 to vector<8x512xf32>
    %85 = arith.select %83, %79, %84 : vector<8x512xi1>, vector<8x512xf32>
    %c56_37 = arith.constant 56 : index
    %c0_38 = arith.constant 0 : index
    %86 = vector.load %arg9[%c56_37, %c0_38] : memref<216x512xf32, #tpu.memory_space<vmem>>, vector<8x512xf32>
    tpu.vector_store %arg9[%c56_37, %c0_38], %85 {strides = array<i32>} : memref<216x512xf32, #tpu.memory_space<vmem>>, vector<8x512xf32>,
    %c0_39 = arith.constant 0 : index
    %c73 = arith.constant 73 : index
    %87 = vector.load %arg8[%c0_39, %c73] : memref<8x768xf32, #tpu.memory_space<vmem>>, vector<8x512xf32>
    %88 = arith.andi %12, %18 : vector<1x512xi1>
    %89 = arith.andi %88, %22 : vector<1x512xi1>
    %cst_40 = arith.constant 0.000000e+00 : f32
    %90 = vector.shape_cast %89 : vector<1x512xi1> to vector<1x512xi1>
    %91 = vector.broadcast %90 : vector<1x512xi1> to vector<8x512xi1>
    %92 = vector.broadcast %cst_40 : f32 to vector<8x512xf32>
    %93 = arith.select %91, %87, %92 : vector<8x512xi1>, vector<8x512xf32>
    %c64_41 = arith.constant 64 : index
    %c0_42 = arith.constant 0 : index
    %94 = vector.load %arg9[%c64_41, %c0_42] : memref<216x512xf32, #tpu.memory_space<vmem>>, vector<8x512xf32>
    tpu.vector_store %arg9[%c64_41, %c0_42], %93 {strides = array<i32>} : memref<216x512xf32, #tpu.memory_space<vmem>>, vector<8x512xf32>,
    %c0_43 = arith.constant 0 : index
    %c119 = arith.constant 119 : index
    %95 = vector.load %arg8[%c0_43, %c119] : memref<8x768xf32, #tpu.memory_space<vmem>>, vector<8x512xf32>
    %96 = arith.andi %10, %16 : vector<1x512xi1>
    %97 = arith.andi %96, %20 : vector<1x512xi1>
    %cst_44 = arith.constant 0.000000e+00 : f32
    %98 = vector.shape_cast %97 : vector<1x512xi1> to vector<1x512xi1>
    %99 = vector.broadcast %98 : vector<1x512xi1> to vector<8x512xi1>
    %100 = vector.broadcast %cst_44 : f32 to vector<8x512xf32>
    %101 = arith.select %99, %95, %100 : vector<8x512xi1>, vector<8x512xf32>
    %c72_45 = arith.constant 72 : index
    %c0_46 = arith.constant 0 : index
    %102 = vector.load %arg9[%c72_45, %c0_46] : memref<216x512xf32, #tpu.memory_space<vmem>>, vector<8x512xf32>
    tpu.vector_store %arg9[%c72_45, %c0_46], %101 {strides = array<i32>} : memref<216x512xf32, #tpu.memory_space<vmem>>, vector<8x512xf32>,
    %c0_47 = arith.constant 0 : index
    %c120 = arith.constant 120 : index
    %103 = vector.load %arg8[%c0_47, %c120] : memref<8x768xf32, #tpu.memory_space<vmem>>, vector<8x512xf32>
    %104 = arith.andi %10, %16 : vector<1x512xi1>
    %105 = arith.andi %104, %10 : vector<1x512xi1>
    %cst_48 = arith.constant 0.000000e+00 : f32
    %106 = vector.shape_cast %105 : vector<1x512xi1> to vector<1x512xi1>
    %107 = vector.broadcast %106 : vector<1x512xi1> to vector<8x512xi1>
    %108 = vector.broadcast %cst_48 : f32 to vector<8x512xf32>
    %109 = arith.select %107, %103, %108 : vector<8x512xi1>, vector<8x512xf32>
    %c80 = arith.constant 80 : index
    %c0_49 = arith.constant 0 : index
    %110 = vector.load %arg9[%c80, %c0_49] : memref<216x512xf32, #tpu.memory_space<vmem>>, vector<8x512xf32>
    tpu.vector_store %arg9[%c80, %c0_49], %109 {strides = array<i32>} : memref<216x512xf32, #tpu.memory_space<vmem>>, vector<8x512xf32>,
    %c0_50 = arith.constant 0 : index
    %c121 = arith.constant 121 : index
    %111 = vector.load %arg8[%c0_50, %c121] : memref<8x768xf32, #tpu.memory_space<vmem>>, vector<8x512xf32>
    %112 = arith.andi %10, %16 : vector<1x512xi1>
    %113 = arith.andi %112, %22 : vector<1x512xi1>
    %cst_51 = arith.constant 0.000000e+00 : f32
    %114 = vector.shape_cast %113 : vector<1x512xi1> to vector<1x512xi1>
    %115 = vector.broadcast %114 : vector<1x512xi1> to vector<8x512xi1>
    %116 = vector.broadcast %cst_51 : f32 to vector<8x512xf32>
    %117 = arith.select %115, %111, %116 : vector<8x512xi1>, vector<8x512xf32>
    %c88 = arith.constant 88 : index
    %c0_52 = arith.constant 0 : index
    %118 = vector.load %arg9[%c88, %c0_52] : memref<216x512xf32, #tpu.memory_space<vmem>>, vector<8x512xf32>
    tpu.vector_store %arg9[%c88, %c0_52], %117 {strides = array<i32>} : memref<216x512xf32, #tpu.memory_space<vmem>>, vector<8x512xf32>,
    %c0_53 = arith.constant 0 : index
    %c127 = arith.constant 127 : index
    %119 = vector.load %arg8[%c0_53, %c127] : memref<8x768xf32, #tpu.memory_space<vmem>>, vector<8x512xf32>
    %120 = arith.andi %10, %10 : vector<1x512xi1>
    %121 = arith.andi %120, %20 : vector<1x512xi1>
    %cst_54 = arith.constant 0.000000e+00 : f32
    %122 = vector.shape_cast %121 : vector<1x512xi1> to vector<1x512xi1>
    %123 = vector.broadcast %122 : vector<1x512xi1> to vector<8x512xi1>
    %124 = vector.broadcast %cst_54 : f32 to vector<8x512xf32>
    %125 = arith.select %123, %119, %124 : vector<8x512xi1>, vector<8x512xf32>
    %c96 = arith.constant 96 : index
    %c0_55 = arith.constant 0 : index
    %126 = vector.load %arg9[%c96, %c0_55] : memref<216x512xf32, #tpu.memory_space<vmem>>, vector<8x512xf32>
    tpu.vector_store %arg9[%c96, %c0_55], %125 {strides = array<i32>} : memref<216x512xf32, #tpu.memory_space<vmem>>, vector<8x512xf32>,
    %c0_56 = arith.constant 0 : index
    %c128_57 = arith.constant 128 : index
    %127 = vector.load %arg8[%c0_56, %c128_57] : memref<8x768xf32, #tpu.memory_space<vmem>>, vector<8x512xf32>
    %128 = arith.andi %10, %10 : vector<1x512xi1>
    %129 = arith.andi %128, %10 : vector<1x512xi1>
    %cst_58 = arith.constant 0.000000e+00 : f32
    %130 = vector.shape_cast %129 : vector<1x512xi1> to vector<1x512xi1>
    %131 = vector.broadcast %130 : vector<1x512xi1> to vector<8x512xi1>
    %132 = vector.broadcast %cst_58 : f32 to vector<8x512xf32>
    %133 = arith.select %131, %127, %132 : vector<8x512xi1>, vector<8x512xf32>
    %c104 = arith.constant 104 : index
    %c0_59 = arith.constant 0 : index
    %134 = vector.load %arg9[%c104, %c0_59] : memref<216x512xf32, #tpu.memory_space<vmem>>, vector<8x512xf32>
    tpu.vector_store %arg9[%c104, %c0_59], %133 {strides = array<i32>} : memref<216x512xf32, #tpu.memory_space<vmem>>, vector<8x512xf32>,
    %c0_60 = arith.constant 0 : index
    %c129 = arith.constant 129 : index
    %135 = vector.load %arg8[%c0_60, %c129] : memref<8x768xf32, #tpu.memory_space<vmem>>, vector<8x512xf32>
    %136 = arith.andi %10, %10 : vector<1x512xi1>
    %137 = arith.andi %136, %22 : vector<1x512xi1>
    %cst_61 = arith.constant 0.000000e+00 : f32
    %138 = vector.shape_cast %137 : vector<1x512xi1> to vector<1x512xi1>
    %139 = vector.broadcast %138 : vector<1x512xi1> to vector<8x512xi1>
    %140 = vector.broadcast %cst_61 : f32 to vector<8x512xf32>
    %141 = arith.select %139, %135, %140 : vector<8x512xi1>, vector<8x512xf32>
    %c112 = arith.constant 112 : index
    %c0_62 = arith.constant 0 : index
    %142 = vector.load %arg9[%c112, %c0_62] : memref<216x512xf32, #tpu.memory_space<vmem>>, vector<8x512xf32>
    tpu.vector_store %arg9[%c112, %c0_62], %141 {strides = array<i32>} : memref<216x512xf32, #tpu.memory_space<vmem>>, vector<8x512xf32>,
    %c0_63 = arith.constant 0 : index
    %c135 = arith.constant 135 : index
    %143 = vector.load %arg8[%c0_63, %c135] : memref<8x768xf32, #tpu.memory_space<vmem>>, vector<8x512xf32>
    %144 = arith.andi %10, %18 : vector<1x512xi1>
    %145 = arith.andi %144, %20 : vector<1x512xi1>
    %cst_64 = arith.constant 0.000000e+00 : f32
    %146 = vector.shape_cast %145 : vector<1x512xi1> to vector<1x512xi1>
    %147 = vector.broadcast %146 : vector<1x512xi1> to vector<8x512xi1>
    %148 = vector.broadcast %cst_64 : f32 to vector<8x512xf32>
    %149 = arith.select %147, %143, %148 : vector<8x512xi1>, vector<8x512xf32>
    %c120_65 = arith.constant 120 : index
    %c0_66 = arith.constant 0 : index
    %150 = vector.load %arg9[%c120_65, %c0_66] : memref<216x512xf32, #tpu.memory_space<vmem>>, vector<8x512xf32>
    tpu.vector_store %arg9[%c120_65, %c0_66], %149 {strides = array<i32>} : memref<216x512xf32, #tpu.memory_space<vmem>>, vector<8x512xf32>,
    %c0_67 = arith.constant 0 : index
    %c136 = arith.constant 136 : index
    %151 = vector.load %arg8[%c0_67, %c136] : memref<8x768xf32, #tpu.memory_space<vmem>>, vector<8x512xf32>
    %152 = arith.andi %10, %18 : vector<1x512xi1>
    %153 = arith.andi %152, %10 : vector<1x512xi1>
    %cst_68 = arith.constant 0.000000e+00 : f32
    %154 = vector.shape_cast %153 : vector<1x512xi1> to vector<1x512xi1>
    %155 = vector.broadcast %154 : vector<1x512xi1> to vector<8x512xi1>
    %156 = vector.broadcast %cst_68 : f32 to vector<8x512xf32>
    %157 = arith.select %155, %151, %156 : vector<8x512xi1>, vector<8x512xf32>
    %c128_69 = arith.constant 128 : index
    %c0_70 = arith.constant 0 : index
    %158 = vector.load %arg9[%c128_69, %c0_70] : memref<216x512xf32, #tpu.memory_space<vmem>>, vector<8x512xf32>
    tpu.vector_store %arg9[%c128_69, %c0_70], %157 {strides = array<i32>} : memref<216x512xf32, #tpu.memory_space<vmem>>, vector<8x512xf32>,
    %c0_71 = arith.constant 0 : index
    %c137 = arith.constant 137 : index
    %159 = vector.load %arg8[%c0_71, %c137] : memref<8x768xf32, #tpu.memory_space<vmem>>, vector<8x512xf32>
    %160 = arith.andi %10, %18 : vector<1x512xi1>
    %161 = arith.andi %160, %22 : vector<1x512xi1>
    %cst_72 = arith.constant 0.000000e+00 : f32
    %162 = vector.shape_cast %161 : vector<1x512xi1> to vector<1x512xi1>
    %163 = vector.broadcast %162 : vector<1x512xi1> to vector<8x512xi1>
    %164 = vector.broadcast %cst_72 : f32 to vector<8x512xf32>
    %165 = arith.select %163, %159, %164 : vector<8x512xi1>, vector<8x512xf32>
    %c136_73 = arith.constant 136 : index
    %c0_74 = arith.constant 0 : index
    %166 = vector.load %arg9[%c136_73, %c0_74] : memref<216x512xf32, #tpu.memory_space<vmem>>, vector<8x512xf32>
    tpu.vector_store %arg9[%c136_73, %c0_74], %165 {strides = array<i32>} : memref<216x512xf32, #tpu.memory_space<vmem>>, vector<8x512xf32>,
    %c0_75 = arith.constant 0 : index
    %c183 = arith.constant 183 : index
    %167 = vector.load %arg8[%c0_75, %c183] : memref<8x768xf32, #tpu.memory_space<vmem>>, vector<8x512xf32>
    %168 = arith.andi %14, %16 : vector<1x512xi1>
    %169 = arith.andi %168, %20 : vector<1x512xi1>
    %cst_76 = arith.constant 0.000000e+00 : f32
    %170 = vector.shape_cast %169 : vector<1x512xi1> to vector<1x512xi1>
    %171 = vector.broadcast %170 : vector<1x512xi1> to vector<8x512xi1>
    %172 = vector.broadcast %cst_76 : f32 to vector<8x512xf32>
    %173 = arith.select %171, %167, %172 : vector<8x512xi1>, vector<8x512xf32>
    %c144 = arith.constant 144 : index
    %c0_77 = arith.constant 0 : index
    %174 = vector.load %arg9[%c144, %c0_77] : memref<216x512xf32, #tpu.memory_space<vmem>>, vector<8x512xf32>
    tpu.vector_store %arg9[%c144, %c0_77], %173 {strides = array<i32>} : memref<216x512xf32, #tpu.memory_space<vmem>>, vector<8x512xf32>,
    %c0_78 = arith.constant 0 : index
    %c184 = arith.constant 184 : index
    %175 = vector.load %arg8[%c0_78, %c184] : memref<8x768xf32, #tpu.memory_space<vmem>>, vector<8x512xf32>
    %176 = arith.andi %14, %16 : vector<1x512xi1>
    %177 = arith.andi %176, %10 : vector<1x512xi1>
    %cst_79 = arith.constant 0.000000e+00 : f32
    %178 = vector.shape_cast %177 : vector<1x512xi1> to vector<1x512xi1>
    %179 = vector.broadcast %178 : vector<1x512xi1> to vector<8x512xi1>
    %180 = vector.broadcast %cst_79 : f32 to vector<8x512xf32>
    %181 = arith.select %179, %175, %180 : vector<8x512xi1>, vector<8x512xf32>
    %c152 = arith.constant 152 : index
    %c0_80 = arith.constant 0 : index
    %182 = vector.load %arg9[%c152, %c0_80] : memref<216x512xf32, #tpu.memory_space<vmem>>, vector<8x512xf32>
    tpu.vector_store %arg9[%c152, %c0_80], %181 {strides = array<i32>} : memref<216x512xf32, #tpu.memory_space<vmem>>, vector<8x512xf32>,
    %c0_81 = arith.constant 0 : index
    %c185 = arith.constant 185 : index
    %183 = vector.load %arg8[%c0_81, %c185] : memref<8x768xf32, #tpu.memory_space<vmem>>, vector<8x512xf32>
    %184 = arith.andi %14, %16 : vector<1x512xi1>
    %185 = arith.andi %184, %22 : vector<1x512xi1>
    %cst_82 = arith.constant 0.000000e+00 : f32
    %186 = vector.shape_cast %185 : vector<1x512xi1> to vector<1x512xi1>
    %187 = vector.broadcast %186 : vector<1x512xi1> to vector<8x512xi1>
    %188 = vector.broadcast %cst_82 : f32 to vector<8x512xf32>
    %189 = arith.select %187, %183, %188 : vector<8x512xi1>, vector<8x512xf32>
    %c160 = arith.constant 160 : index
    %c0_83 = arith.constant 0 : index
    %190 = vector.load %arg9[%c160, %c0_83] : memref<216x512xf32, #tpu.memory_space<vmem>>, vector<8x512xf32>
    tpu.vector_store %arg9[%c160, %c0_83], %189 {strides = array<i32>} : memref<216x512xf32, #tpu.memory_space<vmem>>, vector<8x512xf32>,
    %c0_84 = arith.constant 0 : index
    %c191 = arith.constant 191 : index
    %191 = vector.load %arg8[%c0_84, %c191] : memref<8x768xf32, #tpu.memory_space<vmem>>, vector<8x512xf32>
    %192 = arith.andi %14, %10 : vector<1x512xi1>
    %193 = arith.andi %192, %20 : vector<1x512xi1>
    %cst_85 = arith.constant 0.000000e+00 : f32
    %194 = vector.shape_cast %193 : vector<1x512xi1> to vector<1x512xi1>
    %195 = vector.broadcast %194 : vector<1x512xi1> to vector<8x512xi1>
    %196 = vector.broadcast %cst_85 : f32 to vector<8x512xf32>
    %197 = arith.select %195, %191, %196 : vector<8x512xi1>, vector<8x512xf32>
    %c168 = arith.constant 168 : index
    %c0_86 = arith.constant 0 : index
    %198 = vector.load %arg9[%c168, %c0_86] : memref<216x512xf32, #tpu.memory_space<vmem>>, vector<8x512xf32>
    tpu.vector_store %arg9[%c168, %c0_86], %197 {strides = array<i32>} : memref<216x512xf32, #tpu.memory_space<vmem>>, vector<8x512xf32>,
    %c0_87 = arith.constant 0 : index
    %c192 = arith.constant 192 : index
    %199 = vector.load %arg8[%c0_87, %c192] : memref<8x768xf32, #tpu.memory_space<vmem>>, vector<8x512xf32>
    %200 = arith.andi %14, %10 : vector<1x512xi1>
    %201 = arith.andi %200, %10 : vector<1x512xi1>
    %cst_88 = arith.constant 0.000000e+00 : f32
    %202 = vector.shape_cast %201 : vector<1x512xi1> to vector<1x512xi1>
    %203 = vector.broadcast %202 : vector<1x512xi1> to vector<8x512xi1>
    %204 = vector.broadcast %cst_88 : f32 to vector<8x512xf32>
    %205 = arith.select %203, %199, %204 : vector<8x512xi1>, vector<8x512xf32>
    %c176 = arith.constant 176 : index
    %c0_89 = arith.constant 0 : index
    %206 = vector.load %arg9[%c176, %c0_89] : memref<216x512xf32, #tpu.memory_space<vmem>>, vector<8x512xf32>
    tpu.vector_store %arg9[%c176, %c0_89], %205 {strides = array<i32>} : memref<216x512xf32, #tpu.memory_space<vmem>>, vector<8x512xf32>,
    %c0_90 = arith.constant 0 : index
    %c193 = arith.constant 193 : index
    %207 = vector.load %arg8[%c0_90, %c193] : memref<8x768xf32, #tpu.memory_space<vmem>>, vector<8x512xf32>
    %208 = arith.andi %14, %10 : vector<1x512xi1>
    %209 = arith.andi %208, %22 : vector<1x512xi1>
    %cst_91 = arith.constant 0.000000e+00 : f32
    %210 = vector.shape_cast %209 : vector<1x512xi1> to vector<1x512xi1>
    %211 = vector.broadcast %210 : vector<1x512xi1> to vector<8x512xi1>
    %212 = vector.broadcast %cst_91 : f32 to vector<8x512xf32>
    %213 = arith.select %211, %207, %212 : vector<8x512xi1>, vector<8x512xf32>
    %c184_92 = arith.constant 184 : index
    %c0_93 = arith.constant 0 : index
    %214 = vector.load %arg9[%c184_92, %c0_93] : memref<216x512xf32, #tpu.memory_space<vmem>>, vector<8x512xf32>
    tpu.vector_store %arg9[%c184_92, %c0_93], %213 {strides = array<i32>} : memref<216x512xf32, #tpu.memory_space<vmem>>, vector<8x512xf32>,
    %c0_94 = arith.constant 0 : index
    %c199 = arith.constant 199 : index
    %215 = vector.load %arg8[%c0_94, %c199] : memref<8x768xf32, #tpu.memory_space<vmem>>, vector<8x512xf32>
    %216 = arith.andi %14, %18 : vector<1x512xi1>
    %217 = arith.andi %216, %20 : vector<1x512xi1>
    %cst_95 = arith.constant 0.000000e+00 : f32
    %218 = vector.shape_cast %217 : vector<1x512xi1> to vector<1x512xi1>
    %219 = vector.broadcast %218 : vector<1x512xi1> to vector<8x512xi1>
    %220 = vector.broadcast %cst_95 : f32 to vector<8x512xf32>
    %221 = arith.select %219, %215, %220 : vector<8x512xi1>, vector<8x512xf32>
    %c192_96 = arith.constant 192 : index
    %c0_97 = arith.constant 0 : index
    %222 = vector.load %arg9[%c192_96, %c0_97] : memref<216x512xf32, #tpu.memory_space<vmem>>, vector<8x512xf32>
    tpu.vector_store %arg9[%c192_96, %c0_97], %221 {strides = array<i32>} : memref<216x512xf32, #tpu.memory_space<vmem>>, vector<8x512xf32>,
    %c0_98 = arith.constant 0 : index
    %c200 = arith.constant 200 : index
    %223 = vector.load %arg8[%c0_98, %c200] : memref<8x768xf32, #tpu.memory_space<vmem>>, vector<8x512xf32>
    %224 = arith.andi %14, %18 : vector<1x512xi1>
    %225 = arith.andi %224, %10 : vector<1x512xi1>
    %cst_99 = arith.constant 0.000000e+00 : f32
    %226 = vector.shape_cast %225 : vector<1x512xi1> to vector<1x512xi1>
    %227 = vector.broadcast %226 : vector<1x512xi1> to vector<8x512xi1>
    %228 = vector.broadcast %cst_99 : f32 to vector<8x512xf32>
    %229 = arith.select %227, %223, %228 : vector<8x512xi1>, vector<8x512xf32>
    %c200_100 = arith.constant 200 : index
    %c0_101 = arith.constant 0 : index
    %230 = vector.load %arg9[%c200_100, %c0_101] : memref<216x512xf32, #tpu.memory_space<vmem>>, vector<8x512xf32>
    tpu.vector_store %arg9[%c200_100, %c0_101], %229 {strides = array<i32>} : memref<216x512xf32, #tpu.memory_space<vmem>>, vector<8x512xf32>,
    %c0_102 = arith.constant 0 : index
    %c201 = arith.constant 201 : index
    %231 = vector.load %arg8[%c0_102, %c201] : memref<8x768xf32, #tpu.memory_space<vmem>>, vector<8x512xf32>
    %232 = arith.andi %14, %18 : vector<1x512xi1>
    %233 = arith.andi %232, %22 : vector<1x512xi1>
    %cst_103 = arith.constant 0.000000e+00 : f32
    %234 = vector.shape_cast %233 : vector<1x512xi1> to vector<1x512xi1>
    %235 = vector.broadcast %234 : vector<1x512xi1> to vector<8x512xi1>
    %236 = vector.broadcast %cst_103 : f32 to vector<8x512xf32>
    %237 = arith.select %235, %231, %236 : vector<8x512xi1>, vector<8x512xf32>
    %c208 = arith.constant 208 : index
    %c0_104 = arith.constant 0 : index
    %238 = vector.load %arg9[%c208, %c0_104] : memref<216x512xf32, #tpu.memory_space<vmem>>, vector<8x512xf32>
    tpu.vector_store %arg9[%c208, %c0_104], %237 {strides = array<i32>} : memref<216x512xf32, #tpu.memory_space<vmem>>, vector<8x512xf32>,
    %c0_105 = arith.constant 0 : index
    %c0_106 = arith.constant 0 : index
    %239 = vector.load %arg2[%c0_105, %c0_106] : memref<8x216xf32, #tpu.memory_space<vmem>>, vector<8x216xf32>
    %c0_107 = arith.constant 0 : index
    %c0_108 = arith.constant 0 : index
    %240 = vector.load %arg9[%c0_107, %c0_108] : memref<216x512xf32, #tpu.memory_space<vmem>>, vector<216x512xf32>
    %cst_109 = arith.constant dense<0.000000e+00> : vector<8x512xf32>
    %241 = tpu.matmul %239, %240, %cst_109 {dimension_numbers = #tpu.dot_dimension_numbers<[1], [0], [0], [1], [0, 0, 1, 1], [], []>} : vector<8x216xf32>, vector<216x512xf32>, vector<8x512xf32> -> vector<8x512xf32>
    %c0_110 = arith.constant 0 : index
    %c0_111 = arith.constant 0 : index
    %242 = vector.load %arg3[%c0_110, %c0_111] : memref<8x1xf32, #tpu.memory_space<vmem>>, vector<8x1xf32>
    %243 = vector.broadcast %242 : vector<8x1xf32> to vector<8x512xf32>
    %244 = arith.addf %241, %243 : vector<8x512xf32>
    %c0_112 = arith.constant 0 : index
    %c0_113 = arith.constant 0 : index
    %245 = vector.load %arg5[%c0_112, %c0_113] : memref<8x512xf32, #tpu.memory_space<vmem>>, vector<8x512xf32>
    tpu.vector_store %arg5[%c0_112, %c0_113], %244 {strides = array<i32>} : memref<8x512xf32, #tpu.memory_space<vmem>>, vector<8x512xf32>,
    %cst_114 = arith.constant dense<0.000000e+00> : vector<8xf32>
    %246 = vector.multi_reduction <add>, %244, %cst_114 [1] : vector<8x512xf32> to vector<8xf32>
    %247 = vector.shape_cast %246 : vector<8xf32> to vector<8x1xf32>
    %c0_115 = arith.constant 0 : index
    %c0_116 = arith.constant 0 : index
    %c0_117 = arith.constant 0 : index
    %248 = vector.load %arg6[%c0_115, %c0_116, %c0_117] : memref<1x8x1xf32, #tpu.memory_space<vmem>>, vector<1x8x1xf32>
    %249 = vector.shape_cast %248 : vector<1x8x1xf32> to vector<8x1xf32>
    %250 = vector.shape_cast %247 : vector<8x1xf32> to vector<1x8x1xf32>
    tpu.vector_store %arg6[%c0_115, %c0_116, %c0_117], %250 {strides = array<i32>} : memref<1x8x1xf32, #tpu.memory_space<vmem>>, vector<1x8x1xf32>,
    %251 = arith.mulf %244, %244 : vector<8x512xf32>
    %cst_118 = arith.constant dense<0.000000e+00> : vector<8xf32>
    %252 = vector.multi_reduction <add>, %251, %cst_118 [1] : vector<8x512xf32> to vector<8xf32>
    %253 = vector.shape_cast %252 : vector<8xf32> to vector<8x1xf32>
    %c0_119 = arith.constant 0 : index
    %c0_120 = arith.constant 0 : index
    %c0_121 = arith.constant 0 : index
    %254 = vector.load %arg7[%c0_119, %c0_120, %c0_121] : memref<1x8x1xf32, #tpu.memory_space<vmem>>, vector<1x8x1xf32>
    %255 = vector.shape_cast %254 : vector<1x8x1xf32> to vector<8x1xf32>
    %256 = vector.shape_cast %253 : vector<8x1xf32> to vector<1x8x1xf32>
    tpu.vector_store %arg7[%c0_119, %c0_120, %c0_121], %256 {strides = array<i32>} : memref<1x8x1xf32, #tpu.memory_space<vmem>>, vector<1x8x1xf32>,
    return
  }
  func.func @transform_0(%arg0: i32) -> (i32, i32) {
    %c0_i32 = arith.constant 0 : i32
    %c0_i32_0 = arith.constant 0 : i32
    return %c0_i32, %arg0 : i32, i32
  }
  func.func @transform_1(%arg0: i32) -> (i32, i32) {
    %c0_i32 = arith.constant 0 : i32
    %c0_i32_0 = arith.constant 0 : i32
    %c0_i32_1 = arith.constant 0 : i32
    return %c0_i32, %c0_i32_0 : i32, i32
  }
  func.func @transform_2(%arg0: i32) -> (i32, i32) {
    %c0_i32 = arith.constant 0 : i32
    %c0_i32_0 = arith.constant 0 : i32
    %c0_i32_1 = arith.constant 0 : i32
    return %c0_i32, %c0_i32_0 : i32, i32
  }
  func.func @transform_3(%arg0: i32) -> (i32, i32) {
    %c0_i32 = arith.constant 0 : i32
    %c0_i32_0 = arith.constant 0 : i32
    return %c0_i32, %arg0 : i32, i32
  }
  func.func @transform_4(%arg0: i32) -> (i32, i32) {
    %c0_i32 = arith.constant 0 : i32
    %c0_i32_0 = arith.constant 0 : i32
    return %c0_i32, %arg0 : i32, i32
  }
  func.func @transform_5(%arg0: i32) -> (i32, i32, i32) {
    %c0_i32 = arith.constant 0 : i32
    %c0_i32_0 = arith.constant 0 : i32
    %c0_i32_1 = arith.constant 0 : i32
    return %arg0, %c0_i32, %c0_i32_0 : i32, i32, i32
  }
  func.func @transform_6(%arg0: i32) -> (i32, i32, i32) {
    %c0_i32 = arith.constant 0 : i32
    %c0_i32_0 = arith.constant 0 : i32
    %c0_i32_1 = arith.constant 0 : i32
    return %arg0, %c0_i32, %c0_i32_0 : i32, i32, i32
  }
}

module attributes {stable_mosaic.version = 11 : i64} {
  func.func @_conv_kernel(%arg0: i32, %arg1: memref<8x512xf32, #tpu.memory_space<vmem>>, %arg2: memref<8x216xf32, #tpu.memory_space<vmem>>, %arg3: memref<8x1xf32, #tpu.memory_space<vmem>>, %arg4: memref<8x512xi32, #tpu.memory_space<vmem>>, %arg5: memref<8x1xf32, #tpu.memory_space<vmem>>, %arg6: memref<8x1xf32, #tpu.memory_space<vmem>>, %arg7: memref<8x512xf32, #tpu.memory_space<vmem>>, %arg8: memref<1x8x1xf32, #tpu.memory_space<vmem>>, %arg9: memref<1x8x1xf32, #tpu.memory_space<vmem>>, %arg10: memref<8x768xf32, #tpu.memory_space<vmem>>, %arg11: memref<216x512xf32, #tpu.memory_space<vmem>>) attributes {dimension_semantics = [#tpu.dimension_semantics<parallel>], iteration_bounds = array<i64: 1>, scalar_prefetch = 0 : i64, scratch_operands = 2 : i64, tpu.core_type = #tpu.core_type<tc>, window_params = [{transform_indices = @transform_0, window_bounds = array<i64: 8, 512>}, {pipeline_mode = #tpu.pipeline_mode<synchronous>, transform_indices = @transform_1, window_bounds = array<i64: 8, 216>}, {pipeline_mode = #tpu.pipeline_mode<synchronous>, transform_indices = @transform_2, window_bounds = array<i64: 8, 1>}, {transform_indices = @transform_3, window_bounds = array<i64: 8, 512>}, {pipeline_mode = #tpu.pipeline_mode<synchronous>, transform_indices = @transform_4, window_bounds = array<i64: 8, 1>}, {pipeline_mode = #tpu.pipeline_mode<synchronous>, transform_indices = @transform_5, window_bounds = array<i64: 8, 1>}, {transform_indices = @transform_6, window_bounds = array<i64: 8, 512>}, {transform_indices = @transform_7, window_bounds = array<i64: 1, 8, 1>}, {transform_indices = @transform_8, window_bounds = array<i64: 1, 8, 1>}]} {
    %c0 = arith.constant 0 : index
    %c0_0 = arith.constant 0 : index
    %0 = vector.load %arg1[%c0, %c0_0] : memref<8x512xf32, #tpu.memory_space<vmem>>, vector<8x512xf32>
    %c0_1 = arith.constant 0 : index
    %c0_2 = arith.constant 0 : index
    %1 = vector.load %arg5[%c0_1, %c0_2] : memref<8x1xf32, #tpu.memory_space<vmem>>, vector<8x1xf32>
    %2 = vector.broadcast %1 : vector<8x1xf32> to vector<8x512xf32>
    %3 = arith.mulf %0, %2 : vector<8x512xf32>
    %c0_3 = arith.constant 0 : index
    %c0_4 = arith.constant 0 : index
    %4 = vector.load %arg6[%c0_3, %c0_4] : memref<8x1xf32, #tpu.memory_space<vmem>>, vector<8x1xf32>
    %5 = vector.broadcast %4 : vector<8x1xf32> to vector<8x512xf32>
    %6 = arith.addf %3, %5 : vector<8x512xf32>
    %cst = arith.constant 0.000000e+00 : f32
    %7 = vector.broadcast %cst : f32 to vector<8x512xf32>
    %8 = arith.maximumf %6, %7 : vector<8x512xf32>
    %cst_5 = arith.constant 0.000000e+00 : f32
    %9 = vector.broadcast %cst_5 : f32 to vector<8x128xf32>
    %c0_6 = arith.constant 0 : index
    %c0_7 = arith.constant 0 : index
    %10 = vector.load %arg10[%c0_6, %c0_7] : memref<8x768xf32, #tpu.memory_space<vmem>>, vector<8x128xf32>
    tpu.vector_store %arg10[%c0_6, %c0_7], %9 {strides = array<i32>} : memref<8x768xf32, #tpu.memory_space<vmem>>, vector<8x128xf32>,
    %cst_8 = arith.constant 0.000000e+00 : f32
    %11 = vector.broadcast %cst_8 : f32 to vector<8x128xf32>
    %c0_9 = arith.constant 0 : index
    %c640 = arith.constant 640 : index
    %12 = vector.load %arg10[%c0_9, %c640] : memref<8x768xf32, #tpu.memory_space<vmem>>, vector<8x128xf32>
    tpu.vector_store %arg10[%c0_9, %c640], %11 {strides = array<i32>} : memref<8x768xf32, #tpu.memory_space<vmem>>, vector<8x128xf32>,
    %c0_10 = arith.constant 0 : index
    %c128 = arith.constant 128 : index
    %13 = vector.load %arg10[%c0_10, %c128] : memref<8x768xf32, #tpu.memory_space<vmem>>, vector<8x512xf32>
    tpu.vector_store %arg10[%c0_10, %c128], %8 {strides = array<i32>} : memref<8x768xf32, #tpu.memory_space<vmem>>, vector<8x512xf32>,
    %c0_11 = arith.constant 0 : index
    %c0_12 = arith.constant 0 : index
    %14 = vector.load %arg4[%c0_11, %c0_12] : memref<8x512xi32, #tpu.memory_space<vmem>>, vector<1x512xi32>
    %c1 = arith.constant 1 : index
    %c0_13 = arith.constant 0 : index
    %15 = vector.load %arg4[%c1, %c0_13] : memref<8x512xi32, #tpu.memory_space<vmem>>, vector<1x512xi32>
    %c2 = arith.constant 2 : index
    %c0_14 = arith.constant 0 : index
    %16 = vector.load %arg4[%c2, %c0_14] : memref<8x512xi32, #tpu.memory_space<vmem>>, vector<1x512xi32>
    %c0_i32 = arith.constant 0 : i32
    %17 = vector.broadcast %c0_i32 : i32 to vector<1x512xi32>
    %18 = arith.cmpi sge, %14, %17 : vector<1x512xi32>
    %c1_i32 = arith.constant 1 : i32
    %19 = vector.broadcast %c1_i32 : i32 to vector<1x512xi32>
    %20 = arith.cmpi sge, %14, %19 : vector<1x512xi32>
    %c2_i32 = arith.constant 2 : i32
    %21 = vector.broadcast %c2_i32 : i32 to vector<1x512xi32>
    %22 = arith.cmpi sle, %14, %21 : vector<1x512xi32>
    %c1_i32_15 = arith.constant 1 : i32
    %23 = vector.broadcast %c1_i32_15 : i32 to vector<1x512xi32>
    %24 = arith.cmpi sge, %15, %23 : vector<1x512xi32>
    %c6_i32 = arith.constant 6 : i32
    %25 = vector.broadcast %c6_i32 : i32 to vector<1x512xi32>
    %26 = arith.cmpi sle, %15, %25 : vector<1x512xi32>
    %c1_i32_16 = arith.constant 1 : i32
    %27 = vector.broadcast %c1_i32_16 : i32 to vector<1x512xi32>
    %28 = arith.cmpi sge, %16, %27 : vector<1x512xi32>
    %c6_i32_17 = arith.constant 6 : i32
    %29 = vector.broadcast %c6_i32_17 : i32 to vector<1x512xi32>
    %30 = arith.cmpi sle, %16, %29 : vector<1x512xi32>
    %c0_18 = arith.constant 0 : index
    %c55 = arith.constant 55 : index
    %31 = vector.load %arg10[%c0_18, %c55] : memref<8x768xf32, #tpu.memory_space<vmem>>, vector<8x512xf32>
    %32 = arith.andi %20, %24 : vector<1x512xi1>
    %33 = arith.andi %32, %28 : vector<1x512xi1>
    %cst_19 = arith.constant 0.000000e+00 : f32
    %34 = vector.shape_cast %33 : vector<1x512xi1> to vector<1x512xi1>
    %35 = vector.broadcast %34 : vector<1x512xi1> to vector<8x512xi1>
    %36 = vector.broadcast %cst_19 : f32 to vector<8x512xf32>
    %37 = arith.select %35, %31, %36 : vector<8x512xi1>, vector<8x512xf32>
    %c0_20 = arith.constant 0 : index
    %c0_21 = arith.constant 0 : index
    %38 = vector.load %arg11[%c0_20, %c0_21] : memref<216x512xf32, #tpu.memory_space<vmem>>, vector<8x512xf32>
    tpu.vector_store %arg11[%c0_20, %c0_21], %37 {strides = array<i32>} : memref<216x512xf32, #tpu.memory_space<vmem>>, vector<8x512xf32>,
    %c0_22 = arith.constant 0 : index
    %c56 = arith.constant 56 : index
    %39 = vector.load %arg10[%c0_22, %c56] : memref<8x768xf32, #tpu.memory_space<vmem>>, vector<8x512xf32>
    %40 = arith.andi %20, %24 : vector<1x512xi1>
    %41 = arith.andi %40, %18 : vector<1x512xi1>
    %cst_23 = arith.constant 0.000000e+00 : f32
    %42 = vector.shape_cast %41 : vector<1x512xi1> to vector<1x512xi1>
    %43 = vector.broadcast %42 : vector<1x512xi1> to vector<8x512xi1>
    %44 = vector.broadcast %cst_23 : f32 to vector<8x512xf32>
    %45 = arith.select %43, %39, %44 : vector<8x512xi1>, vector<8x512xf32>
    %c8 = arith.constant 8 : index
    %c0_24 = arith.constant 0 : index
    %46 = vector.load %arg11[%c8, %c0_24] : memref<216x512xf32, #tpu.memory_space<vmem>>, vector<8x512xf32>
    tpu.vector_store %arg11[%c8, %c0_24], %45 {strides = array<i32>} : memref<216x512xf32, #tpu.memory_space<vmem>>, vector<8x512xf32>,
    %c0_25 = arith.constant 0 : index
    %c57 = arith.constant 57 : index
    %47 = vector.load %arg10[%c0_25, %c57] : memref<8x768xf32, #tpu.memory_space<vmem>>, vector<8x512xf32>
    %48 = arith.andi %20, %24 : vector<1x512xi1>
    %49 = arith.andi %48, %30 : vector<1x512xi1>
    %cst_26 = arith.constant 0.000000e+00 : f32
    %50 = vector.shape_cast %49 : vector<1x512xi1> to vector<1x512xi1>
    %51 = vector.broadcast %50 : vector<1x512xi1> to vector<8x512xi1>
    %52 = vector.broadcast %cst_26 : f32 to vector<8x512xf32>
    %53 = arith.select %51, %47, %52 : vector<8x512xi1>, vector<8x512xf32>
    %c16 = arith.constant 16 : index
    %c0_27 = arith.constant 0 : index
    %54 = vector.load %arg11[%c16, %c0_27] : memref<216x512xf32, #tpu.memory_space<vmem>>, vector<8x512xf32>
    tpu.vector_store %arg11[%c16, %c0_27], %53 {strides = array<i32>} : memref<216x512xf32, #tpu.memory_space<vmem>>, vector<8x512xf32>,
    %c0_28 = arith.constant 0 : index
    %c63 = arith.constant 63 : index
    %55 = vector.load %arg10[%c0_28, %c63] : memref<8x768xf32, #tpu.memory_space<vmem>>, vector<8x512xf32>
    %56 = arith.andi %20, %18 : vector<1x512xi1>
    %57 = arith.andi %56, %28 : vector<1x512xi1>
    %cst_29 = arith.constant 0.000000e+00 : f32
    %58 = vector.shape_cast %57 : vector<1x512xi1> to vector<1x512xi1>
    %59 = vector.broadcast %58 : vector<1x512xi1> to vector<8x512xi1>
    %60 = vector.broadcast %cst_29 : f32 to vector<8x512xf32>
    %61 = arith.select %59, %55, %60 : vector<8x512xi1>, vector<8x512xf32>
    %c24 = arith.constant 24 : index
    %c0_30 = arith.constant 0 : index
    %62 = vector.load %arg11[%c24, %c0_30] : memref<216x512xf32, #tpu.memory_space<vmem>>, vector<8x512xf32>
    tpu.vector_store %arg11[%c24, %c0_30], %61 {strides = array<i32>} : memref<216x512xf32, #tpu.memory_space<vmem>>, vector<8x512xf32>,
    %c0_31 = arith.constant 0 : index
    %c64 = arith.constant 64 : index
    %63 = vector.load %arg10[%c0_31, %c64] : memref<8x768xf32, #tpu.memory_space<vmem>>, vector<8x512xf32>
    %64 = arith.andi %20, %18 : vector<1x512xi1>
    %65 = arith.andi %64, %18 : vector<1x512xi1>
    %cst_32 = arith.constant 0.000000e+00 : f32
    %66 = vector.shape_cast %65 : vector<1x512xi1> to vector<1x512xi1>
    %67 = vector.broadcast %66 : vector<1x512xi1> to vector<8x512xi1>
    %68 = vector.broadcast %cst_32 : f32 to vector<8x512xf32>
    %69 = arith.select %67, %63, %68 : vector<8x512xi1>, vector<8x512xf32>
    %c32 = arith.constant 32 : index
    %c0_33 = arith.constant 0 : index
    %70 = vector.load %arg11[%c32, %c0_33] : memref<216x512xf32, #tpu.memory_space<vmem>>, vector<8x512xf32>
    tpu.vector_store %arg11[%c32, %c0_33], %69 {strides = array<i32>} : memref<216x512xf32, #tpu.memory_space<vmem>>, vector<8x512xf32>,
    %c0_34 = arith.constant 0 : index
    %c65 = arith.constant 65 : index
    %71 = vector.load %arg10[%c0_34, %c65] : memref<8x768xf32, #tpu.memory_space<vmem>>, vector<8x512xf32>
    %72 = arith.andi %20, %18 : vector<1x512xi1>
    %73 = arith.andi %72, %30 : vector<1x512xi1>
    %cst_35 = arith.constant 0.000000e+00 : f32
    %74 = vector.shape_cast %73 : vector<1x512xi1> to vector<1x512xi1>
    %75 = vector.broadcast %74 : vector<1x512xi1> to vector<8x512xi1>
    %76 = vector.broadcast %cst_35 : f32 to vector<8x512xf32>
    %77 = arith.select %75, %71, %76 : vector<8x512xi1>, vector<8x512xf32>
    %c40 = arith.constant 40 : index
    %c0_36 = arith.constant 0 : index
    %78 = vector.load %arg11[%c40, %c0_36] : memref<216x512xf32, #tpu.memory_space<vmem>>, vector<8x512xf32>
    tpu.vector_store %arg11[%c40, %c0_36], %77 {strides = array<i32>} : memref<216x512xf32, #tpu.memory_space<vmem>>, vector<8x512xf32>,
    %c0_37 = arith.constant 0 : index
    %c71 = arith.constant 71 : index
    %79 = vector.load %arg10[%c0_37, %c71] : memref<8x768xf32, #tpu.memory_space<vmem>>, vector<8x512xf32>
    %80 = arith.andi %20, %26 : vector<1x512xi1>
    %81 = arith.andi %80, %28 : vector<1x512xi1>
    %cst_38 = arith.constant 0.000000e+00 : f32
    %82 = vector.shape_cast %81 : vector<1x512xi1> to vector<1x512xi1>
    %83 = vector.broadcast %82 : vector<1x512xi1> to vector<8x512xi1>
    %84 = vector.broadcast %cst_38 : f32 to vector<8x512xf32>
    %85 = arith.select %83, %79, %84 : vector<8x512xi1>, vector<8x512xf32>
    %c48 = arith.constant 48 : index
    %c0_39 = arith.constant 0 : index
    %86 = vector.load %arg11[%c48, %c0_39] : memref<216x512xf32, #tpu.memory_space<vmem>>, vector<8x512xf32>
    tpu.vector_store %arg11[%c48, %c0_39], %85 {strides = array<i32>} : memref<216x512xf32, #tpu.memory_space<vmem>>, vector<8x512xf32>,
    %c0_40 = arith.constant 0 : index
    %c72 = arith.constant 72 : index
    %87 = vector.load %arg10[%c0_40, %c72] : memref<8x768xf32, #tpu.memory_space<vmem>>, vector<8x512xf32>
    %88 = arith.andi %20, %26 : vector<1x512xi1>
    %89 = arith.andi %88, %18 : vector<1x512xi1>
    %cst_41 = arith.constant 0.000000e+00 : f32
    %90 = vector.shape_cast %89 : vector<1x512xi1> to vector<1x512xi1>
    %91 = vector.broadcast %90 : vector<1x512xi1> to vector<8x512xi1>
    %92 = vector.broadcast %cst_41 : f32 to vector<8x512xf32>
    %93 = arith.select %91, %87, %92 : vector<8x512xi1>, vector<8x512xf32>
    %c56_42 = arith.constant 56 : index
    %c0_43 = arith.constant 0 : index
    %94 = vector.load %arg11[%c56_42, %c0_43] : memref<216x512xf32, #tpu.memory_space<vmem>>, vector<8x512xf32>
    tpu.vector_store %arg11[%c56_42, %c0_43], %93 {strides = array<i32>} : memref<216x512xf32, #tpu.memory_space<vmem>>, vector<8x512xf32>,
    %c0_44 = arith.constant 0 : index
    %c73 = arith.constant 73 : index
    %95 = vector.load %arg10[%c0_44, %c73] : memref<8x768xf32, #tpu.memory_space<vmem>>, vector<8x512xf32>
    %96 = arith.andi %20, %26 : vector<1x512xi1>
    %97 = arith.andi %96, %30 : vector<1x512xi1>
    %cst_45 = arith.constant 0.000000e+00 : f32
    %98 = vector.shape_cast %97 : vector<1x512xi1> to vector<1x512xi1>
    %99 = vector.broadcast %98 : vector<1x512xi1> to vector<8x512xi1>
    %100 = vector.broadcast %cst_45 : f32 to vector<8x512xf32>
    %101 = arith.select %99, %95, %100 : vector<8x512xi1>, vector<8x512xf32>
    %c64_46 = arith.constant 64 : index
    %c0_47 = arith.constant 0 : index
    %102 = vector.load %arg11[%c64_46, %c0_47] : memref<216x512xf32, #tpu.memory_space<vmem>>, vector<8x512xf32>
    tpu.vector_store %arg11[%c64_46, %c0_47], %101 {strides = array<i32>} : memref<216x512xf32, #tpu.memory_space<vmem>>, vector<8x512xf32>,
    %c0_48 = arith.constant 0 : index
    %c119 = arith.constant 119 : index
    %103 = vector.load %arg10[%c0_48, %c119] : memref<8x768xf32, #tpu.memory_space<vmem>>, vector<8x512xf32>
    %104 = arith.andi %18, %24 : vector<1x512xi1>
    %105 = arith.andi %104, %28 : vector<1x512xi1>
    %cst_49 = arith.constant 0.000000e+00 : f32
    %106 = vector.shape_cast %105 : vector<1x512xi1> to vector<1x512xi1>
    %107 = vector.broadcast %106 : vector<1x512xi1> to vector<8x512xi1>
    %108 = vector.broadcast %cst_49 : f32 to vector<8x512xf32>
    %109 = arith.select %107, %103, %108 : vector<8x512xi1>, vector<8x512xf32>
    %c72_50 = arith.constant 72 : index
    %c0_51 = arith.constant 0 : index
    %110 = vector.load %arg11[%c72_50, %c0_51] : memref<216x512xf32, #tpu.memory_space<vmem>>, vector<8x512xf32>
    tpu.vector_store %arg11[%c72_50, %c0_51], %109 {strides = array<i32>} : memref<216x512xf32, #tpu.memory_space<vmem>>, vector<8x512xf32>,
    %c0_52 = arith.constant 0 : index
    %c120 = arith.constant 120 : index
    %111 = vector.load %arg10[%c0_52, %c120] : memref<8x768xf32, #tpu.memory_space<vmem>>, vector<8x512xf32>
    %112 = arith.andi %18, %24 : vector<1x512xi1>
    %113 = arith.andi %112, %18 : vector<1x512xi1>
    %cst_53 = arith.constant 0.000000e+00 : f32
    %114 = vector.shape_cast %113 : vector<1x512xi1> to vector<1x512xi1>
    %115 = vector.broadcast %114 : vector<1x512xi1> to vector<8x512xi1>
    %116 = vector.broadcast %cst_53 : f32 to vector<8x512xf32>
    %117 = arith.select %115, %111, %116 : vector<8x512xi1>, vector<8x512xf32>
    %c80 = arith.constant 80 : index
    %c0_54 = arith.constant 0 : index
    %118 = vector.load %arg11[%c80, %c0_54] : memref<216x512xf32, #tpu.memory_space<vmem>>, vector<8x512xf32>
    tpu.vector_store %arg11[%c80, %c0_54], %117 {strides = array<i32>} : memref<216x512xf32, #tpu.memory_space<vmem>>, vector<8x512xf32>,
    %c0_55 = arith.constant 0 : index
    %c121 = arith.constant 121 : index
    %119 = vector.load %arg10[%c0_55, %c121] : memref<8x768xf32, #tpu.memory_space<vmem>>, vector<8x512xf32>
    %120 = arith.andi %18, %24 : vector<1x512xi1>
    %121 = arith.andi %120, %30 : vector<1x512xi1>
    %cst_56 = arith.constant 0.000000e+00 : f32
    %122 = vector.shape_cast %121 : vector<1x512xi1> to vector<1x512xi1>
    %123 = vector.broadcast %122 : vector<1x512xi1> to vector<8x512xi1>
    %124 = vector.broadcast %cst_56 : f32 to vector<8x512xf32>
    %125 = arith.select %123, %119, %124 : vector<8x512xi1>, vector<8x512xf32>
    %c88 = arith.constant 88 : index
    %c0_57 = arith.constant 0 : index
    %126 = vector.load %arg11[%c88, %c0_57] : memref<216x512xf32, #tpu.memory_space<vmem>>, vector<8x512xf32>
    tpu.vector_store %arg11[%c88, %c0_57], %125 {strides = array<i32>} : memref<216x512xf32, #tpu.memory_space<vmem>>, vector<8x512xf32>,
    %c0_58 = arith.constant 0 : index
    %c127 = arith.constant 127 : index
    %127 = vector.load %arg10[%c0_58, %c127] : memref<8x768xf32, #tpu.memory_space<vmem>>, vector<8x512xf32>
    %128 = arith.andi %18, %18 : vector<1x512xi1>
    %129 = arith.andi %128, %28 : vector<1x512xi1>
    %cst_59 = arith.constant 0.000000e+00 : f32
    %130 = vector.shape_cast %129 : vector<1x512xi1> to vector<1x512xi1>
    %131 = vector.broadcast %130 : vector<1x512xi1> to vector<8x512xi1>
    %132 = vector.broadcast %cst_59 : f32 to vector<8x512xf32>
    %133 = arith.select %131, %127, %132 : vector<8x512xi1>, vector<8x512xf32>
    %c96 = arith.constant 96 : index
    %c0_60 = arith.constant 0 : index
    %134 = vector.load %arg11[%c96, %c0_60] : memref<216x512xf32, #tpu.memory_space<vmem>>, vector<8x512xf32>
    tpu.vector_store %arg11[%c96, %c0_60], %133 {strides = array<i32>} : memref<216x512xf32, #tpu.memory_space<vmem>>, vector<8x512xf32>,
    %c0_61 = arith.constant 0 : index
    %c128_62 = arith.constant 128 : index
    %135 = vector.load %arg10[%c0_61, %c128_62] : memref<8x768xf32, #tpu.memory_space<vmem>>, vector<8x512xf32>
    %136 = arith.andi %18, %18 : vector<1x512xi1>
    %137 = arith.andi %136, %18 : vector<1x512xi1>
    %cst_63 = arith.constant 0.000000e+00 : f32
    %138 = vector.shape_cast %137 : vector<1x512xi1> to vector<1x512xi1>
    %139 = vector.broadcast %138 : vector<1x512xi1> to vector<8x512xi1>
    %140 = vector.broadcast %cst_63 : f32 to vector<8x512xf32>
    %141 = arith.select %139, %135, %140 : vector<8x512xi1>, vector<8x512xf32>
    %c104 = arith.constant 104 : index
    %c0_64 = arith.constant 0 : index
    %142 = vector.load %arg11[%c104, %c0_64] : memref<216x512xf32, #tpu.memory_space<vmem>>, vector<8x512xf32>
    tpu.vector_store %arg11[%c104, %c0_64], %141 {strides = array<i32>} : memref<216x512xf32, #tpu.memory_space<vmem>>, vector<8x512xf32>,
    %c0_65 = arith.constant 0 : index
    %c129 = arith.constant 129 : index
    %143 = vector.load %arg10[%c0_65, %c129] : memref<8x768xf32, #tpu.memory_space<vmem>>, vector<8x512xf32>
    %144 = arith.andi %18, %18 : vector<1x512xi1>
    %145 = arith.andi %144, %30 : vector<1x512xi1>
    %cst_66 = arith.constant 0.000000e+00 : f32
    %146 = vector.shape_cast %145 : vector<1x512xi1> to vector<1x512xi1>
    %147 = vector.broadcast %146 : vector<1x512xi1> to vector<8x512xi1>
    %148 = vector.broadcast %cst_66 : f32 to vector<8x512xf32>
    %149 = arith.select %147, %143, %148 : vector<8x512xi1>, vector<8x512xf32>
    %c112 = arith.constant 112 : index
    %c0_67 = arith.constant 0 : index
    %150 = vector.load %arg11[%c112, %c0_67] : memref<216x512xf32, #tpu.memory_space<vmem>>, vector<8x512xf32>
    tpu.vector_store %arg11[%c112, %c0_67], %149 {strides = array<i32>} : memref<216x512xf32, #tpu.memory_space<vmem>>, vector<8x512xf32>,
    %c0_68 = arith.constant 0 : index
    %c135 = arith.constant 135 : index
    %151 = vector.load %arg10[%c0_68, %c135] : memref<8x768xf32, #tpu.memory_space<vmem>>, vector<8x512xf32>
    %152 = arith.andi %18, %26 : vector<1x512xi1>
    %153 = arith.andi %152, %28 : vector<1x512xi1>
    %cst_69 = arith.constant 0.000000e+00 : f32
    %154 = vector.shape_cast %153 : vector<1x512xi1> to vector<1x512xi1>
    %155 = vector.broadcast %154 : vector<1x512xi1> to vector<8x512xi1>
    %156 = vector.broadcast %cst_69 : f32 to vector<8x512xf32>
    %157 = arith.select %155, %151, %156 : vector<8x512xi1>, vector<8x512xf32>
    %c120_70 = arith.constant 120 : index
    %c0_71 = arith.constant 0 : index
    %158 = vector.load %arg11[%c120_70, %c0_71] : memref<216x512xf32, #tpu.memory_space<vmem>>, vector<8x512xf32>
    tpu.vector_store %arg11[%c120_70, %c0_71], %157 {strides = array<i32>} : memref<216x512xf32, #tpu.memory_space<vmem>>, vector<8x512xf32>,
    %c0_72 = arith.constant 0 : index
    %c136 = arith.constant 136 : index
    %159 = vector.load %arg10[%c0_72, %c136] : memref<8x768xf32, #tpu.memory_space<vmem>>, vector<8x512xf32>
    %160 = arith.andi %18, %26 : vector<1x512xi1>
    %161 = arith.andi %160, %18 : vector<1x512xi1>
    %cst_73 = arith.constant 0.000000e+00 : f32
    %162 = vector.shape_cast %161 : vector<1x512xi1> to vector<1x512xi1>
    %163 = vector.broadcast %162 : vector<1x512xi1> to vector<8x512xi1>
    %164 = vector.broadcast %cst_73 : f32 to vector<8x512xf32>
    %165 = arith.select %163, %159, %164 : vector<8x512xi1>, vector<8x512xf32>
    %c128_74 = arith.constant 128 : index
    %c0_75 = arith.constant 0 : index
    %166 = vector.load %arg11[%c128_74, %c0_75] : memref<216x512xf32, #tpu.memory_space<vmem>>, vector<8x512xf32>
    tpu.vector_store %arg11[%c128_74, %c0_75], %165 {strides = array<i32>} : memref<216x512xf32, #tpu.memory_space<vmem>>, vector<8x512xf32>,
    %c0_76 = arith.constant 0 : index
    %c137 = arith.constant 137 : index
    %167 = vector.load %arg10[%c0_76, %c137] : memref<8x768xf32, #tpu.memory_space<vmem>>, vector<8x512xf32>
    %168 = arith.andi %18, %26 : vector<1x512xi1>
    %169 = arith.andi %168, %30 : vector<1x512xi1>
    %cst_77 = arith.constant 0.000000e+00 : f32
    %170 = vector.shape_cast %169 : vector<1x512xi1> to vector<1x512xi1>
    %171 = vector.broadcast %170 : vector<1x512xi1> to vector<8x512xi1>
    %172 = vector.broadcast %cst_77 : f32 to vector<8x512xf32>
    %173 = arith.select %171, %167, %172 : vector<8x512xi1>, vector<8x512xf32>
    %c136_78 = arith.constant 136 : index
    %c0_79 = arith.constant 0 : index
    %174 = vector.load %arg11[%c136_78, %c0_79] : memref<216x512xf32, #tpu.memory_space<vmem>>, vector<8x512xf32>
    tpu.vector_store %arg11[%c136_78, %c0_79], %173 {strides = array<i32>} : memref<216x512xf32, #tpu.memory_space<vmem>>, vector<8x512xf32>,
    %c0_80 = arith.constant 0 : index
    %c183 = arith.constant 183 : index
    %175 = vector.load %arg10[%c0_80, %c183] : memref<8x768xf32, #tpu.memory_space<vmem>>, vector<8x512xf32>
    %176 = arith.andi %22, %24 : vector<1x512xi1>
    %177 = arith.andi %176, %28 : vector<1x512xi1>
    %cst_81 = arith.constant 0.000000e+00 : f32
    %178 = vector.shape_cast %177 : vector<1x512xi1> to vector<1x512xi1>
    %179 = vector.broadcast %178 : vector<1x512xi1> to vector<8x512xi1>
    %180 = vector.broadcast %cst_81 : f32 to vector<8x512xf32>
    %181 = arith.select %179, %175, %180 : vector<8x512xi1>, vector<8x512xf32>
    %c144 = arith.constant 144 : index
    %c0_82 = arith.constant 0 : index
    %182 = vector.load %arg11[%c144, %c0_82] : memref<216x512xf32, #tpu.memory_space<vmem>>, vector<8x512xf32>
    tpu.vector_store %arg11[%c144, %c0_82], %181 {strides = array<i32>} : memref<216x512xf32, #tpu.memory_space<vmem>>, vector<8x512xf32>,
    %c0_83 = arith.constant 0 : index
    %c184 = arith.constant 184 : index
    %183 = vector.load %arg10[%c0_83, %c184] : memref<8x768xf32, #tpu.memory_space<vmem>>, vector<8x512xf32>
    %184 = arith.andi %22, %24 : vector<1x512xi1>
    %185 = arith.andi %184, %18 : vector<1x512xi1>
    %cst_84 = arith.constant 0.000000e+00 : f32
    %186 = vector.shape_cast %185 : vector<1x512xi1> to vector<1x512xi1>
    %187 = vector.broadcast %186 : vector<1x512xi1> to vector<8x512xi1>
    %188 = vector.broadcast %cst_84 : f32 to vector<8x512xf32>
    %189 = arith.select %187, %183, %188 : vector<8x512xi1>, vector<8x512xf32>
    %c152 = arith.constant 152 : index
    %c0_85 = arith.constant 0 : index
    %190 = vector.load %arg11[%c152, %c0_85] : memref<216x512xf32, #tpu.memory_space<vmem>>, vector<8x512xf32>
    tpu.vector_store %arg11[%c152, %c0_85], %189 {strides = array<i32>} : memref<216x512xf32, #tpu.memory_space<vmem>>, vector<8x512xf32>,
    %c0_86 = arith.constant 0 : index
    %c185 = arith.constant 185 : index
    %191 = vector.load %arg10[%c0_86, %c185] : memref<8x768xf32, #tpu.memory_space<vmem>>, vector<8x512xf32>
    %192 = arith.andi %22, %24 : vector<1x512xi1>
    %193 = arith.andi %192, %30 : vector<1x512xi1>
    %cst_87 = arith.constant 0.000000e+00 : f32
    %194 = vector.shape_cast %193 : vector<1x512xi1> to vector<1x512xi1>
    %195 = vector.broadcast %194 : vector<1x512xi1> to vector<8x512xi1>
    %196 = vector.broadcast %cst_87 : f32 to vector<8x512xf32>
    %197 = arith.select %195, %191, %196 : vector<8x512xi1>, vector<8x512xf32>
    %c160 = arith.constant 160 : index
    %c0_88 = arith.constant 0 : index
    %198 = vector.load %arg11[%c160, %c0_88] : memref<216x512xf32, #tpu.memory_space<vmem>>, vector<8x512xf32>
    tpu.vector_store %arg11[%c160, %c0_88], %197 {strides = array<i32>} : memref<216x512xf32, #tpu.memory_space<vmem>>, vector<8x512xf32>,
    %c0_89 = arith.constant 0 : index
    %c191 = arith.constant 191 : index
    %199 = vector.load %arg10[%c0_89, %c191] : memref<8x768xf32, #tpu.memory_space<vmem>>, vector<8x512xf32>
    %200 = arith.andi %22, %18 : vector<1x512xi1>
    %201 = arith.andi %200, %28 : vector<1x512xi1>
    %cst_90 = arith.constant 0.000000e+00 : f32
    %202 = vector.shape_cast %201 : vector<1x512xi1> to vector<1x512xi1>
    %203 = vector.broadcast %202 : vector<1x512xi1> to vector<8x512xi1>
    %204 = vector.broadcast %cst_90 : f32 to vector<8x512xf32>
    %205 = arith.select %203, %199, %204 : vector<8x512xi1>, vector<8x512xf32>
    %c168 = arith.constant 168 : index
    %c0_91 = arith.constant 0 : index
    %206 = vector.load %arg11[%c168, %c0_91] : memref<216x512xf32, #tpu.memory_space<vmem>>, vector<8x512xf32>
    tpu.vector_store %arg11[%c168, %c0_91], %205 {strides = array<i32>} : memref<216x512xf32, #tpu.memory_space<vmem>>, vector<8x512xf32>,
    %c0_92 = arith.constant 0 : index
    %c192 = arith.constant 192 : index
    %207 = vector.load %arg10[%c0_92, %c192] : memref<8x768xf32, #tpu.memory_space<vmem>>, vector<8x512xf32>
    %208 = arith.andi %22, %18 : vector<1x512xi1>
    %209 = arith.andi %208, %18 : vector<1x512xi1>
    %cst_93 = arith.constant 0.000000e+00 : f32
    %210 = vector.shape_cast %209 : vector<1x512xi1> to vector<1x512xi1>
    %211 = vector.broadcast %210 : vector<1x512xi1> to vector<8x512xi1>
    %212 = vector.broadcast %cst_93 : f32 to vector<8x512xf32>
    %213 = arith.select %211, %207, %212 : vector<8x512xi1>, vector<8x512xf32>
    %c176 = arith.constant 176 : index
    %c0_94 = arith.constant 0 : index
    %214 = vector.load %arg11[%c176, %c0_94] : memref<216x512xf32, #tpu.memory_space<vmem>>, vector<8x512xf32>
    tpu.vector_store %arg11[%c176, %c0_94], %213 {strides = array<i32>} : memref<216x512xf32, #tpu.memory_space<vmem>>, vector<8x512xf32>,
    %c0_95 = arith.constant 0 : index
    %c193 = arith.constant 193 : index
    %215 = vector.load %arg10[%c0_95, %c193] : memref<8x768xf32, #tpu.memory_space<vmem>>, vector<8x512xf32>
    %216 = arith.andi %22, %18 : vector<1x512xi1>
    %217 = arith.andi %216, %30 : vector<1x512xi1>
    %cst_96 = arith.constant 0.000000e+00 : f32
    %218 = vector.shape_cast %217 : vector<1x512xi1> to vector<1x512xi1>
    %219 = vector.broadcast %218 : vector<1x512xi1> to vector<8x512xi1>
    %220 = vector.broadcast %cst_96 : f32 to vector<8x512xf32>
    %221 = arith.select %219, %215, %220 : vector<8x512xi1>, vector<8x512xf32>
    %c184_97 = arith.constant 184 : index
    %c0_98 = arith.constant 0 : index
    %222 = vector.load %arg11[%c184_97, %c0_98] : memref<216x512xf32, #tpu.memory_space<vmem>>, vector<8x512xf32>
    tpu.vector_store %arg11[%c184_97, %c0_98], %221 {strides = array<i32>} : memref<216x512xf32, #tpu.memory_space<vmem>>, vector<8x512xf32>,
    %c0_99 = arith.constant 0 : index
    %c199 = arith.constant 199 : index
    %223 = vector.load %arg10[%c0_99, %c199] : memref<8x768xf32, #tpu.memory_space<vmem>>, vector<8x512xf32>
    %224 = arith.andi %22, %26 : vector<1x512xi1>
    %225 = arith.andi %224, %28 : vector<1x512xi1>
    %cst_100 = arith.constant 0.000000e+00 : f32
    %226 = vector.shape_cast %225 : vector<1x512xi1> to vector<1x512xi1>
    %227 = vector.broadcast %226 : vector<1x512xi1> to vector<8x512xi1>
    %228 = vector.broadcast %cst_100 : f32 to vector<8x512xf32>
    %229 = arith.select %227, %223, %228 : vector<8x512xi1>, vector<8x512xf32>
    %c192_101 = arith.constant 192 : index
    %c0_102 = arith.constant 0 : index
    %230 = vector.load %arg11[%c192_101, %c0_102] : memref<216x512xf32, #tpu.memory_space<vmem>>, vector<8x512xf32>
    tpu.vector_store %arg11[%c192_101, %c0_102], %229 {strides = array<i32>} : memref<216x512xf32, #tpu.memory_space<vmem>>, vector<8x512xf32>,
    %c0_103 = arith.constant 0 : index
    %c200 = arith.constant 200 : index
    %231 = vector.load %arg10[%c0_103, %c200] : memref<8x768xf32, #tpu.memory_space<vmem>>, vector<8x512xf32>
    %232 = arith.andi %22, %26 : vector<1x512xi1>
    %233 = arith.andi %232, %18 : vector<1x512xi1>
    %cst_104 = arith.constant 0.000000e+00 : f32
    %234 = vector.shape_cast %233 : vector<1x512xi1> to vector<1x512xi1>
    %235 = vector.broadcast %234 : vector<1x512xi1> to vector<8x512xi1>
    %236 = vector.broadcast %cst_104 : f32 to vector<8x512xf32>
    %237 = arith.select %235, %231, %236 : vector<8x512xi1>, vector<8x512xf32>
    %c200_105 = arith.constant 200 : index
    %c0_106 = arith.constant 0 : index
    %238 = vector.load %arg11[%c200_105, %c0_106] : memref<216x512xf32, #tpu.memory_space<vmem>>, vector<8x512xf32>
    tpu.vector_store %arg11[%c200_105, %c0_106], %237 {strides = array<i32>} : memref<216x512xf32, #tpu.memory_space<vmem>>, vector<8x512xf32>,
    %c0_107 = arith.constant 0 : index
    %c201 = arith.constant 201 : index
    %239 = vector.load %arg10[%c0_107, %c201] : memref<8x768xf32, #tpu.memory_space<vmem>>, vector<8x512xf32>
    %240 = arith.andi %22, %26 : vector<1x512xi1>
    %241 = arith.andi %240, %30 : vector<1x512xi1>
    %cst_108 = arith.constant 0.000000e+00 : f32
    %242 = vector.shape_cast %241 : vector<1x512xi1> to vector<1x512xi1>
    %243 = vector.broadcast %242 : vector<1x512xi1> to vector<8x512xi1>
    %244 = vector.broadcast %cst_108 : f32 to vector<8x512xf32>
    %245 = arith.select %243, %239, %244 : vector<8x512xi1>, vector<8x512xf32>
    %c208 = arith.constant 208 : index
    %c0_109 = arith.constant 0 : index
    %246 = vector.load %arg11[%c208, %c0_109] : memref<216x512xf32, #tpu.memory_space<vmem>>, vector<8x512xf32>
    tpu.vector_store %arg11[%c208, %c0_109], %245 {strides = array<i32>} : memref<216x512xf32, #tpu.memory_space<vmem>>, vector<8x512xf32>,
    %c0_110 = arith.constant 0 : index
    %c0_111 = arith.constant 0 : index
    %247 = vector.load %arg2[%c0_110, %c0_111] : memref<8x216xf32, #tpu.memory_space<vmem>>, vector<8x216xf32>
    %c0_112 = arith.constant 0 : index
    %c0_113 = arith.constant 0 : index
    %248 = vector.load %arg11[%c0_112, %c0_113] : memref<216x512xf32, #tpu.memory_space<vmem>>, vector<216x512xf32>
    %cst_114 = arith.constant dense<0.000000e+00> : vector<8x512xf32>
    %249 = tpu.matmul %247, %248, %cst_114 {dimension_numbers = #tpu.dot_dimension_numbers<[1], [0], [0], [1], [0, 0, 1, 1], [], []>} : vector<8x216xf32>, vector<216x512xf32>, vector<8x512xf32> -> vector<8x512xf32>
    %c0_115 = arith.constant 0 : index
    %c0_116 = arith.constant 0 : index
    %250 = vector.load %arg3[%c0_115, %c0_116] : memref<8x1xf32, #tpu.memory_space<vmem>>, vector<8x1xf32>
    %251 = vector.broadcast %250 : vector<8x1xf32> to vector<8x512xf32>
    %252 = arith.addf %249, %251 : vector<8x512xf32>
    %c0_117 = arith.constant 0 : index
    %c0_118 = arith.constant 0 : index
    %253 = vector.load %arg7[%c0_117, %c0_118] : memref<8x512xf32, #tpu.memory_space<vmem>>, vector<8x512xf32>
    tpu.vector_store %arg7[%c0_117, %c0_118], %252 {strides = array<i32>} : memref<8x512xf32, #tpu.memory_space<vmem>>, vector<8x512xf32>,
    %cst_119 = arith.constant dense<0.000000e+00> : vector<8xf32>
    %254 = vector.multi_reduction <add>, %252, %cst_119 [1] : vector<8x512xf32> to vector<8xf32>
    %255 = vector.shape_cast %254 : vector<8xf32> to vector<8x1xf32>
    %c0_120 = arith.constant 0 : index
    %c0_121 = arith.constant 0 : index
    %c0_122 = arith.constant 0 : index
    %256 = vector.load %arg8[%c0_120, %c0_121, %c0_122] : memref<1x8x1xf32, #tpu.memory_space<vmem>>, vector<1x8x1xf32>
    %257 = vector.shape_cast %256 : vector<1x8x1xf32> to vector<8x1xf32>
    %258 = vector.shape_cast %255 : vector<8x1xf32> to vector<1x8x1xf32>
    tpu.vector_store %arg8[%c0_120, %c0_121, %c0_122], %258 {strides = array<i32>} : memref<1x8x1xf32, #tpu.memory_space<vmem>>, vector<1x8x1xf32>,
    %259 = arith.mulf %252, %252 : vector<8x512xf32>
    %cst_123 = arith.constant dense<0.000000e+00> : vector<8xf32>
    %260 = vector.multi_reduction <add>, %259, %cst_123 [1] : vector<8x512xf32> to vector<8xf32>
    %261 = vector.shape_cast %260 : vector<8xf32> to vector<8x1xf32>
    %c0_124 = arith.constant 0 : index
    %c0_125 = arith.constant 0 : index
    %c0_126 = arith.constant 0 : index
    %262 = vector.load %arg9[%c0_124, %c0_125, %c0_126] : memref<1x8x1xf32, #tpu.memory_space<vmem>>, vector<1x8x1xf32>
    %263 = vector.shape_cast %262 : vector<1x8x1xf32> to vector<8x1xf32>
    %264 = vector.shape_cast %261 : vector<8x1xf32> to vector<1x8x1xf32>
    tpu.vector_store %arg9[%c0_124, %c0_125, %c0_126], %264 {strides = array<i32>} : memref<1x8x1xf32, #tpu.memory_space<vmem>>, vector<1x8x1xf32>,
    return
  }
  func.func @transform_0(%arg0: i32) -> (i32, i32) {
    %c0_i32 = arith.constant 0 : i32
    %c0_i32_0 = arith.constant 0 : i32
    return %c0_i32, %arg0 : i32, i32
  }
  func.func @transform_1(%arg0: i32) -> (i32, i32) {
    %c0_i32 = arith.constant 0 : i32
    %c0_i32_0 = arith.constant 0 : i32
    %c0_i32_1 = arith.constant 0 : i32
    return %c0_i32, %c0_i32_0 : i32, i32
  }
  func.func @transform_2(%arg0: i32) -> (i32, i32) {
    %c0_i32 = arith.constant 0 : i32
    %c0_i32_0 = arith.constant 0 : i32
    %c0_i32_1 = arith.constant 0 : i32
    return %c0_i32, %c0_i32_0 : i32, i32
  }
  func.func @transform_3(%arg0: i32) -> (i32, i32) {
    %c0_i32 = arith.constant 0 : i32
    %c0_i32_0 = arith.constant 0 : i32
    return %c0_i32, %arg0 : i32, i32
  }
  func.func @transform_4(%arg0: i32) -> (i32, i32) {
    %c0_i32 = arith.constant 0 : i32
    %c0_i32_0 = arith.constant 0 : i32
    %c0_i32_1 = arith.constant 0 : i32
    return %c0_i32, %c0_i32_0 : i32, i32
  }
  func.func @transform_5(%arg0: i32) -> (i32, i32) {
    %c0_i32 = arith.constant 0 : i32
    %c0_i32_0 = arith.constant 0 : i32
    %c0_i32_1 = arith.constant 0 : i32
    return %c0_i32, %c0_i32_0 : i32, i32
  }
  func.func @transform_6(%arg0: i32) -> (i32, i32) {
    %c0_i32 = arith.constant 0 : i32
    %c0_i32_0 = arith.constant 0 : i32
    return %c0_i32, %arg0 : i32, i32
  }
  func.func @transform_7(%arg0: i32) -> (i32, i32, i32) {
    %c0_i32 = arith.constant 0 : i32
    %c0_i32_0 = arith.constant 0 : i32
    %c0_i32_1 = arith.constant 0 : i32
    return %arg0, %c0_i32, %c0_i32_0 : i32, i32, i32
  }
  func.func @transform_8(%arg0: i32) -> (i32, i32, i32) {
    %c0_i32 = arith.constant 0 : i32
    %c0_i32_0 = arith.constant 0 : i32
    %c0_i32_1 = arith.constant 0 : i32
    return %arg0, %c0_i32, %c0_i32_0 : i32, i32, i32
  }
}

</mosaic_0001>

<bundles_post_ra>
// kernel: down_forward.2
= control target key start
LH: loop header
LB: loop body
LE: loop exit
PB: predicated region body
PF: predicated region fallthrough
CT: control target
= control target key end

     0   :  { %s1774_s25 = smov 73   ;;  %v2967_v2 = vmov 0.0   ;;  %s1776_s30 = smov 72   ;;  %vm2969_vm0 = vcmask 596992   ;;  %vm2970_vm1 = vcmask 588800   ;;  %vm2971_vm2 = vcmask 580608   ;;  %s2960_s0 = inlined_call_operand.vmem [shape: f32[8,512], index: 0, kind: input, shape index: {}]   ;;  %s2961_s3 = inlined_call_operand.vmem [shape: s32[8,512], index: 3, kind: input, shape index: {}]   ;;  %s2962_s1 = inlined_call_operand.vmem [shape: f32[8,216], index: 1, kind: input, shape index: {}]   ;;  %s2963_s2 = inlined_call_operand.vmem [shape: f32[8,1], index: 2, kind: input, shape index: {}]   ;;  %s2964_s4 = inlined_call_operand.vmem [shape: f32[8,512], index: 4, kind: output, shape index: {0}]   ;;  %s2965_s5 = inlined_call_operand.vmem [shape: f32[1,8,1], index: 5, kind: output, shape index: {1}]   ;;  %s2966_s6 = inlined_call_operand.vmem [shape: f32[1,8,1], index: 6, kind: output, shape index: {2}]  }
   0x1   :  { %v1831_v0 = vld [vmem:[%s2960_s0 + $0x18] sm:$0xff]  ;;  %v1836_v1 = vld [vmem:[%s2960_s0 + $0x8] sm:$0xff]  ;;  %1726 = vrot.lane.b32.xlu0 %v2967_v2, %s1774_s25  ;;  %v1847_v3 = vld [vmem:[%s2960_s0 + $0x10] sm:$0xff]  ;;  %s1777_s7 = smov 71   ;;  %s1778_s8 = smov 65   ;;  %vm2974_vm3 = vcmask 531456  }
   0x2   :  { %71 = vrot.lane.b32.xlu2 %v1831_v0, %s1774_s25  ;;  %67 = vrot.lane.b32.xlu1 %v1836_v1, %s1774_s25  ;;  %v1852_v4 = vld [vmem:[%s2960_s0] sm:$0xff]  ;;  %s1779_s9 = smov 64   ;;  %s1780_s10 = smov 63   ;;  %vm2975_vm4 = vcmask 523264   ;;  %vm2980_vm5 = vcmask 515072   ;;  %vm2981_vm6 = vcmask 465920  }
   0x3   :  { %s1781_s11 = smov 57   ;;  %s1782_s12 = smov 56   ;;  %vm2984_vm7 = vcmask 457728   ;;  %vm450_vm8 = vcmask 449536   ;;  %vm498_vm11 = vcmask 72704  }
   0x4   :  { %s1783_s13 = smov 55   ;;  %s1784_s14 = smov 9  }
   0x5   :  { %s1785_s15 = smov 8   ;;  %s1786_s16 = smov 121  }
   0x6   :  { %s1787_s17 = smov 127   ;;  %s1788_s18 = smov 1  }
   0x7   :  { %s1789_s19 = smov 7   ;;  %s1792_s27 = smov 120  }
   0x9   :  { %65 = vrot.lane.b32.xlu0 %v1852_v4, %s1774_s25 }
   0xa   :  { %1731 = vrot.lane.b32.xlu2 %v2967_v2, %s1776_s30  ;;  %69 = vrot.lane.b32.xlu1 %v1847_v3, %s1774_s25 }
  0x11   :  { %112 = vrot.lane.b32.xlu0 %v1852_v4, %s1776_s30 }
  0x12   :  { %116 = vrot.lane.b32.xlu2 %v1847_v3, %s1776_s30  ;;  %114 = vrot.lane.b32.xlu1 %v1836_v1, %s1776_s30 }
  0x19   :  { %118 = vrot.lane.b32.xlu0 %v1831_v0, %s1776_s30 }
  0x1a   :  { %1736 = vrot.lane.b32.xlu1 %v2967_v2, %s1777_s7  ;;  %159 = vrot.lane.b32.xlu2 %v1852_v4, %s1777_s7 }
  0x21   :  { %161 = vrot.lane.b32.xlu0 %v1836_v1, %s1777_s7 }
  0x22   :  { %163 = vrot.lane.b32.xlu1 %v1847_v3, %s1777_s7  ;;  %165 = vrot.lane.b32.xlu2 %v1831_v0, %s1777_s7 }
  0x29   :  { %1741 = vrot.lane.b32.xlu0 %v2967_v2, %s1778_s8 }
  0x2a   :  { %207 = vrot.lane.b32.xlu1 %v1852_v4, %s1778_s8  ;;  %209 = vrot.lane.b32.xlu2 %v1836_v1, %s1778_s8 }
  0x31   :  { %211 = vrot.lane.b32.xlu0 %v1847_v3, %s1778_s8 }
  0x32   :  { %213 = vrot.lane.b32.xlu1 %v1831_v0, %s1778_s8  ;;  %1746 = vrot.lane.b32.xlu2 %v2967_v2, %s1779_s9 }
  0x39   :  { %253 = vrot.lane.b32.xlu0 %v1852_v4, %s1779_s9 }
  0x3a   :  { %255 = vrot.lane.b32.xlu1 %v1836_v1, %s1779_s9  ;;  %257 = vrot.lane.b32.xlu2 %v1847_v3, %s1779_s9 }
  0x41   :  { %259 = vrot.lane.b32.xlu0 %v1831_v0, %s1779_s9 }
  0x42   :  { %1751 = vrot.lane.b32.xlu1 %v2967_v2, %s1780_s10  ;;  %300 = vrot.lane.b32.xlu2 %v1852_v4, %s1780_s10 }
  0x49   :  { %302 = vrot.lane.b32.xlu0 %v1836_v1, %s1780_s10 }
  0x4a   :  { %304 = vrot.lane.b32.xlu1 %v1847_v3, %s1780_s10  ;;  %306 = vrot.lane.b32.xlu2 %v1831_v0, %s1780_s10 }
  0x51   :  { %1756 = vrot.lane.b32.xlu0 %v2967_v2, %s1781_s11 }
  0x52   :  { %348 = vrot.lane.b32.xlu1 %v1852_v4, %s1781_s11  ;;  %350 = vrot.lane.b32.xlu2 %v1836_v1, %s1781_s11 }
  0x59   :  { %352 = vrot.lane.b32.xlu0 %v1847_v3, %s1781_s11 }
  0x5a   :  { %354 = vrot.lane.b32.xlu1 %v1831_v0, %s1781_s11  ;;  %1761 = vrot.lane.b32.xlu2 %v2967_v2, %s1782_s12 }
  0x5c   :  { %v72_v5 = vpop.permute.xlu2 %71 }
  0x61   :  { %395 = vrot.lane.b32.xlu0 %v1852_v4, %s1782_s12 }
  0x62   :  { %397 = vrot.lane.b32.xlu1 %v1836_v1, %s1782_s12  ;;  %399 = vrot.lane.b32.xlu2 %v1847_v3, %s1782_s12 }
  0x64   :  { %v1926_v6 = vpop.permute.xlu2 %1731 }
  0x65   :  { %2999 = vst [vmem:[#allocation4_spill] sm:$0xff] %v1926_v6  ;;  %v1733_v19 = vunpack.i.l.bf16 %v1926_v6 }
  0x69   :  { %401 = vrot.lane.b32.xlu0 %v1831_v0, %s1782_s12 }
  0x6a   :  { %1766 = vrot.lane.b32.xlu1 %v2967_v2, %s1783_s13  ;;  %442 = vrot.lane.b32.xlu2 %v1852_v4, %s1783_s13 }
  0x6c   :  { %v117_v7 = vpop.permute.xlu2 %116 }
  0x71   :  { %444 = vrot.lane.b32.xlu0 %v1836_v1, %s1783_s13 }
  0x72   :  { %446 = vrot.lane.b32.xlu1 %v1847_v3, %s1783_s13  ;;  %448 = vrot.lane.b32.xlu2 %v1831_v0, %s1783_s13 }
  0x73   :  { %v1940_v10 = vpop.permute.xlu0 %1726 }
  0x74   :  { %v68_v8 = vpop.permute.xlu1 %67  ;;  %v160_v9 = vpop.permute.xlu2 %159  ;;  %3000 = vst [vmem:[#allocation5_spill] sm:$0xff] %v1940_v10  ;;  %v1728_v11 = vunpack.i.l.bf16 %v1940_v10 }
  0x79   :  { %488 = vrot.lane.b32.xlu0 %v2967_v2, %s1784_s14 }
  0x7a   :  { %490 = vrot.lane.b32.xlu1 %v1852_v4, %s1784_s14  ;;  %492 = vrot.lane.b32.xlu2 %v1836_v1, %s1784_s14 }
  0x7b   :  { %v66_v14 = vpop.permute.xlu0 %65 }
  0x7c   :  { %v70_v12 = vpop.permute.xlu1 %69  ;;  %v166_v13 = vpop.permute.xlu2 %165  ;;  %v1953_v17 = vsel %vm2969_vm0, %v66_v14, %v68_v8  ;;  %v1956_v18 = vsel %vm2969_vm0, %v1728_v11, %v66_v14 }
  0x7d   :  { %v1947_v15 = vsel %vm2969_vm0, %v70_v12, %v72_v5  ;;  %v1950_v16 = vsel %vm2969_vm0, %v68_v8, %v70_v12 }
  0x7e   :  { %3001 = vst [vmem:[#allocation6_spill] sm:$0xff] %v1947_v15 }
  0x7f   :  { %3002 = vst [vmem:[#allocation7_spill] sm:$0xff] %v1950_v16 }
  0x81   :  { %494 = vrot.lane.b32.xlu0 %v1847_v3, %s1784_s14 }
  0x82   :  { %496 = vrot.lane.b32.xlu1 %v1831_v0, %s1784_s14  ;;  %534 = vrot.lane.b32.xlu2 %v2967_v2, %s1785_s15 }
  0x83   :  { %v113_v22 = vpop.permute.xlu0 %112 }
  0x84   :  { %v115_v20 = vpop.permute.xlu1 %114  ;;  %v210_v21 = vpop.permute.xlu2 %209  ;;  %v1970_v25 = vsel %vm2970_vm1, %v1733_v19, %v113_v22 }
  0x85   :  { %v1964_v23 = vsel %vm2970_vm1, %v115_v20, %v117_v7  ;;  %v1967_v24 = vsel %vm2970_vm1, %v113_v22, %v115_v20 }
  0x86   :  { %3003 = vst [vmem:[#allocation8_spill] sm:$0xff] %v1964_v23 }
  0x89   :  { %536 = vrot.lane.b32.xlu0 %v1852_v4, %s1785_s15 }
  0x8a   :  { %746 = vrot.lane.b32.xlu1 %v1836_v1, %s1786_s16  ;;  %748 = vrot.lane.b32.xlu2 %v1847_v3, %s1786_s16 }
  0x8b   :  { %v119_v29 = vpop.permute.xlu0 %118 }
  0x8c   :  { %v1978_v26 = vpop.permute.xlu1 %1736  ;;  %v1980_v27 = vpop.permute.xlu2 %1746  ;;  %v1984_v30 = vsel %vm2970_vm1, %v117_v7, %v119_v29 }
  0x8d   :  { %3004 = vst [vmem:[#allocation9_spill] sm:$0xff] %v1978_v26  ;;  %v1738_v28 = vunpack.i.l.bf16 %v1978_v26  ;;  %v1748_v49 = vunpack.i.l.bf16 %v1980_v27 }
  0x8e   :  { %3005 = vst [vmem:[#allocation10_spill] sm:$0xff] %v1980_v27 }
  0x8f   :  { %3006 = vst [vmem:[#allocation11_spill] sm:$0xff] %v1984_v30  ;;  %v1987_v31 = vsel %vm2971_vm2, %v1738_v28, %v160_v9 }
  0x91   :  { %698 = vrot.lane.b32.xlu0 %v1836_v1, %s1787_s17 }
  0x92   :  { %700 = vrot.lane.b32.xlu1 %v1847_v3, %s1787_s17  ;;  %744 = vrot.lane.b32.xlu2 %v1852_v4, %s1786_s16 }
  0x93   :  { %v162_v34 = vpop.permute.xlu0 %161 }
  0x94   :  { %v164_v32 = vpop.permute.xlu1 %163  ;;  %v258_v33 = vpop.permute.xlu2 %257  ;;  %v1999_v36 = vsel %vm2971_vm2, %v160_v9, %v162_v34 }
  0x95   :  { %v1996_v35 = vsel %vm2971_vm2, %v164_v32, %v166_v13  ;;  %v2002_v37 = vsel %vm2971_vm2, %v162_v34, %v164_v32 }
  0x96   :  { %3007 = vst [vmem:[#allocation12_spill] sm:$0xff] %v1996_v35 }
  0x97   :  { %3008 = vst [vmem:[#allocation13_spill] sm:$0xff] %v2002_v37 }
  0x99   :  { %630 = vrot.lane.b32.xlu0 %v1852_v4, %s1788_s18 }
  0x9a   :  { %632 = vrot.lane.b32.xlu1 %v1836_v1, %s1788_s18  ;;  %696 = vrot.lane.b32.xlu2 %v1852_v4, %s1787_s17 }
  0x9b   :  { %v2010_v40 = vpop.permute.xlu0 %1741 }
  0x9c   :  { %v208_v38 = vpop.permute.xlu1 %207  ;;  %v301_v39 = vpop.permute.xlu2 %300  ;;  %3009 = vst [vmem:[#allocation14_spill] sm:$0xff] %v2010_v40  ;;  %v1743_v42 = vunpack.i.l.bf16 %v2010_v40 }
  0x9d   :  { %v2013_v41 = vsel %vm2974_vm3, %v208_v38, %v210_v21 }
  0x9e   :  { %v2017_v43 = vsel %vm2974_vm3, %v1743_v42, %v208_v38 }
  0xa1   :  { %583 = vrot.lane.b32.xlu0 %v1852_v4, %s1789_s19 }
  0xa2   :  { %585 = vrot.lane.b32.xlu1 %v1836_v1, %s1789_s19  ;;  %1256 = vrot.lane.b32.xlu2 %v1836_v1, %s1783_s13 }
  0xa3   :  { %v212_v46 = vpop.permute.xlu0 %211 }
  0xa4   :  { %v214_v44 = vpop.permute.xlu1 %213  ;;  %v307_v45 = vpop.permute.xlu2 %306  ;;  %v2029_v48 = vsel %vm2974_vm3, %v210_v21, %v212_v46 }
  0xa5   :  { %v2026_v47 = vsel %vm2974_vm3, %v212_v46, %v214_v44  ;;  %3011 = vst [vmem:[#allocation16_spill] sm:$0xff] %v2029_v48  ;;  %v2972_v46 = vmov 0  }
  0xa6   :  { %3010 = vst [vmem:[#allocation15_spill] sm:$0xff] %v2026_v47  ;;  %1770 = vset.pattern.permute.xlu1 %v2972_v46  ;;  %1771 = vset.pattern.permute.xlu0 %v2972_v46 }
  0xa9   :  { %1258 = vrot.lane.b32.xlu0 %v1847_v3, %s1783_s13 }
  0xaa   :  { %538 = vrot.lane.b32.xlu1 %v1836_v1, %s1785_s15  ;;  %628 = vrot.lane.b32.xlu2 %v2967_v2, %s1788_s18 }
  0xab   :  { %v254_v52 = vpop.permute.xlu0 %253 }
  0xac   :  { %v256_v50 = vpop.permute.xlu1 %255  ;;  %v351_v51 = vpop.permute.xlu2 %350  ;;  %v2045_v55 = vsel %vm2975_vm4, %v1748_v49, %v254_v52 }
  0xad   :  { %v2039_v53 = vsel %vm2975_vm4, %v256_v50, %v258_v33  ;;  %v2042_v54 = vsel %vm2975_vm4, %v254_v52, %v256_v50 }
  0xae   :  { %3012 = vst [vmem:[#allocation17_spill] sm:$0xff] %v2039_v53 }
  0xb1   :  { %750 = vrot.lane.b32.xlu0 %v1831_v0, %s1786_s16 }
  0xb2   :  { %1210 = vrot.lane.b32.xlu1 %v1836_v1, %s1782_s12  ;;  %1212 = vrot.lane.b32.xlu2 %v1847_v3, %s1782_s12 }
  0xb3   :  { %v260_v59 = vpop.permute.xlu0 %259 }
  0xb4   :  { %v2053_v56 = vpop.permute.xlu1 %1751  ;;  %v2055_v57 = vpop.permute.xlu2 %1761  ;;  %v2059_v60 = vsel %vm2975_vm4, %v258_v33, %v260_v59 }
  0xb5   :  { %3013 = vst [vmem:[#allocation18_spill] sm:$0xff] %v2053_v56  ;;  %v1753_v58 = vunpack.i.l.bf16 %v2053_v56  ;;  %v1763_v33 = vunpack.i.l.bf16 %v2055_v57 }
  0xb6   :  { %3014 = vst [vmem:[#allocation19_spill] sm:$0xff] %v2059_v60 }
  0xb7   :  { %v2062_v61 = vsel %vm2980_vm5, %v1753_v58, %v301_v39 }
  0xb9   :  { %581 = vrot.lane.b32.xlu0 %v2967_v2, %s1789_s19 }
  0xba   :  { %702 = vrot.lane.b32.xlu1 %v1831_v0, %s1787_s17  ;;  %752 = vrot.lane.b32.xlu2 %v2967_v2, %s1786_s16 }
  0xbb   :  { %v303_v5 = vpop.permute.xlu0 %302 }
  0xbc   :  { %v305_v62 = vpop.permute.xlu1 %304  ;;  %v400_v63 = vpop.permute.xlu2 %399  ;;  %v2074_v8 = vsel %vm2980_vm5, %v301_v39, %v303_v5 }
  0xbd   :  { %v2071_v7 = vsel %vm2980_vm5, %v305_v62, %v307_v45  ;;  %v2077_v9 = vsel %vm2980_vm5, %v303_v5, %v305_v62 }
  0xbe   :  { %3015 = vst [vmem:[#allocation20_spill] sm:$0xff] %v2071_v7 }
  0xbf   :  { %3016 = vst [vmem:[#allocation21_spill] sm:$0xff] %v2077_v9 }
  0xc1   :  { %1164 = vrot.lane.b32.xlu0 %v1836_v1, %s1781_s11 }
  0xc2   :  { %1166 = vrot.lane.b32.xlu1 %v1847_v3, %s1781_s11  ;;  %1254 = vrot.lane.b32.xlu2 %v1852_v4, %s1783_s13 }
  0xc3   :  { %v2087_v13 = vpop.permute.xlu0 %1756 }
  0xc4   :  { %v349_v11 = vpop.permute.xlu1 %348  ;;  %v2085_v12 = vpop.permute.xlu2 %442  ;;  %3017 = vst [vmem:[#allocation22_spill] sm:$0xff] %v2087_v13  ;;  %v1758_v19 = vunpack.i.l.bf16 %v2087_v13 }
  0xc5   :  { %v2090_v14 = vsel %vm2981_vm6, %v349_v11, %v351_v51 }
  0xc6   :  { %v2094_v20 = vsel %vm2981_vm6, %v1758_v19, %v349_v11 }
  0xc9   :  { %704 = vrot.lane.b32.xlu0 %v2967_v2, %s1787_s17 }
  0xca   :  { %1117 = vrot.lane.b32.xlu1 %v1836_v1, %s1780_s10  ;;  %1119 = vrot.lane.b32.xlu2 %v1847_v3, %s1780_s10 }
  0xcb   :  { %v353_v28 = vpop.permute.xlu0 %352 }
  0xcc   :  { %v355_v21 = vpop.permute.xlu1 %354  ;;  %v449_v22 = vpop.permute.xlu2 %448  ;;  %v2106_v32 = vsel %vm2981_vm6, %v351_v51, %v353_v28 }
  0xcd   :  { %v2103_v29 = vsel %vm2981_vm6, %v353_v28, %v355_v21  ;;  %3019 = vst [vmem:[#allocation24_spill] sm:$0xff] %v2106_v32  ;;  %v2166_v21 = vld [vmem:[%s2961_s3] ss:$8 sm:$0xf] }
  0xce   :  { %3018 = vst [vmem:[#allocation23_spill] sm:$0xff] %v2103_v29  ;;  %v2171_v28 = vld [vmem:[%s2961_s3 + $0x1] ss:$8 sm:$0xf]  ;;  %vm2992_vm9 = vcmp.ge.s32.totalorder %v2166_v21, 0 }
  0xcf   :  { %vm39_vm10 = vcmp.le.s32.totalorder %v2171_v28, 6  ;;  %vm38_vm4 = vcmp.ge.s32.totalorder %v2171_v28, 1 }
  0xd0   :  { %vm2193_vm13 = vmand %vm2992_vm9, %vm39_vm10 }
  0xd1   :  { %1208 = vrot.lane.b32.xlu0 %v1852_v4, %s1782_s12 }
  0xd2   :  { %634 = vrot.lane.b32.xlu1 %v1847_v3, %s1788_s18  ;;  %1071 = vrot.lane.b32.xlu2 %v1836_v1, %s1779_s9 }
  0xd3   :  { %v396_v39 = vpop.permute.xlu0 %395 }
  0xd4   :  { %v398_v34 = vpop.permute.xlu1 %397  ;;  %v2115_v38 = vpop.permute.xlu2 %492  ;;  %v2124_v45 = vsel %vm2984_vm7, %v1763_v33, %v396_v39 }
  0xd5   :  { %v2118_v42 = vsel %vm2984_vm7, %v398_v34, %v400_v63  ;;  %v2121_v44 = vsel %vm2984_vm7, %v396_v39, %v398_v34 }
  0xd6   :  { %3020 = vst [vmem:[#allocation25_spill] sm:$0xff] %v2118_v42  ;;  %v3029_v42 = vmov 0  }
  0xd9   :  { %1073 = vrot.lane.b32.xlu0 %v1847_v3, %s1779_s9 }
  0xda   :  { %1162 = vrot.lane.b32.xlu1 %v1852_v4, %s1781_s11  ;;  %1260 = vrot.lane.b32.xlu2 %v1831_v0, %s1783_s13 }
  0xdb   :  { %v402_v52 = vpop.permute.xlu0 %401 }
  0xdc   :  { %v2133_v49 = vpop.permute.xlu1 %1766  ;;  %v2135_v50 = vpop.permute.xlu2 %534  ;;  %v2140_v58 = vsel %vm2984_vm7, %v400_v63, %v402_v52 }
  0xdd   :  { %v1768_v51 = vunpack.i.l.bf16 %v2133_v49  ;;  %3021 = vst [vmem:[#allocation26_spill] sm:$0xff] %v2140_v58 }
  0xdf   :  { %v2144_v59 = vsel %vm450_vm8, %v1768_v51, %v2085_v12  ;;  %v3024_v51 = vmov 0 }
  0xe0   :  { %v3025_v51 = vsel %vm2193_vm13, 4294967295, %v3024_v51 }
  0xe1   :  { %587 = vrot.lane.b32.xlu0 %v1847_v3, %s1789_s19  ;;  %3026 = vst [vmem:[#allocation29_spill] sm:$0xff] %v3025_v51 }
  0xe2   :  { %636 = vrot.lane.b32.xlu1 %v1831_v0, %s1788_s18  ;;  %1026 = vrot.lane.b32.xlu2 %v1836_v1, %s1778_s8 }
  0xe3   :  { %v2154_v11 = vpop.permute.xlu0 %444 }
  0xe4   :  { %v447_v62 = vpop.permute.xlu1 %446  ;;  %v2152_v5 = vpop.permute.xlu2 %748 }
  0xe5   :  { %v2157_v63 = vsel %vm450_vm8, %v447_v62, %v449_v22  ;;  %v2161_v19 = vsel %vm450_vm8, %v2154_v11, %v447_v62  ;;  %v2182_v22 = vld [vmem:[%s2961_s3 + $0x2] ss:$8 sm:$0xf]  ;;  %s1791_s3 = smov 119  }
  0xe6   :  { %3022 = vst [vmem:[#allocation27_spill] sm:$0xff] %v2157_v63  ;;  %vm40_vm12 = vcmp.ge.s32.totalorder %v2182_v22, 1  ;;  %vm41_vm15 = vcmp.le.s32.totalorder %v2182_v22, 6 }
  0xe7   :  { %3023 = vst [vmem:[#allocation28_spill] sm:$0xff] %v2161_v19  ;;  %vm729_vm14 = vmand %vm2193_vm13, %vm40_vm12 }
  0xe8   :  { %v2212_v16 = vsel %vm729_vm14, 1, %v2972_v46  ;;  %vm2982_vm14 = vcmask 990208   ;;  %vm681_vm0 = vmand %vm2992_vm9, %vm41_vm15 }
  0xe9   :  { %1028 = vrot.lane.b32.xlu0 %v1847_v3, %s1778_s8  ;;  %v731_v48 = vperm.slane %v2212_v16, 0  ;;  %v732_v53 = vperm.slane %v2212_v16, 1  ;;  %v2242_v19 = vsel %vm681_vm0, 1, %v3029_v42  ;;  %vm613_vm0 = vmand %vm2992_vm9, %vm40_vm12 }
  0xea   :  { %1115 = vrot.lane.b32.xlu1 %v1852_v4, %s1780_s10  ;;  %1214 = vrot.lane.b32.xlu2 %v1831_v0, %s1782_s12  ;;  %v2267_v6 = vsel %vm613_vm0, 1, %v3029_v42  ;;  %vm2985_vm0 = vcmask 7168  }
  0xeb   :  { %v489_v39 = vpop.permute.xlu0 %488  ;;  %vm735_vm1 = vcmp.eq.s32.totalorder %v731_v48, 1  ;;  %vm736_vm2 = vcmp.eq.s32.totalorder %v732_v53, 1  ;;  %v2247_v48 = vsel %vm2992_vm9, 1, %v3029_v42  ;;  %v684_v53 = vperm.slane %v2242_v19, 1  ;;  %3030 = vst [vmem:[#allocation32_spill] sm:$0xff] %v2267_v6 }
  0xec   :  { %v2186_v33 = vpop.permute.xlu1 %490  ;;  %v745_v34 = vpop.permute.xlu2 %744  ;;  %v615_v15 = vperm.slane %v2267_v6, 0 }
  0xed   :  { %v2199_v52 = vsel %vm498_vm11, %v489_v39, %v2186_v33 }
  0xf1   :  { %540 = vrot.lane.b32.xlu0 %v1847_v3, %s1785_s15 }
  0xf2   :  { %589 = vrot.lane.b32.xlu1 %v1831_v0, %s1789_s19  ;;  %979 = vrot.lane.b32.xlu2 %v1836_v1, %s1777_s7 }
  0xf3   :  { %v495_v39 = vpop.permute.xlu0 %494 }
  0xf4   :  { %v497_v62 = vpop.permute.xlu1 %496  ;;  %v697_v2 = vpop.permute.xlu2 %696  ;;  %v2219_v37 = vsel %vm498_vm11, %v2115_v38, %v495_v39 }
  0xf5   :  { %v2215_v23 = vsel %vm498_vm11, %v495_v39, %v497_v62  ;;  %3028 = vst [vmem:[#allocation31_spill] sm:$0xff] %v2219_v37  ;;  %v683_v37 = vperm.slane %v2242_v19, 0 }
  0xf6   :  { %3027 = vst [vmem:[#allocation30_spill] sm:$0xff] %v2215_v23 }
  0xf7   :  { %vm687_vm3 = vcmp.eq.s32.totalorder %v683_v37, 1 }
  0xf9   :  { %981 = vrot.lane.b32.xlu0 %v1847_v3, %s1777_s7 }
  0xfa   :  { %1069 = vrot.lane.b32.xlu1 %v1852_v4, %s1779_s9  ;;  %1168 = vrot.lane.b32.xlu2 %v1831_v0, %s1781_s11 }
  0xfb   :  { %v2236_v46 = vpop.permute.xlu0 %536 }
  0xfc   :  { %v747_v62 = vpop.permute.xlu1 %746  ;;  %v2234_v39 = vpop.permute.xlu2 %1256 }
  0xfd   :  { %v755_v9 = vsel %vm2982_vm14, %v745_v34, %v747_v62  ;;  %v756_v32 = vsel %vm2982_vm14, %v747_v62, %v2152_v5  ;;  %v661_v34 = vperm.slane %v2247_v48, 1  ;;  %vm2276_vm14 = vmand %vm2992_vm9, %vm38_vm4 }
  0xfe   :  { %1598 = vmatpush.msk.msra.mxu0 %vm735_vm1, %v755_v9  ;;  %1625 = vmatpush.msk.msra.mxu2 %vm736_vm2, %v756_v32  ;;  %v660_v9 = vperm.slane %v2247_v48, 0  ;;  %vm2983_vm1 = vcmask 1039360   ;;  %vm688_vm2 = vcmp.eq.s32.totalorder %v684_v53, 1  ;;  %v616_v53 = vperm.slane %v2267_v6, 1 }
  0xff   :  { %vm665_vm5 = vcmp.eq.s32.totalorder %v661_v34, 1 }
 0x100   :  { %vm664_vm6 = vcmp.eq.s32.totalorder %v660_v9, 1 }
 0x101   :  { %542 = vrot.lane.b32.xlu0 %v1831_v0, %s1785_s15 }
 0x102   :  { %933 = vrot.lane.b32.xlu1 %v1836_v1, %s1776_s30  ;;  %935 = vrot.lane.b32.xlu2 %v1847_v3, %s1776_s30 }
 0x103   :  { %v699_v10 = vpop.permute.xlu0 %698 }
 0x104   :  { %v2263_v32 = vpop.permute.xlu1 %700  ;;  %v629_v62 = vpop.permute.xlu2 %628  ;;  %v707_v40 = vsel %vm2983_vm1, %v697_v2, %v699_v10 }
 0x105   :  { %v708_v26 = vsel %vm2983_vm1, %v699_v10, %v2263_v32  ;;  %1599 = vmatpush.msk.msra.mxu0 %vm687_vm3, %v707_v40  ;;  %vm566_vm3 = vmand %vm2276_vm14, %vm41_vm15 }
 0x106   :  { %1626 = vmatpush.msk.msra.mxu2 %vm688_vm2, %v708_v26  ;;  %vm2986_vm2 = vcmp.le.s32.totalorder %v2166_v21, 2  ;;  %v2300_v40 = vsel %vm566_vm3, 1, %v3029_v42  ;;  %vm2993_vm3 = vcmp.ge.s32.totalorder %v2166_v21, 1 }
 0x107   :  { %1600 = vmatpush.msk.msra.mxu0 %vm664_vm6, %v1852_v4  ;;  %vm619_vm6 = vcmp.eq.s32.totalorder %v615_v15, 1  ;;  %vm2309_vm1 = vmand %vm2986_vm2, %vm39_vm10  ;;  %v569_v15 = vperm.slane %v2300_v40, 1 }
 0x108   :  { %1627 = vmatpush.msk.msra.mxu2 %vm665_vm5, %v1836_v1  ;;  %vm620_vm5 = vcmp.eq.s32.totalorder %v616_v53, 1  ;;  %vm1239_vm7 = vmand %vm2309_vm1, %vm41_vm15 }
 0x109   :  { %1024 = vrot.lane.b32.xlu0 %v1852_v4, %s1778_s8  ;;  %vm573_vm2 = vcmp.eq.s32.totalorder %v569_v15, 1 }
 0x10a   :  { %1121 = vrot.lane.b32.xlu1 %v1831_v0, %s1780_s10  ;;  %887 = vrot.lane.b32.xlu2 %v1836_v1, %s1774_s25 }
 0x10b   :  { %v631_v26 = vpop.permute.xlu0 %630 }
 0x10c   :  { %v2295_v2 = vpop.permute.xlu1 %632  ;;  %v2297_v10 = vpop.permute.xlu2 %1212  ;;  %v639_v9 = vsel %vm2985_vm0, %v629_v62, %v631_v26 }
 0x10d   :  { %v640_v34 = vsel %vm2985_vm0, %v631_v26, %v2295_v2  ;;  %1601 = vmatpush.msk.msra.mxu0 %vm619_vm6, %v639_v9  ;;  %vm2990_vm6 = vcmask 56320   ;;  %vm2333_vm0 = vmand %vm2993_vm3, %vm39_vm10  ;;  %v2347_v9 = vsel %vm2276_vm14, 1, %v3029_v42 }
 0x10e   :  { %1628 = vmatpush.msk.msra.mxu2 %vm620_vm5, %v640_v34  ;;  %vm473_vm5 = vmand %vm2276_vm14, %vm40_vm12  ;;  %v2342_v34 = vsel %vm1239_vm7, 1, %v3029_v42  ;;  %v522_v37 = vperm.slane %v2347_v9, 1 }
 0x10f   :  { %v2355_v60 = vsel %vm473_vm5, 1, %v3029_v42  ;;  %vm425_vm7 = vmand %vm2333_vm0, %vm41_vm15  ;;  %v1241_v15 = vperm.slane %v2342_v34, 0  ;;  %v1242_v51 = vperm.slane %v2342_v34, 1 }
 0x110   :  { %vm378_vm10 = vmand %vm2333_vm0, %vm2992_vm9  ;;  %v2378_v29 = vsel %vm425_vm7, 1, %v3029_v42 }
 0x111   :  { %889 = vrot.lane.b32.xlu0 %v1847_v3, %s1774_s25  ;;  %vm2372_vm14 = vmand %vm2309_vm1, %vm2992_vm9  ;;  %vm1245_vm7 = vcmp.eq.s32.totalorder %v1241_v15, 1  ;;  %v2403_v63 = vsel %vm378_vm10, 1, %v3029_v42 }
 0x112   :  { %977 = vrot.lane.b32.xlu1 %v1852_v4, %s1777_s7  ;;  %1075 = vrot.lane.b32.xlu2 %v1831_v0, %s1779_s9  ;;  %vm2396_vm5 = vmand %vm2333_vm0, %vm40_vm12  ;;  %v2411_v62 = vsel %vm2372_vm14, 1, %v3029_v42  ;;  %v381_v6 = vperm.slane %v2403_v63, 1 }
 0x113   :  { %v2349_v35 = vpop.permute.xlu0 %583  ;;  %v2427_v7 = vsel %vm2396_vm5, 1, %v3029_v42 }
 0x114   :  { %v2337_v53 = vpop.permute.xlu1 %585  ;;  %v2339_v26 = vpop.permute.xlu2 %752 }
 0x115   :  { %3037 = vst [vmem:[#allocation33_spill] sm:$0xff] %v2337_v53  ;;  %v593_v47 = vsel %vm2990_vm6, %v2349_v35, %v2337_v53  ;;  %vm526_vm6 = vcmp.eq.s32.totalorder %v522_v37, 1  ;;  %v428_v53 = vperm.slane %v2378_v29, 1 }
 0x116   :  { %1629 = vmatpush.msk.msra.mxu2 %vm573_vm2, %v593_v47  ;;  %v476_v47 = vperm.slane %v2355_v60, 1  ;;  %vm2384_vm2 = vmand %vm2993_vm3, %vm2992_vm9  ;;  %vm544_vm9 = vcmask 64512   ;;  %vm1246_vm3 = vcmp.eq.s32.totalorder %v1242_v51, 1 }
 0x117   :  { %vm283_vm0 = vmand %vm2384_vm2, %vm41_vm15  ;;  %vm432_vm5 = vcmp.eq.s32.totalorder %v428_v53, 1 }
 0x118   :  { %vm480_vm10 = vcmp.eq.s32.totalorder %v476_v47, 1  ;;  %v1196_v47 = vperm.slane %v2411_v62, 1 }
 0x119   :  { %839 = vrot.lane.b32.xlu0 %v1836_v1, %s1791_s3 }
 0x11a   :  { %841 = vrot.lane.b32.xlu1 %v1847_v3, %s1791_s3  ;;  %931 = vrot.lane.b32.xlu2 %v1852_v4, %s1776_s30 }
 0x11b   :  { %v2417_v15 = vpop.permute.xlu0 %1258 }
 0x11c   :  { %v2405_v56 = vpop.permute.xlu1 %538  ;;  %v1255_v23 = vpop.permute.xlu2 %1254  ;;  %v1265_v13 = vsel %vm450_vm8, %v2234_v39, %v2417_v15 }
 0x11d   :  { %3044 = vst [vmem:[#allocation34_spill] sm:$0xff] %v2405_v56  ;;  %v1264_v37 = vsel %vm450_vm8, %v1255_v23, %v2234_v39  ;;  %v546_v51 = vsel %vm544_vm9, %v2236_v46, %v2405_v56  ;;  %1641 = vmatpush.msk.msra.mxu3 %vm1246_vm3, %v1265_v13  ;;  %v500_v23 = vsel %vm498_vm11, %v2186_v33, %v2115_v38  ;;  %v2438_v56 = vsel %vm283_vm0, 1, %v3029_v42  ;;  %vm190_vm11 = vmand %vm2384_vm2, %vm40_vm12 }
 0x11e   :  { %1614 = vmatpush.msk.msra.mxu1 %vm1245_vm7, %v1264_v37  ;;  %1630 = vmatpush.msk.msra.mxu2 %vm526_vm6, %v546_v51  ;;  %vm3045_vm6 = vcmp.ge.s32.totalorder %v2166_v21, 1  ;;  %v334_v13 = vperm.slane %v2427_v7, 1  ;;  %v2456_v38 = vsel %vm2384_vm2, 1, %v3029_v42  ;;  %v452_v33 = vsel %vm450_vm8, %v2085_v12, %v2154_v11 }
 0x11f   :  { %vm2444_vm14 = vmand %vm3045_vm6, %vm38_vm4  ;;  %vm385_vm3 = vcmp.eq.s32.totalorder %v381_v6, 1  ;;  %v286_v39 = vperm.slane %v2438_v56, 1  ;;  %vm1200_vm7 = vcmp.eq.s32.totalorder %v1196_v47, 1  ;;  %v239_v6 = vperm.slane %v2456_v38, 1 }
 0x120   :  { %1631 = vmatpush.msk.msra.mxu2 %vm480_vm10, %v500_v23  ;;  %vm142_vm2 = vmand %vm2444_vm14, %vm41_vm15  ;;  %vm338_vm0 = vcmp.eq.s32.totalorder %v334_v13, 1  ;;  %vm3048_vm10 = vcmp.ge.s32.totalorder %v2166_v21, 0  ;;  %v568_v47 = vperm.slane %v2300_v40, 0 }
 0x121   :  { %1030 = vrot.lane.b32.xlu0 %v1831_v0, %s1778_s8  ;;  %vm95_vm6 = vmand %vm2444_vm14, %vm3048_vm10  ;;  %v2491_v53 = vsel %vm142_vm2, 1, %v3029_v42  ;;  %vm243_vm2 = vcmp.eq.s32.totalorder %v239_v6, 1  ;;  %v475_v6 = vperm.slane %v2355_v60, 0 }
 0x122   :  { %792 = vrot.lane.b32.xlu1 %v1836_v1, %s1792_s27  ;;  %794 = vrot.lane.b32.xlu2 %v1847_v3, %s1792_s27  ;;  %v2473_v1 = vsel %vm190_vm11, 1, %v3029_v42  ;;  %vm290_vm11 = vcmp.eq.s32.totalorder %v286_v39, 1  ;;  %vm48_vm10 = vmand %vm2444_vm14, %vm40_vm12  ;;  %v145_v23 = vperm.slane %v2491_v53, 1 }
 0x123   :  { %1632 = vmatpush.msk.msra.mxu2 %vm432_vm5, %v452_v33  ;;  %v2485_v12 = vpop.permute.xlu0 %750  ;;  %vm3049_vm5 = vcmask 457728   ;;  %v193_v37 = vperm.slane %v2473_v1, 1  ;;  %v2511_v27 = vsel %vm48_vm10, 1, %v3029_v42 }
 0x124   :  { %v2475_v3 = vpop.permute.xlu1 %1210  ;;  %v2477_v58 = vpop.permute.xlu2 %1119  ;;  %v51_v33 = vperm.slane %v2511_v27, 1 }
 0x125   :  { %1633 = vmatpush.msk.msra.mxu2 %vm385_vm3, %v2121_v44  ;;  %v1219_v11 = vsel %vm3049_vm5, %v2475_v3, %v2297_v10  ;;  %v2500_v44 = vsel %vm95_vm6, 1, %v3029_v42  ;;  %vm3050_vm3 = vcmask 990208   ;;  %vm197_vm14 = vcmp.eq.s32.totalorder %v193_v37, 1 }
 0x126   :  { %1642 = vmatpush.msk.msra.mxu3 %vm1200_vm7, %v1219_v11  ;;  %v2505_v51 = vsel %vm3050_vm3, %v2152_v5, %v2485_v12  ;;  %v521_v5 = vperm.slane %v2347_v9, 0  ;;  %vm1147_vm7 = vmand %vm2309_vm1, %vm40_vm12  ;;  %vm572_vm6 = vcmp.eq.s32.totalorder %v568_v47, 1  ;;  %vm3051_vm1 = vcmask 1039360  }
 0x127   :  { %1634 = vmatpush.msk.msra.mxu2 %vm338_vm0, %v2090_v14  ;;  %v98_v14 = vperm.slane %v2500_v44, 1  ;;  %vm149_vm0 = vcmp.eq.s32.totalorder %v145_v23, 1  ;;  %v2534_v30 = vsel %vm1147_vm7, 1, %v3029_v42  ;;  %vm3052_vm5 = vcmask 56320  }
 0x128   :  { %vm525_vm10 = vcmp.eq.s32.totalorder %v521_v5, 1  ;;  %vm3053_vm3 = vcmp.ge.s32.totalorder %v2166_v21, 0  ;;  %v427_v37 = vperm.slane %v2378_v29, 0  ;;  %vm55_vm7 = vcmp.eq.s32.totalorder %v51_v33, 1 }
 0x129   :  { %1635 = vmatpush.msk.msra.mxu2 %vm290_vm11, %v2074_v8  ;;  %885 = vrot.lane.b32.xlu0 %v1852_v4, %s1774_s25  ;;  %vm102_vm11 = vcmp.eq.s32.totalorder %v98_v14, 1  ;;  %v1150_v23 = vperm.slane %v2534_v30, 1  ;;  %v380_v47 = vperm.slane %v2403_v63, 0  ;;  %v238_v33 = vperm.slane %v2456_v38, 0 }
 0x12a   :  { %983 = vrot.lane.b32.xlu1 %v1831_v0, %s1777_s7  ;;  %837 = vrot.lane.b32.xlu2 %v1852_v4, %s1791_s3 }
 0x12b   :  { %1636 = vmatpush.msk.msra.mxu2 %vm243_vm2, %v2042_v54  ;;  %v582_v39 = vpop.permute.xlu0 %581  ;;  %vm3054_vm2 = vcmp.le.s32.totalorder %v2166_v21, 2 }
 0x12c   :  { %v2526_v8 = vpop.permute.xlu1 %702  ;;  %v2528_v13 = vpop.permute.xlu2 %1071  ;;  %v592_v11 = vsel %vm3052_vm5, %v582_v39, %v2349_v35  ;;  %v545_v35 = vsel %vm544_vm9, %v2135_v50, %v2236_v46 }
 0x12d   :  { %1637 = vmatpush.msk.msra.mxu2 %vm197_vm14, %v2013_v41  ;;  %v2539_v54 = vsel %vm3051_vm1, %v2263_v32, %v2526_v8  ;;  %vm2547_vm14 = vmand %vm3054_vm2, %vm3053_vm3  ;;  %1602 = vmatpush.msk.msra.mxu0 %vm572_vm6, %v592_v11  ;;  %v1244_v32 = vperm.slane %v2342_v34, 3  ;;  %vm479_vm1 = vcmp.eq.s32.totalorder %v475_v6, 1  ;;  %vm431_vm6 = vcmp.eq.s32.totalorder %v427_v37, 1  ;;  %v3073_v41 = vld [vmem:[#allocation33_spill] sm:$0xff] }
 0x12e   :  { %vm3057_vm3 = vcmask 465920   ;;  %v192_v6 = vperm.slane %v2473_v1, 0 }
 0x12f   :  { %1638 = vmatpush.msk.msra.mxu2 %vm149_vm0, %v1999_v36  ;;  %1603 = vmatpush.msk.msra.mxu0 %vm525_vm10, %v545_v35  ;;  %vm1100_vm0 = vmand %vm2547_vm14, %vm41_vm15  ;;  %v1769_v36 = vunpack.i.h.bf16 %v2133_v49  ;;  %vm1248_vm5 = vcmp.eq.s32.totalorder %v1244_v32, 1  ;;  %vm384_vm10 = vcmp.eq.s32.totalorder %v380_v47, 1  ;;  %v285_v49 = vperm.slane %v2438_v56, 0 }
 0x130   :  { %v50_v32 = vperm.slane %v2511_v27, 0  ;;  %v734_v35 = vperm.slane %v2212_v16, 3  ;;  %v686_v47 = vperm.slane %v2242_v19, 3 }
 0x131   :  { %1639 = vmatpush.msk.msra.mxu2 %vm102_vm11, %v1967_v24  ;;  %937 = vrot.lane.b32.xlu0 %v1831_v0, %s1776_s30  ;;  %v333_v24 = vperm.slane %v2427_v7, 0  ;;  %vm1154_vm11 = vcmp.eq.s32.totalorder %v1150_v23, 1  ;;  %v1195_v23 = vperm.slane %v2411_v62, 0 }
 0x132   :  { %790 = vrot.lane.b32.xlu1 %v1852_v4, %s1792_s27  ;;  %891 = vrot.lane.b32.xlu2 %v1831_v0, %s1774_s25  ;;  %v2577_v4 = vsel %vm1100_vm0, 1, %v3029_v42  ;;  %vm3059_vm0 = vcmask 515072  }
 0x133   :  { %1640 = vmatpush.msk.msra.mxu2 %vm55_vm7, %v1953_v17  ;;  %1604 = vmatpush.msk.msra.mxu0 %vm479_vm1, %v2199_v52  ;;  %v2579_v14 = vpop.permute.xlu0 %1164  ;;  %vm337_vm2 = vcmp.eq.s32.totalorder %v333_v24, 1  ;;  %v1103_v39 = vperm.slane %v2577_v4, 1  ;;  %vm289_vm7 = vcmp.eq.s32.totalorder %v285_v49, 1  ;;  %v663_v24 = vperm.slane %v2247_v48, 3 }
 0x134   :  { %v2574_v46 = vpop.permute.xlu1 %1166  ;;  %v1261_v50 = vpop.permute.xlu2 %1260 }
 0x135   :  { %v1267_v17 = vsel %vm450_vm8, %v1261_v50, %v1769_v36  ;;  %v2585_v5 = vsel %vm450_vm8, %v2417_v15, %v1261_v50  ;;  %1605 = vmatpush.msk.msra.mxu0 %vm431_vm6, %v2144_v59  ;;  %v1173_v52 = vsel %vm3057_vm3, %v2579_v14, %v2574_v46  ;;  %vm242_vm8 = vcmp.eq.s32.totalorder %v238_v33, 1 }
 0x136   :  { %1695 = vmatpush.msk.msrb.mxu2 %vm1248_vm5, %v1267_v17  ;;  %1643 = vmatpush.msk.msra.mxu3 %vm1154_vm11, %v1173_v52  ;;  %vm1107_vm1 = vcmp.eq.s32.totalorder %v1103_v39, 1  ;;  %v144_v59 = vperm.slane %v2491_v53, 0  ;;  %v3058_v15 = vmov 0.0   ;;  %vm196_vm6 = vcmp.eq.s32.totalorder %v192_v6, 1  ;;  %v3068_v6 = vld [vmem:[#allocation32_spill] sm:$0xff] }
 0x137   :  { %1606 = vmatpush.msk.msra.mxu0 %vm384_vm10, %v2124_v45  ;;  %v1764_v36 = vunpack.i.h.bf16 %v2055_v57  ;;  %vm54_vm10 = vcmp.eq.s32.totalorder %v50_v32, 1  ;;  %v2629_v57 = vsel %vm2547_vm14, 1, %v3029_v42 }
 0x138   :  { %vm148_vm5 = vcmp.eq.s32.totalorder %v144_v59, 1  ;;  %v618_v59 = vperm.slane %v3068_v6, 3 }
 0x139   :  { %1607 = vmatpush.msk.msra.mxu0 %vm337_vm2, %v2094_v20  ;;  %843 = vrot.lane.b32.xlu0 %v1831_v0, %s1791_s3  ;;  %vm738_vm2 = vcmp.eq.s32.totalorder %v734_v35, 1 }
 0x13a   :  { %796 = vrot.lane.b32.xlu1 %v1831_v0, %s1792_s27  ;;  %845 = vrot.lane.b32.xlu2 %v3058_v15, %s1791_s3  ;;  %v97_v0 = vperm.slane %v2500_v44, 0 }
 0x13b   :  { %1608 = vmatpush.msk.msra.mxu0 %vm289_vm7, %v2062_v61  ;;  %v705_v20 = vpop.permute.xlu0 %704  ;;  %v1198_v61 = vperm.slane %v2411_v62, 3  ;;  %vm1199_vm7 = vcmp.eq.s32.totalorder %v1195_v23, 1 }
 0x13c   :  { %v2604_v45 = vpop.permute.xlu1 %1117  ;;  %v2606_v11 = vpop.permute.xlu2 %1026  ;;  %vm101_vm11 = vcmp.eq.s32.totalorder %v97_v0, 1 }
 0x13d   :  { %v1126_v37 = vsel %vm3059_vm0, %v2604_v45, %v2477_v58  ;;  %1609 = vmatpush.msk.msra.mxu0 %vm242_vm8, %v2045_v55  ;;  %vm1202_vm3 = vcmp.eq.s32.totalorder %v1198_v61, 1  ;;  %vm3060_vm8 = vcmask 457728   ;;  %vm3062_vm0 = vcmask 7168  }
 0x13e   :  { %1644 = vmatpush.msk.msra.mxu3 %vm1107_vm1, %v1126_v37  ;;  %vm3061_vm1 = vmmov %vm3060_vm8 }
 0x13f   :  { %1610 = vmatpush.msk.msra.mxu0 %vm196_vm6, %v2017_v43  ;;  %vm3063_vm6 = vcmask 990208  }
 0x140   :  { %v758_v49 = vsel %vm3063_vm6, %v2485_v12, %v2339_v26  ;;  %vm622_vm6 = vcmp.eq.s32.totalorder %v618_v59, 1 }
 0x141   :  { %1611 = vmatpush.msk.msra.mxu0 %vm148_vm5, %v1987_v31  ;;  %798 = vrot.lane.b32.xlu0 %v3058_v15, %s1792_s27  ;;  %vm3064_vm5 = vmmov %vm3061_vm1  ;;  %v1152_v15 = vperm.slane %v2534_v30, 3 }
 0x143   :  { %1612 = vmatpush.msk.msra.mxu0 %vm101_vm11, %v1970_v25  ;;  %v1209_v50 = vpop.permute.xlu0 %1208  ;;  %vm690_vm11 = vcmp.eq.s32.totalorder %v686_v47, 1 }
 0x144   :  { %v635_v55 = vpop.permute.xlu1 %634  ;;  %v1215_v43 = vpop.permute.xlu2 %1214  ;;  %v1218_v52 = vsel %vm3064_vm5, %v1209_v50, %v2475_v3  ;;  %vm1156_vm5 = vcmp.eq.s32.totalorder %v1152_v15, 1 }
 0x145   :  { %v1221_v31 = vsel %vm3060_vm8, %v1215_v43, %v1764_v36  ;;  %v2633_v17 = vsel %vm3061_vm1, %v2297_v10, %v1215_v43  ;;  %v2637_v25 = vsel %vm3062_vm0, %v2295_v2, %v635_v55  ;;  %1613 = vmatpush.msk.msra.mxu0 %vm54_vm10, %v1956_v18  ;;  %1615 = vmatpush.msk.msra.mxu1 %vm1199_vm7, %v1218_v52  ;;  %v1149_v10 = vperm.slane %v2534_v30, 0  ;;  %v1772_v18 = vld [vmem:[%s2960_s0 + $0x18] sm:$0xff]  ;;  %vm1009_vm0 = vmand %vm2547_vm14, %vm40_vm12 }
 0x146   :  { %1696 = vmatpush.msk.msrb.mxu2 %vm1202_vm3, %v1221_v31  ;;  %vm3065_vm8 = vcmask 1039360   ;;  %v1057_v2 = vperm.slane %v2629_v57, 1  ;;  %vm667_vm1 = vcmp.eq.s32.totalorder %v663_v24, 1  ;;  %vm3067_vm7 = vcmask 523264  }
 0x147   :  { %1679 = vmatpush.msk.msrb.mxu0 %vm738_vm2, %v758_v49  ;;  %v710_v33 = vsel %vm3065_vm8, %v2526_v8, %v705_v20  ;;  %vm1153_vm10 = vcmp.eq.s32.totalorder %v1149_v10, 1  ;;  %vm3066_vm2 = vcmask 465920   ;;  %v3069_v20 = vld [vmem:[#allocation22_spill] sm:$0xff]  ;;  %v2671_v23 = vsel %vm1009_vm0, 1, %v3029_v42 }
 0x148   :  { %vm1061_vm3 = vcmp.eq.s32.totalorder %v1057_v2, 1  ;;  %v1759_v37 = vunpack.i.h.bf16 %v3069_v20  ;;  %vm3071_vm8 = vmmov %vm3066_vm2  ;;  %vm3074_vm14 = vcmask 56320   ;;  %v1102_v43 = vperm.slane %v2577_v4, 0 }
 0x149   :  { %1680 = vmatpush.msk.msrb.mxu0 %vm690_vm11, %v710_v33  ;;  %vm3070_vm11 = vcmask 7168   ;;  %v1012_v24 = vperm.slane %v2671_v23, 1  ;;  %v571_v49 = vperm.slane %v2300_v40, 3  ;;  %vm3077_vm0 = vcmp.le.s32.totalorder %v2166_v21, 2 }
 0x14b   :  { %1681 = vmatpush.msk.msrb.mxu0 %vm667_vm1, %v1772_v18  ;;  %v2654_v12 = vpop.permute.xlu0 %1073  ;;  %vm3072_vm1 = vmmov %vm3066_vm2  ;;  %v1056_v18 = vperm.slane %v2629_v57, 0 }
 0x14c   :  { %v1163_v26 = vpop.permute.xlu1 %1162  ;;  %v2652_v3 = vpop.permute.xlu2 %979  ;;  %v1080_v8 = vsel %vm3067_vm7, %v2528_v13, %v2654_v12  ;;  %vm3076_vm7 = vcmask 531456  }
 0x14d   :  { %v1172_v39 = vsel %vm3066_vm2, %v1163_v26, %v2579_v14  ;;  %1645 = vmatpush.msk.msra.mxu3 %vm1061_vm3, %v1080_v8  ;;  %vm1016_vm3 = vcmp.eq.s32.totalorder %v1012_v24, 1  ;;  %vm3075_vm2 = vcmask 515072   ;;  %v1105_v24 = vperm.slane %v2577_v4, 3 }
 0x14e   :  { %1616 = vmatpush.msk.msra.mxu1 %vm1153_vm10, %v1172_v39  ;;  %vm1106_vm10 = vcmp.eq.s32.totalorder %v1102_v43, 1  ;;  %v383_v43 = vperm.slane %v2403_v63, 3 }
 0x153   :  { %v588_v32 = vpop.permute.xlu0 %587 }
 0x154   :  { %v637_v14 = vpop.permute.xlu1 %636  ;;  %v1169_v0 = vpop.permute.xlu2 %1168  ;;  %v2679_v36 = vsel %vm3074_vm14, %v3073_v41, %v588_v32 }
 0x155   :  { %v642_v61 = vsel %vm3070_vm11, %v635_v55, %v637_v14  ;;  %v1175_v35 = vsel %vm3071_vm8, %v1169_v0, %v1759_v37  ;;  %v2675_v47 = vsel %vm3072_vm1, %v2574_v46, %v1169_v0  ;;  %vm575_vm11 = vcmp.eq.s32.totalorder %v571_v49, 1  ;;  %vm3080_vm8 = vmmov %vm3074_vm14 }
 0x156   :  { %1682 = vmatpush.msk.msrb.mxu0 %vm622_vm6, %v642_v61  ;;  %1697 = vmatpush.msk.msrb.mxu2 %vm1156_vm5, %v1175_v35  ;;  %vm2695_vm6 = vmand %vm3077_vm0, %vm38_vm4  ;;  %vm3081_vm4 = vcmp.ge.s32.totalorder %v2166_v21, 0  ;;  %vm1060_vm14 = vcmp.eq.s32.totalorder %v1056_v18, 1  ;;  %v524_v14 = vperm.slane %v2347_v9, 3  ;;  %v478_v0 = vperm.slane %v2355_v60, 3  ;;  %v3086_v18 = vld [vmem:[#allocation18_spill] sm:$0xff] }
 0x157   :  { %vm962_vm5 = vmand %vm2695_vm6, %vm41_vm15  ;;  %v1059_v49 = vperm.slane %v2629_v57, 3 }
 0x158   :  { %v2707_v2 = vsel %vm962_vm5, 1, %v3029_v42  ;;  %vm916_vm1 = vmand %vm2695_vm6, %vm3081_vm4  ;;  %vm528_vm0 = vcmp.eq.s32.totalorder %v524_v14, 1  ;;  %vm3084_vm5 = vcmask 588800   ;;  %vm387_vm4 = vcmp.eq.s32.totalorder %v383_v43, 1  ;;  %v3092_v43 = vld [vmem:[#allocation23_spill] sm:$0xff] }
 0x159   :  { %v965_v26 = vperm.slane %v2707_v2, 1  ;;  %v2718_v8 = vsel %vm916_vm1, 1, %v3029_v42  ;;  %vm870_vm1 = vmand %vm2695_vm6, %vm40_vm12  ;;  %vm1063_vm12 = vcmp.eq.s32.totalorder %v1059_v49, 1  ;;  %vm3091_vm6 = vcmask 531456   ;;  %v3094_v49 = vld [vmem:[#allocation20_spill] sm:$0xff] }
 0x15a   :  { %v919_v21 = vperm.slane %v2718_v8, 1 }
 0x15b   :  { %v2683_v50 = vpop.permute.xlu0 %1028 }
 0x15c   :  { %v1116_v55 = vpop.permute.xlu1 %1115  ;;  %v1035_v46 = vsel %vm3076_vm7, %v2606_v11, %v2683_v50  ;;  %v2709_v28 = vpop.permute.xlu2 %935  ;;  %vm923_vm7 = vcmp.eq.s32.totalorder %v919_v21, 1  ;;  %v3088_v21 = vld [vmem:[#allocation10_spill] sm:$0xff] }
 0x15d   :  { %v1125_v31 = vsel %vm3075_vm2, %v1116_v55, %v2604_v45  ;;  %1646 = vmatpush.msk.msra.mxu3 %vm1016_vm3, %v1035_v46  ;;  %vm3082_vm3 = vcmask 523264   ;;  %vm3083_vm2 = vcmask 580608   ;;  %v1011_v55 = vperm.slane %v2671_v23, 0  ;;  %v3085_v46 = vld [vmem:[#allocation30_spill] sm:$0xff] }
 0x15e   :  { %1617 = vmatpush.msk.msra.mxu1 %vm1106_vm10, %v1125_v31  ;;  %vm969_vm10 = vcmp.eq.s32.totalorder %v965_v26, 1  ;;  %v336_v31 = vperm.slane %v2427_v7, 3  ;;  %v1754_v26 = vunpack.i.h.bf16 %v3086_v18  ;;  %v1749_v14 = vunpack.i.h.bf16 %v3088_v21  ;;  %v3104_v18 = vld [vmem:[#allocation14_spill] sm:$0xff] }
 0x15f   :  { %v53_v21 = vperm.slane %v2511_v27, 3 }
 0x163   :  { %v2703_v10 = vpop.permute.xlu0 %540 }
 0x164   :  { %v590_v45 = vpop.permute.xlu1 %589  ;;  %v2728_v37 = vpop.permute.xlu2 %887 }
 0x165   :  { %v595_v33 = vsel %vm3080_vm8, %v588_v32, %v590_v45 }
 0x166   :  { %1683 = vmatpush.msk.msrb.mxu0 %vm575_vm11, %v595_v33  ;;  %vm482_vm11 = vcmp.eq.s32.totalorder %v478_v0, 1  ;;  %v288_v33 = vperm.slane %v2438_v56, 3 }
 0x16b   :  { %v2720_v59 = vpop.permute.xlu0 %981 }
 0x16c   :  { %v1070_v39 = vpop.permute.xlu1 %1069  ;;  %v988_v20 = vsel %vm3083_vm2, %v2652_v3, %v2720_v59  ;;  %v2746_v45 = vpop.permute.xlu2 %1075  ;;  %vm3090_vm2 = vcmask 515072  }
 0x16d   :  { %v1079_v15 = vsel %vm3082_vm3, %v1070_v39, %v2528_v13  ;;  %1647 = vmatpush.msk.msra.mxu3 %vm969_vm10, %v988_v20  ;;  %v430_v13 = vperm.slane %v2378_v29, 3  ;;  %v3087_v39 = vld [vmem:[#allocation27_spill] sm:$0xff]  ;;  %vm1015_vm10 = vcmp.eq.s32.totalorder %v1011_v55, 1  ;;  %vm340_vm3 = vcmp.eq.s32.totalorder %v336_v31, 1 }
 0x16e   :  { %1618 = vmatpush.msk.msra.mxu1 %vm1060_vm14, %v1079_v15  ;;  %vm1109_vm14 = vcmp.eq.s32.totalorder %v1105_v24, 1  ;;  %v241_v20 = vperm.slane %v2456_v38, 3  ;;  %v964_v55 = vperm.slane %v2707_v2, 0 }
 0x16f   :  { %vm434_vm8 = vcmp.eq.s32.totalorder %v430_v13, 1  ;;  %v3089_v13 = vld [vmem:[#allocation26_spill] sm:$0xff] }
 0x173   :  { %v543_v61 = vpop.permute.xlu0 %542 }
 0x174   :  { %v2732_v32 = vpop.permute.xlu1 %933  ;;  %v548_v41 = vsel %vm544_vm9, %v2703_v10, %v543_v61  ;;  %v2763_v61 = vsel %vm870_vm1, 1, %v3029_v42 }
 0x175   :  { %v942_v35 = vsel %vm3084_vm5, %v2732_v32, %v2709_v28  ;;  %1684 = vmatpush.msk.msrb.mxu0 %vm528_vm0, %v548_v41  ;;  %v195_v41 = vperm.slane %v2473_v1, 3  ;;  %vm3093_vm0 = vcmask 523264   ;;  %vm245_vm5 = vcmp.eq.s32.totalorder %v241_v20, 1 }
 0x176   :  { %1648 = vmatpush.msk.msra.mxu3 %vm923_vm7, %v942_v35  ;;  %vm292_vm7 = vcmp.eq.s32.totalorder %v288_v33, 1  ;;  %v1082_v24 = vsel %vm3093_vm0, %v2746_v45, %v1749_v14  ;;  %v873_v31 = vperm.slane %v2763_v61, 1  ;;  %v100_v33 = vperm.slane %v2500_v44, 3 }
 0x177   :  { %1685 = vmatpush.msk.msrb.mxu0 %vm482_vm11, %v3085_v46  ;;  %v147_v46 = vperm.slane %v2491_v53, 3  ;;  %vm199_vm11 = vcmp.eq.s32.totalorder %v195_v41, 1 }
 0x178   :  { %vm877_vm1 = vcmp.eq.s32.totalorder %v873_v31, 1  ;;  %v2805_v31 = vsel %vm2193_vm13, 1, %v3029_v42 }
 0x179   :  { %1686 = vmatpush.msk.msrb.mxu0 %vm434_vm8, %v3087_v39  ;;  %vm822_vm8 = vmand %vm2193_vm13, %vm41_vm15  ;;  %v932_v39 = vpop.permute.xlu2 %931  ;;  %vm3099_vm15 = vcmask 596992  }
 0x17a   :  { %v2789_v22 = vsel %vm822_vm8, 1, %v3029_v42  ;;  %v1744_v42 = vunpack.i.h.bf16 %v3104_v18 }
 0x17b   :  { %v1025_v0 = vpop.permute.xlu0 %1024  ;;  %1687 = vmatpush.msk.msrb.mxu0 %vm387_vm4, %v3089_v13  ;;  %vm968_vm4 = vcmp.eq.s32.totalorder %v964_v55, 1 }
 0x17c   :  { %v2755_v15 = vpop.permute.xlu1 %1121  ;;  %v1034_v35 = vsel %vm3091_vm6, %v1025_v0, %v2606_v11  ;;  %v918_v11 = vperm.slane %v2718_v8, 0  ;;  %v3097_v0 = vld [vmem:[#allocation15_spill] sm:$0xff]  ;;  %vm57_vm6 = vcmp.eq.s32.totalorder %v53_v21, 1  ;;  %v1151_v21 = vperm.slane %v2534_v30, 2 }
 0x17d   :  { %v1128_v52 = vsel %vm3090_vm2, %v2755_v15, %v1754_v26  ;;  %1619 = vmatpush.msk.msra.mxu1 %vm1015_vm10, %v1034_v35  ;;  %1688 = vmatpush.msk.msrb.mxu0 %vm340_vm3, %v3092_v43  ;;  %v3096_v26 = vld [vmem:[#allocation19_spill] sm:$0xff]  ;;  %vm3098_vm10 = vcmask 580608   ;;  %vm104_vm2 = vcmp.eq.s32.totalorder %v100_v33, 1  ;;  %v3100_v35 = vld [vmem:[#allocation12_spill] sm:$0xff]  ;;  %v1243_v33 = vperm.slane %v2342_v34, 2 }
 0x17e   :  { %1698 = vmatpush.msk.msrb.mxu2 %vm1109_vm14, %v1128_v52  ;;  %vm151_vm14 = vcmp.eq.s32.totalorder %v147_v46, 1  ;;  %vm922_vm3 = vcmp.eq.s32.totalorder %v918_v11, 1  ;;  %v3102_v43 = vld [vmem:[#allocation11_spill] sm:$0xff]  ;;  %v778_v11 = vperm.slane %v2805_v31, 1  ;;  %v2825_v34 = vld [vmem:[%s2962_s1] sm:$0xff]  ;;  %v967_v30 = vperm.slane %v2707_v2, 3 }
 0x17f   :  { %1689 = vmatpush.msk.msrb.mxu0 %vm292_vm7, %v3094_v49  ;;  %vm847_vm7 = vcmask 973824   ;;  %vm1247_vm13 = vcmp.eq.s32.totalorder %v1243_v33, 1  ;;  %1456 = vmatmul.f32.vlgmr.msra.gmra.mxu2 %v2825_v34 }
 0x180   :  { %1699 = vmatpush.msk.msrb.mxu2 %vm1063_vm12, %v1082_v24  ;;  %vm3101_vm12 = vcmask 588800   ;;  %v3103_v24 = vld [vmem:[#allocation6_spill] sm:$0xff]  ;;  %1416 = vmatmul.f32.vlgmr.msra.gmra.mxu0 %v2825_v34 }
 0x181   :  { %1690 = vmatpush.msk.msrb.mxu0 %vm245_vm5, %v3096_v26  ;;  %v941_v41 = vsel %vm3101_vm12, %v932_v39, %v2732_v32  ;;  %v2809_v49 = vpop.permute.xlu2 %794  ;;  %v1014_v26 = vperm.slane %v2671_v23, 3  ;;  %vm800_vm5 = vcmask 982016   ;;  %v1197_v39 = vperm.slane %v2411_v62, 2 }
 0x183   :  { %v2783_v14 = vpop.permute.xlu0 %889  ;;  %1691 = vmatpush.msk.msrb.mxu0 %vm199_vm11, %v3097_v0  ;;  %vm782_vm11 = vcmp.eq.s32.totalorder %v778_v11, 1  ;;  %vm1018_vm8 = vcmp.eq.s32.totalorder %v1014_v26, 1 }
 0x184   :  { %v978_v20 = vpop.permute.xlu1 %977  ;;  %v896_v52 = vsel %vm3099_vm15, %v2728_v37, %v2783_v14  ;;  %vm971_vm15 = vcmp.eq.s32.totalorder %v967_v30, 1  ;;  %v3118_v30 = vld [vmem:[#allocation5_spill] sm:$0xff] }
 0x185   :  { %v987_v13 = vsel %vm3098_vm10, %v978_v20, %v2652_v3  ;;  %1649 = vmatpush.msk.msra.mxu3 %vm877_vm1, %v896_v52  ;;  %1692 = vmatpush.msk.msrb.mxu0 %vm151_vm14, %v3100_v35  ;;  %v825_v3 = vperm.slane %v2789_v22, 1  ;;  %vm1201_vm1 = vcmp.eq.s32.totalorder %v1197_v39, 1  ;;  %v1104_v52 = vperm.slane %v2577_v4, 2  ;;  %v2835_v35 = vld [vmem:[%s2962_s1 + $0x8] sm:$0xff] }
 0x186   :  { %1620 = vmatpush.msk.msra.mxu1 %vm968_vm4, %v987_v13  ;;  %vm3105_vm4 = vcmask 531456   ;;  %vm1396_vm14 = vcmask 719872   ;;  %vm1155_vm10 = vcmp.eq.s32.totalorder %v1151_v21, 1  ;;  %v733_v39 = vperm.slane %v2212_v16, 2 }
 0x187   :  { %1693 = vmatpush.msk.msrb.mxu0 %vm104_vm2, %v3102_v43  ;;  %vm829_vm0 = vcmp.eq.s32.totalorder %v825_v3, 1  ;;  %v1058_v3 = vperm.slane %v2629_v57, 2  ;;  %v1013_v43 = vperm.slane %v2671_v23, 2  ;;  %v966_v57 = vperm.slane %v2707_v2, 2 }
 0x188   :  { %1621 = vmatpush.msk.msra.mxu1 %vm922_vm3, %v941_v41  ;;  %v872_v41 = vperm.slane %v2763_v61, 0  ;;  %vm1108_vm3 = vcmp.eq.s32.totalorder %v1104_v52, 1  ;;  %vm3107_vm2 = vcmask 515072   ;;  %v875_v16 = vperm.slane %v2763_v61, 3 }
 0x189   :  { %1694 = vmatpush.msk.msrb.mxu0 %vm57_vm6, %v3103_v24  ;;  %v838_v4 = vpop.permute.xlu2 %837  ;;  %v3106_v24 = vld [vmem:[#allocation9_spill] sm:$0xff]  ;;  %v1127_v33 = vsel %vm3107_vm2, %v2477_v58, %v2755_v15  ;;  %vm1062_vm6 = vcmp.eq.s32.totalorder %v1058_v3, 1  ;;  %v777_v58 = vperm.slane %v2805_v31, 0  ;;  %vm737_vm2 = vcmp.eq.s32.totalorder %v733_v39, 1 }
 0x18a   :  { %vm876_vm12 = vcmp.eq.s32.totalorder %v872_v41, 1  ;;  %1536 = vmatmul.f32.vlgmr.msrb.gmra.mxu0 %v2825_v34  ;;  %v617_v52 = vperm.slane %v3068_v6, 2  ;;  %v826_v3 = vperm.slane %v2789_v22, 2  ;;  %v523_v6 = vperm.slane %v2347_v9, 2 }
 0x18b   :  { %v840_v46 = vpop.permute.xlu0 %839 }
 0x18c   :  { %v2800_v55 = vpop.permute.xlu1 %841  ;;  %v848_v2 = vsel %vm847_vm7, %v838_v4, %v840_v46  ;;  %v827_v4 = vperm.slane %v2789_v22, 3 }
 0x18d   :  { %v849_v32 = vsel %vm847_vm7, %v840_v46, %v2800_v55  ;;  %v874_v46 = vperm.slane %v2763_v61, 2 }
 0x18e   :  { %1650 = vmatpush.msk.msra.mxu3 %vm829_vm0, %v849_v32  ;;  %v1739_v32 = vunpack.i.h.bf16 %v3106_v24  ;;  %vm3108_vm0 = vcmask 580608   ;;  %v429_v24 = vperm.slane %v2378_v29, 2  ;;  %v335_v29 = vperm.slane %v2427_v7, 2 }
 0x18f   :  { %v194_v7 = vperm.slane %v2473_v1, 2  ;;  %v3129_v1 = vld [vmem:[#allocation13_spill] sm:$0xff] }
 0x193   :  { %v1031_v0 = vpop.permute.xlu0 %1030 }
 0x194   :  { %v2816_v20 = vpop.permute.xlu1 %792  ;;  %v1037_v62 = vsel %vm3105_vm4, %v1031_v0, %v1744_v42  ;;  %vm1017_vm4 = vcmp.eq.s32.totalorder %v1013_v43, 1  ;;  %v892_v42 = vpop.permute.xlu2 %891 }
 0x195   :  { %v802_v13 = vsel %vm800_vm5, %v2816_v20, %v2809_v49  ;;  %1700 = vmatpush.msk.msrb.mxu2 %vm1018_vm8, %v1037_v62 }
 0x196   :  { %1651 = vmatpush.msk.msra.mxu3 %vm782_vm11, %v802_v13  ;;  %vm3109_vm11 = vcmask 596992   ;;  %v662_v13 = vperm.slane %v2247_v48, 2  ;;  %v1729_v48 = vunpack.i.h.bf16 %v3118_v30 }
 0x197   :  { %1595 = vmatmul.msk.f32.vlgmr.msra.gmra.mxu3 %vm1396_vm14, %v2835_v35 }
 0x198   :  { %1668 = vmatpush.msk.msrb.mxu3 %vm1247_vm13, %v2585_v5  ;;  %v824_v5 = vperm.slane %v2789_v22, 0  ;;  %vm3110_vm13 = vcmask 523264  }
 0x19a   :  { %1669 = vmatpush.msk.msrb.mxu3 %vm1201_vm1, %v2633_v17  ;;  %vm828_vm8 = vcmp.eq.s32.totalorder %v824_v5, 1  ;;  %vm970_vm1 = vcmp.eq.s32.totalorder %v966_v57, 1  ;;  %v3121_v57 = vld [vmem:[#allocation34_spill] sm:$0xff] }
 0x19b   :  { %v886_v17 = vpop.permute.xlu0 %885 }
 0x19c   :  { %1670 = vmatpush.msk.msrb.mxu3 %vm1155_vm10, %v2675_v47  ;;  %v984_v11 = vpop.permute.xlu1 %983  ;;  %v895_v23 = vsel %vm3109_vm11, %v886_v17, %v2728_v37  ;;  %v1081_v47 = vsel %vm3110_vm13, %v2654_v12, %v2746_v45  ;;  %vm3111_vm10 = vcmask 531456   ;;  %v920_v37 = vperm.slane %v2718_v8, 2  ;;  %v846_v5 = vpop.permute.xlu2 %845  ;;  %v3124_v17 = vld [vmem:[#allocation25_spill] sm:$0xff] }
 0x19d   :  { %v990_v26 = vsel %vm3108_vm0, %v984_v11, %v1739_v32  ;;  %1622 = vmatpush.msk.msra.mxu1 %vm876_vm12, %v895_v23  ;;  %v1036_v15 = vsel %vm3111_vm10, %v2683_v50, %v1031_v0  ;;  %v921_v12 = vperm.slane %v2718_v8, 3  ;;  %v685_v45 = vperm.slane %v2242_v19, 2  ;;  %v3113_v50 = vld [vmem:[#allocation4_spill] sm:$0xff]  ;;  %v3126_v23 = vld [vmem:[#allocation21_spill] sm:$0xff] }
 0x19e   :  { %1671 = vmatpush.msk.msrb.mxu3 %vm1108_vm3, %v1127_v33  ;;  %1701 = vmatpush.msk.msrb.mxu2 %vm971_vm15, %v990_v26  ;;  %vm3112_vm3 = vmmov %vm3108_vm0  ;;  %vm781_vm15 = vcmp.eq.s32.totalorder %v777_v58, 1  ;;  %v1734_v21 = vunpack.i.h.bf16 %v3113_v50  ;;  %vm924_vm12 = vcmp.eq.s32.totalorder %v920_v37, 1  ;;  %vm3116_vm11 = vcmask 588800   ;;  %v3125_v26 = vld [vmem:[#allocation24_spill] sm:$0xff] }
 0x19f   :  { %1623 = vmatpush.msk.msra.mxu1 %vm828_vm8, %v848_v2  ;;  %v989_v18 = vsel %vm3112_vm3, %v2720_v59, %v984_v11  ;;  %vm2874_vm0 = vcmp.eq.s32.totalorder %v685_v45, 1  ;;  %vm3117_vm13 = vmmov %vm3116_vm11  ;;  %vm878_vm8 = vcmp.eq.s32.totalorder %v874_v46, 1  ;;  %vm666_vm10 = vcmp.eq.s32.totalorder %v662_v13, 1  ;;  %v3128_v2 = vld [vmem:[#allocation16_spill] sm:$0xff] }
 0x1a0   :  { %1672 = vmatpush.msk.msrb.mxu3 %vm1062_vm6, %v1081_v47  ;;  %vm925_vm6 = vcmp.eq.s32.totalorder %v921_v12, 1  ;;  %v382_v11 = vperm.slane %v2403_v63, 2  ;;  %v3127_v47 = vld [vmem:[#allocation17_spill] sm:$0xff]  ;;  %v52_v58 = vperm.slane %v2511_v27, 2 }
 0x1a2   :  { %1673 = vmatpush.msk.msrb.mxu3 %vm1017_vm4, %v1036_v15  ;;  %vm879_vm4 = vcmp.eq.s32.totalorder %v875_v16, 1  ;;  %v3131_v15 = vld [vmem:[#allocation7_spill] sm:$0xff] }
 0x1a3   :  { %v938_v8 = vpop.permute.xlu0 %937 }
 0x1a4   :  { %1674 = vmatpush.msk.msrb.mxu3 %vm970_vm1, %v989_v18  ;;  %v791_v0 = vpop.permute.xlu1 %790  ;;  %v943_v61 = vsel %vm3116_vm11, %v2709_v28, %v938_v8  ;;  %v944_v62 = vsel %vm3117_vm13, %v938_v8, %v1734_v21  ;;  %vm3119_vm1 = vcmask 596992   ;;  %v570_v28 = vperm.slane %v2300_v40, 2 }
 0x1a5   :  { %v801_v19 = vsel %vm800_vm5, %v791_v0, %v2816_v20  ;;  %v1390_v20 = vld [vmem:[%s2963_s2] sm:$0xff]  ;;  %1702 = vmatpush.msk.msrb.mxu2 %vm925_vm6, %v944_v62  ;;  %v897_v41 = vsel %vm3119_vm1, %v2783_v14, %v892_v42  ;;  %vm3120_vm3 = vmmov %vm3119_vm1  ;;  %v779_v40 = vperm.slane %v2805_v31, 2  ;;  %v1773_v14 = vld [vmem:[%s2960_s0 + $0x10] sm:$0xff]  ;;  %vm527_vm6 = vcmp.eq.s32.totalorder %v523_v6, 1 }
 0x1a6   :  { %1624 = vmatpush.msk.msra.mxu1 %vm781_vm15, %v801_v19  ;;  %1675 = vmatpush.msk.msrb.mxu3 %vm924_vm12, %v943_v61  ;;  %vm621_vm15 = vcmp.eq.s32.totalorder %v617_v52, 1  ;;  %vm830_vm12 = vcmp.eq.s32.totalorder %v826_v3, 1 }
 0x1a7   :  { %1594 = vmatmul.msk.f32.vlgmr.msra.gmra.mxu1 %vm1396_vm14, %v2835_v35  ;;  %1393 = vperm.xlu1 %1770, %v1390_v20   ;;  %vm783_vm11 = vcmp.eq.s32.totalorder %v779_v40, 1 }
 0x1a8   :  { %1652 = vmatpush.msk.msrb.mxu1 %vm737_vm2, %v2505_v51  ;;  %1676 = vmatpush.msk.msrb.mxu3 %vm878_vm8, %v897_v41  ;;  %v898_v51 = vsel %vm3120_vm3, %v892_v42, %v1729_v48  ;;  %vm574_vm2 = vcmp.eq.s32.totalorder %v570_v28, 1  ;;  %vm433_vm8 = vcmp.eq.s32.totalorder %v429_v24, 1  ;;  %vm198_vm3 = vcmp.eq.s32.totalorder %v194_v7, 1 }
 0x1a9   :  { %1703 = vmatpush.msk.msrb.mxu2 %vm879_vm4, %v898_v51  ;;  %vm339_vm4 = vcmp.eq.s32.totalorder %v335_v29, 1 }
 0x1aa   :  { %1653 = vmatpush.msk.msrb.mxu1 %vm2874_vm0, %v2539_v54  ;;  %v477_v54 = vperm.slane %v2355_v60, 2  ;;  %vm831_vm0 = vcmp.eq.s32.totalorder %v827_v4, 1  ;;  %v547_v60 = vsel %vm544_vm9, %v3121_v57, %v2703_v10  ;;  %vm386_vm9 = vcmp.eq.s32.totalorder %v382_v11, 1 }
 0x1ab   :  { %v844_v9 = vpop.permute.xlu0 %843  ;;  %v287_v10 = vperm.slane %v2438_v56, 2  ;;  %v146_v56 = vperm.slane %v2491_v53, 2 }
 0x1ac   :  { %1654 = vmatpush.msk.msrb.mxu1 %vm666_vm10, %v1773_v14  ;;  %v797_v43 = vpop.permute.xlu1 %796  ;;  %v850_v22 = vsel %vm847_vm7, %v2800_v55, %v844_v9  ;;  %v851_v32 = vsel %vm847_vm7, %v844_v9, %v846_v5  ;;  %vm481_vm13 = vcmp.eq.s32.totalorder %v477_v54, 1  ;;  %v780_v55 = vperm.slane %v2805_v31, 3 }
 0x1ad   :  { %1677 = vmatpush.msk.msrb.mxu3 %vm830_vm12, %v850_v22  ;;  %1704 = vmatpush.msk.msrb.mxu2 %vm831_vm0, %v851_v32  ;;  %v240_v31 = vperm.slane %v2456_v38, 2  ;;  %vm291_vm1 = vcmp.eq.s32.totalorder %v287_v10, 1  ;;  %v99_v38 = vperm.slane %v2500_v44, 2 }
 0x1ae   :  { %1655 = vmatpush.msk.msrb.mxu1 %vm621_vm15, %v2637_v25  ;;  %v803_v25 = vsel %vm800_vm5, %v2809_v49, %v797_v43  ;;  %vm784_vm7 = vcmp.eq.s32.totalorder %v780_v55, 1  ;;  %v3123_v49 = vld [vmem:[#allocation28_spill] sm:$0xff] }
 0x1af   :  { %1678 = vmatpush.msk.msrb.mxu3 %vm783_vm11, %v803_v25  ;;  %vm244_vm10 = vcmp.eq.s32.totalorder %v240_v31, 1  ;;  %vm103_vm15 = vcmp.eq.s32.totalorder %v99_v38, 1 }
 0x1b0   :  { %1656 = vmatpush.msk.msrb.mxu1 %vm574_vm2, %v2679_v36  ;;  %1596 = vmatmul.msk.f32.vlgmr.msrb.gmra.mxu3 %vm1396_vm14, %v2835_v35  ;;  %v3122_v36 = vld [vmem:[#allocation31_spill] sm:$0xff]  ;;  %vm3132_vm2 = vcmask 7168  }
 0x1b1   :  { %vm3133_vm12 = vmmov %vm3132_vm2 }
 0x1b2   :  { %1657 = vmatpush.msk.msrb.mxu1 %vm527_vm6, %v547_v60 }
 0x1b3   :  { %v799_v63 = vpop.permute.xlu0 %798 }
 0x1b4   :  { %1658 = vmatpush.msk.msrb.mxu1 %vm481_vm13, %v3122_v36  ;;  %v804_v33 = vsel %vm800_vm5, %v797_v43, %v799_v63  ;;  %vm150_vm5 = vcmp.eq.s32.totalorder %v146_v56, 1 }
 0x1b5   :  { %1705 = vmatpush.msk.msrb.mxu2 %vm784_vm7, %v804_v33 }
 0x1b6   :  { %1659 = vmatpush.msk.msrb.mxu1 %vm433_vm8, %v3123_v49  ;;  %1597 = vmatmul.msk.f32.vlgmr.msrb.gmra.mxu2 %vm1396_vm14, %v2835_v35  ;;  %vm56_vm14 = vcmp.eq.s32.totalorder %v52_v58, 1  ;;  %v3130_v35 = vld [vmem:[#allocation8_spill] sm:$0xff] }
 0x1b8   :  { %1660 = vmatpush.msk.msrb.mxu1 %vm386_vm9, %v3124_v17 }
 0x1ba   :  { %1661 = vmatpush.msk.msrb.mxu1 %vm339_vm4, %v3125_v26 }
 0x1bc   :  { %1662 = vmatpush.msk.msrb.mxu1 %vm291_vm1, %v3126_v23 }
 0x1be   :  { %1663 = vmatpush.msk.msrb.mxu1 %vm244_vm10, %v3127_v47 }
 0x1c0   :  { %1664 = vmatpush.msk.msrb.mxu1 %vm198_vm3, %v3128_v2 }
 0x1c2   :  { %1665 = vmatpush.msk.msrb.mxu1 %vm150_vm5, %v3129_v1 }
 0x1c4   :  { %1666 = vmatpush.msk.msrb.mxu1 %vm103_vm15, %v3130_v35 }
 0x1c6   :  { %1667 = vmatpush.msk.msrb.mxu1 %vm56_vm14, %v3131_v15 }
 0x1c7   :  { %1496 = vmatmul.f32.vlgmr.msrb.gmra.mxu1 %v2825_v34 }
 0x1fd   :  { %v1417_v12 = vpop.f32.mrf.mxu0 }
 0x202   :  { %v1457_v53 = vpop.f32.mrf.mxu2 }
 0x207   :  { %v1537_v42 = vpop.f32.mrf.mxu0 }
 0x219   :  { %v1394_v39 = vpop.permute.xlu1 %1393 }
 0x21a   :  { %v1477_v44 = vpop.f32.mrf.mxu3  ;;  %v1458_v37 = vadd.f32 %v1457_v53, %v1394_v39  ;;  %v1418_v27 = vadd.f32 %v1417_v12, %v1394_v39  ;;  %v1538_v16 = vadd.f32 %v1537_v42, %v1394_v39 }
 0x21c   :  { %v1478_v45 = vadd.f32 %v1477_v44, %v1458_v37 }
 0x21e   :  { %1561 = vst [vmem:[%s2964_s4 + $0x8] sm:$0xff] %v1478_v45  ;;  %v1571_v8 = vmul.f32 %v1478_v45, %v1478_v45 }
 0x224   :  { %v1437_v18 = vpop.f32.mrf.mxu1 }
 0x225   :  { %v1438_v46 = vadd.f32 %v1437_v18, %v1418_v27 }
 0x227   :  { %1560 = vst [vmem:[%s2964_s4] sm:$0xff] %v1438_v46  ;;  %v1570_v13 = vmul.f32 %v1438_v46, %v1438_v46  ;;  %v1564_v59 = vadd.f32 %v1478_v45, %v1438_v46 }
 0x229   :  { %v1574_v30 = vadd.f32 %v1571_v8, %v1570_v13 }
 0x233   :  { %v1517_v0 = vpop.f32.mrf.mxu3 }
 0x239   :  { %v1557_v34 = vpop.f32.mrf.mxu2 }
 0x23a   :  { %v1558_v50 = vadd.f32 %v1557_v34, %v1538_v16 }
 0x23c   :  { %1563 = vst [vmem:[%s2964_s4 + $0x18] sm:$0xff] %v1558_v50  ;;  %v1573_v20 = vmul.f32 %v1558_v50, %v1558_v50 }
 0x244   :  { %v1497_v21 = vpop.f32.mrf.mxu1 }
 0x245   :  { %v1498_v19 = vadd.f32 %v1497_v21, %v1394_v39 }
 0x247   :  { %v1518_v61 = vadd.f32 %v1517_v0, %v1498_v19 }
 0x249   :  { %1562 = vst [vmem:[%s2964_s4 + $0x10] sm:$0xff] %v1518_v61  ;;  %v1572_v62 = vmul.f32 %v1518_v61, %v1518_v61  ;;  %v1565_v52 = vadd.f32 %v1564_v59, %v1518_v61 }
 0x24b   :  { %v1566_v48 = vadd.f32 %v1565_v52, %v1558_v50  ;;  %v1575_v41 = vadd.f32 %v1574_v30, %v1572_v62 }
 0x24d   :  { %1567 = vadd.xlane.f32.xlu2 %v1566_v48  ;;  %v1576_v28 = vadd.f32 %v1575_v41, %v1573_v20 }
 0x24f   :  { %1577 = vadd.xlane.f32.xlu0 %v1576_v28 }
 0x2c0   :  { %v1568_v3 = vpop.xlane.xlu2 %1567 }
 0x2c1   :  { %1569 = vst.msk [vmem:[%s2965_s5] sm:$0xff] %vm3132_vm2, %v1568_v3 }
 0x2c2   :  { %v1578_v51 = vpop.xlane.xlu0 %1577 }
 0x2c3   :  { %1579 = vst.msk [vmem:[%s2966_s6] sm:$0xff] %vm3133_vm12, %v1578_v51 }

// kernel: down_forward.3
= control target key start
LH: loop header
LB: loop body
LE: loop exit
PB: predicated region body
PF: predicated region fallthrough
CT: control target
= control target key end

     0   :  { %v3048_v0 = vmov 0   ;;  %v3046_v2 = vmov 0.0   ;;  %s1803_s29 = smov 73   ;;  %s1804_s30 = smov 65   ;;  %vm3050_vm0 = vcmask 596992   ;;  %vm3051_vm1 = vcmask 588800   ;;  %s3037_s4 = inlined_call_operand.vmem [shape: f32[8,1], index: 4, kind: input, shape index: {}]   ;;  %s3038_s5 = inlined_call_operand.vmem [shape: f32[8,1], index: 5, kind: input, shape index: {}]   ;;  %s3039_s0 = inlined_call_operand.vmem [shape: f32[8,512], index: 0, kind: input, shape index: {}]   ;;  %s3040_s3 = inlined_call_operand.vmem [shape: s32[8,512], index: 3, kind: input, shape index: {}]   ;;  %s3041_s1 = inlined_call_operand.vmem [shape: f32[8,216], index: 1, kind: input, shape index: {}]   ;;  %s3042_s2 = inlined_call_operand.vmem [shape: f32[8,1], index: 2, kind: input, shape index: {}]   ;;  %s3043_s6 = inlined_call_operand.vmem [shape: f32[8,512], index: 6, kind: output, shape index: {0}]   ;;  %s3044_s7 = inlined_call_operand.vmem [shape: f32[1,8,1], index: 7, kind: output, shape index: {1}]   ;;  %s3045_s8 = inlined_call_operand.vmem [shape: f32[1,8,1], index: 8, kind: output, shape index: {2}]  }
   0x1   :  { %1755 = vset.pattern.permute.xlu0 %v3048_v0  ;;  %v30_v1 = vld [vmem:[%s3037_s4] sm:$0xff]  ;;  %1757 = vrot.lane.b32.xlu1 %v3046_v2, %s1803_s29  ;;  %s1805_s11 = smov 72   ;;  %s1806_s4 = smov 57   ;;  %v27_v6 = vld [vmem:[%s3039_s0 + $0x8] sm:$0xff]  ;;  %v29_v7 = vld [vmem:[%s3039_s0 + $0x18] sm:$0xff]  ;;  %vm3052_vm2 = vcmask 580608  }
   0x2   :  { %33 = vperm.xlu0 %1755, %v30_v1   ;;  %1772 = vrot.lane.b32.xlu2 %v3046_v2, %s1804_s30  ;;  %v40_v3 = vld [vmem:[%s3038_s5] sm:$0xff]  ;;  %s1807_s12 = smov 71   ;;  %s1808_s13 = smov 64   ;;  %v28_v15 = vld [vmem:[%s3039_s0 + $0x10] sm:$0xff]  ;;  %vm3056_vm3 = vcmask 523264   ;;  %vm3054_vm4 = vcmask 531456  }
   0x3   :  { %s1809_s14 = smov 9   ;;  %s1810_s5 = smov 63   ;;  %v26_v5 = vld [vmem:[%s3039_s0] sm:$0xff]  ;;  %vm3057_vm5 = vcmask 515072   ;;  %vm3062_vm6 = vcmask 457728   ;;  %vm3061_vm7 = vcmask 465920  }
   0x4   :  { %s1811_s15 = smov 56   ;;  %s1812_s16 = smov 55   ;;  %vm3070_vm8 = vcmask 449536   ;;  %vm3069_vm11 = vcmask 72704  }
   0x5   :  { %s1813_s0 = smov 121   ;;  %s1814_s25 = smov 8  }
   0x6   :  { %s1815_s26 = smov 127   ;;  %s1816_s27 = smov 1  }
   0x7   :  { %s1817_s28 = smov 7  }
   0x9   :  { %1762 = vrot.lane.b32.xlu1 %v3046_v2, %s1805_s11 }
   0xa   :  { %43 = vperm.xlu0 %1755, %v40_v3   ;;  %1787 = vrot.lane.b32.xlu2 %v3046_v2, %s1806_s4 }
  0x11   :  { %1777 = vrot.lane.b32.xlu1 %v3046_v2, %s1808_s13 }
  0x12   :  { %1767 = vrot.lane.b32.xlu0 %v3046_v2, %s1807_s12  ;;  %518 = vrot.lane.b32.xlu2 %v3046_v2, %s1809_s14 }
  0x19   :  { %1792 = vrot.lane.b32.xlu1 %v3046_v2, %s1811_s15 }
  0x1a   :  { %1782 = vrot.lane.b32.xlu0 %v3046_v2, %s1810_s5 }
  0x22   :  { %1797 = vrot.lane.b32.xlu0 %v3046_v2, %s1812_s16 }
  0x5c   :  { %v1960_v22 = vpop.permute.xlu2 %1772 }
  0x5d   :  { %3080 = vst [vmem:[#allocation4_spill] sm:$0xff] %v1960_v22  ;;  %v1774_v58 = vunpack.i.l.bf16 %v1960_v22 }
  0x64   :  { %v1968_v23 = vpop.permute.xlu2 %1787 }
  0x65   :  { %3081 = vst [vmem:[#allocation5_spill] sm:$0xff] %v1968_v23 }
  0x6c   :  { %v1982_v25 = vpop.permute.xlu2 %518 }
  0x73   :  { %v1976_v24 = vpop.permute.xlu1 %1757 }
  0x74   :  { %v34_v4 = vpop.permute.xlu0 %33  ;;  %3082 = vst [vmem:[#allocation6_spill] sm:$0xff] %v1976_v24  ;;  %v1759_v38 = vunpack.i.l.bf16 %v1976_v24 }
  0x75   :  { %v36_v8 = vmul.f32 %v34_v4, %v26_v5  ;;  %v37_v9 = vmul.f32 %v34_v4, %v27_v6  ;;  %v39_v10 = vmul.f32 %v34_v4, %v29_v7  ;;  %v38_v19 = vmul.f32 %v34_v4, %v28_v15 }
  0x7b   :  { %v1988_v27 = vpop.permute.xlu1 %1762 }
  0x7c   :  { %v44_v11 = vpop.permute.xlu0 %43  ;;  %3084 = vst [vmem:[#allocation8_spill] sm:$0xff] %v1988_v27  ;;  %v1764_v34 = vunpack.i.l.bf16 %v1988_v27 }
  0x7d   :  { %v46_v12 = vadd.f32 %v44_v11, %v36_v8  ;;  %v47_v13 = vadd.f32 %v44_v11, %v37_v9  ;;  %v49_v14 = vadd.f32 %v44_v11, %v39_v10  ;;  %v48_v20 = vadd.f32 %v44_v11, %v38_v19 }
  0x7f   :  { %v1904_v16 = vmax.f32 %v46_v12, 0.0  ;;  %v1906_v17 = vmax.f32 %v47_v13, 0.0  ;;  %v1908_v18 = vmax.f32 %v49_v14, 0.0  ;;  %v1916_v21 = vmax.f32 %v48_v20, 0.0 }
  0x81   :  { %101 = vrot.lane.b32.xlu0 %v1908_v18, %s1803_s29  ;;  %97 = vrot.lane.b32.xlu2 %v1906_v17, %s1803_s29 }
  0x82   :  { %95 = vrot.lane.b32.xlu1 %v1904_v16, %s1803_s29 }
  0x83   :  { %v1998_v30 = vpop.permute.xlu1 %1777 }
  0x84   :  { %v1986_v26 = vpop.permute.xlu0 %1767  ;;  %3086 = vst [vmem:[#allocation10_spill] sm:$0xff] %v1998_v30  ;;  %v1779_v59 = vunpack.i.l.bf16 %v1998_v30 }
  0x85   :  { %3083 = vst [vmem:[#allocation7_spill] sm:$0xff] %v1986_v26  ;;  %v1769_v51 = vunpack.i.l.bf16 %v1986_v26 }
  0x89   :  { %144 = vrot.lane.b32.xlu0 %v1906_v17, %s1805_s11  ;;  %99 = vrot.lane.b32.xlu2 %v1916_v21, %s1803_s29 }
  0x8a   :  { %146 = vrot.lane.b32.xlu1 %v1916_v21, %s1805_s11 }
  0x8b   :  { %v2018_v35 = vpop.permute.xlu1 %1792 }
  0x8c   :  { %v1996_v29 = vpop.permute.xlu0 %1782  ;;  %3088 = vst [vmem:[#allocation12_spill] sm:$0xff] %v2018_v35 }
  0x8d   :  { %3085 = vst [vmem:[#allocation9_spill] sm:$0xff] %v1996_v29  ;;  %v1784_v19 = vunpack.i.l.bf16 %v1996_v29 }
  0x91   :  { %193 = vrot.lane.b32.xlu0 %v1916_v21, %s1807_s12  ;;  %142 = vrot.lane.b32.xlu2 %v1904_v16, %s1805_s11 }
  0x92   :  { %189 = vrot.lane.b32.xlu1 %v1904_v16, %s1807_s12 }
  0x94   :  { %v2013_v33 = vpop.permute.xlu0 %1797 }
  0x99   :  { %237 = vrot.lane.b32.xlu0 %v1904_v16, %s1804_s30  ;;  %148 = vrot.lane.b32.xlu2 %v1908_v18, %s1805_s11 }
  0x9a   :  { %195 = vrot.lane.b32.xlu1 %v1908_v18, %s1807_s12 }
  0xa1   :  { %243 = vrot.lane.b32.xlu0 %v1908_v18, %s1804_s30  ;;  %191 = vrot.lane.b32.xlu2 %v1906_v17, %s1807_s12 }
  0xa2   :  { %239 = vrot.lane.b32.xlu1 %v1906_v17, %s1804_s30 }
  0xa9   :  { %285 = vrot.lane.b32.xlu0 %v1906_v17, %s1808_s13  ;;  %241 = vrot.lane.b32.xlu2 %v1916_v21, %s1804_s30 }
  0xaa   :  { %287 = vrot.lane.b32.xlu1 %v1916_v21, %s1808_s13 }
  0xb1   :  { %334 = vrot.lane.b32.xlu0 %v1916_v21, %s1810_s5  ;;  %283 = vrot.lane.b32.xlu2 %v1904_v16, %s1808_s13 }
  0xb2   :  { %330 = vrot.lane.b32.xlu1 %v1904_v16, %s1810_s5 }
  0xb9   :  { %378 = vrot.lane.b32.xlu0 %v1904_v16, %s1806_s4  ;;  %289 = vrot.lane.b32.xlu2 %v1908_v18, %s1808_s13 }
  0xba   :  { %336 = vrot.lane.b32.xlu1 %v1908_v18, %s1810_s5 }
  0xc1   :  { %384 = vrot.lane.b32.xlu0 %v1908_v18, %s1806_s4  ;;  %332 = vrot.lane.b32.xlu2 %v1906_v17, %s1810_s5 }
  0xc2   :  { %380 = vrot.lane.b32.xlu1 %v1906_v17, %s1806_s4 }
  0xc9   :  { %427 = vrot.lane.b32.xlu0 %v1906_v17, %s1811_s15  ;;  %382 = vrot.lane.b32.xlu2 %v1916_v21, %s1806_s4 }
  0xca   :  { %429 = vrot.lane.b32.xlu1 %v1916_v21, %s1811_s15 }
  0xd1   :  { %476 = vrot.lane.b32.xlu0 %v1916_v21, %s1812_s16  ;;  %425 = vrot.lane.b32.xlu2 %v1904_v16, %s1811_s15 }
  0xd2   :  { %472 = vrot.lane.b32.xlu1 %v1904_v16, %s1812_s16 }
  0xd9   :  { %520 = vrot.lane.b32.xlu0 %v1904_v16, %s1809_s14  ;;  %431 = vrot.lane.b32.xlu2 %v1908_v18, %s1811_s15 }
  0xda   :  { %478 = vrot.lane.b32.xlu1 %v1908_v18, %s1812_s16 }
  0xdb   :  { %v98_v28 = vpop.permute.xlu2 %97 }
  0xe1   :  { %526 = vrot.lane.b32.xlu0 %v1908_v18, %s1809_s14  ;;  %474 = vrot.lane.b32.xlu2 %v1906_v17, %s1812_s16 }
  0xe2   :  { %522 = vrot.lane.b32.xlu1 %v1906_v17, %s1809_s14 }
  0xe3   :  { %v100_v31 = vpop.permute.xlu2 %99 }
  0xe4   :  { %v2007_v32 = vsel %vm3050_vm0, %v98_v28, %v100_v31 }
  0xe5   :  { %3087 = vst [vmem:[#allocation11_spill] sm:$0xff] %v2007_v32  ;;  %v3112_v32 = vmov 0  }
  0xe9   :  { %776 = vrot.lane.b32.xlu0 %v1906_v17, %s1813_s0  ;;  %524 = vrot.lane.b32.xlu2 %v1916_v21, %s1809_s14 }
  0xea   :  { %564 = vrot.lane.b32.xlu1 %v3046_v2, %s1814_s25 }
  0xeb   :  { %v143_v36 = vpop.permute.xlu2 %142 }
  0xec   :  { %v2021_v37 = vsel %vm3051_vm1, %v1764_v34, %v143_v36 }
  0xf1   :  { %730 = vrot.lane.b32.xlu0 %v1916_v21, %s1815_s26  ;;  %566 = vrot.lane.b32.xlu2 %v1904_v16, %s1814_s25 }
  0xf2   :  { %778 = vrot.lane.b32.xlu1 %v1916_v21, %s1813_s0 }
  0xf3   :  { %v102_v39 = vpop.permute.xlu0 %101  ;;  %v149_v40 = vpop.permute.xlu2 %148 }
  0xf4   :  { %v96_v41 = vpop.permute.xlu1 %95  ;;  %v2031_v42 = vsel %vm3050_vm0, %v100_v31, %v102_v39  ;;  %v1789_v39 = vunpack.i.l.bf16 %v1968_v23 }
  0xf5   :  { %3089 = vst [vmem:[#allocation13_spill] sm:$0xff] %v2031_v42  ;;  %v2034_v43 = vsel %vm3050_vm0, %v96_v41, %v98_v28  ;;  %v2037_v44 = vsel %vm3050_vm0, %v1759_v38, %v96_v41 }
  0xf9   :  { %662 = vrot.lane.b32.xlu0 %v1906_v17, %s1816_s27  ;;  %728 = vrot.lane.b32.xlu2 %v1906_v17, %s1815_s26 }
  0xfa   :  { %774 = vrot.lane.b32.xlu1 %v1904_v16, %s1813_s0 }
  0xfb   :  { %v145_v45 = vpop.permute.xlu0 %144  ;;  %v192_v46 = vpop.permute.xlu2 %191 }
  0xfc   :  { %v147_v47 = vpop.permute.xlu1 %146  ;;  %v2046_v48 = vsel %vm3051_vm1, %v143_v36, %v145_v45 }
  0xfd   :  { %v2049_v49 = vsel %vm3051_vm1, %v147_v47, %v149_v40  ;;  %v2052_v50 = vsel %vm3051_vm1, %v145_v45, %v147_v47  ;;  %v1794_v40 = vunpack.i.l.bf16 %v2018_v35 }
  0xfe   :  { %3090 = vst [vmem:[#allocation14_spill] sm:$0xff] %v2049_v49 }
  0xff   :  { %3091 = vst [vmem:[#allocation15_spill] sm:$0xff] %v2052_v50 }
 0x101   :  { %615 = vrot.lane.b32.xlu0 %v1906_v17, %s1817_s28  ;;  %660 = vrot.lane.b32.xlu2 %v1904_v16, %s1816_s27 }
 0x102   :  { %726 = vrot.lane.b32.xlu1 %v1904_v16, %s1815_s26 }
 0x103   :  { %v194_v52 = vpop.permute.xlu0 %193  ;;  %v242_v53 = vpop.permute.xlu2 %241 }
 0x104   :  { %v190_v54 = vpop.permute.xlu1 %189  ;;  %v2062_v55 = vsel %vm3052_vm2, %v192_v46, %v194_v52 }
 0x105   :  { %3092 = vst [vmem:[#allocation16_spill] sm:$0xff] %v2062_v55  ;;  %v2065_v56 = vsel %vm3052_vm2, %v190_v54, %v192_v46  ;;  %v2068_v57 = vsel %vm3052_vm2, %v1769_v51, %v190_v54 }
 0x109   :  { %568 = vrot.lane.b32.xlu0 %v1906_v17, %s1814_s25  ;;  %613 = vrot.lane.b32.xlu2 %v1904_v16, %s1817_s28 }
 0x10a   :  { %1286 = vrot.lane.b32.xlu1 %v1906_v17, %s1812_s16 }
 0x10b   :  { %v238_v60 = vpop.permute.xlu0 %237  ;;  %v284_v61 = vpop.permute.xlu2 %283 }
 0x10c   :  { %v196_v62 = vpop.permute.xlu1 %195  ;;  %v2079_v63 = vsel %vm3056_vm3, %v1779_v59, %v284_v61  ;;  %v2082_v1 = vsel %vm3054_vm4, %v1774_v58, %v238_v60 }
 0x10d   :  { %v2085_v3 = vsel %vm3052_vm2, %v194_v52, %v196_v62 }
 0x10e   :  { %3093 = vst [vmem:[#allocation17_spill] sm:$0xff] %v2085_v3 }
 0x111   :  { %1240 = vrot.lane.b32.xlu0 %v1906_v17, %s1811_s15  ;;  %1288 = vrot.lane.b32.xlu2 %v1916_v21, %s1812_s16 }
 0x112   :  { %658 = vrot.lane.b32.xlu1 %v3046_v2, %s1816_s27 }
 0x113   :  { %v244_v4 = vpop.permute.xlu0 %243  ;;  %v290_v5 = vpop.permute.xlu2 %289 }
 0x114   :  { %v240_v6 = vpop.permute.xlu1 %239  ;;  %v2094_v7 = vsel %vm3054_vm4, %v242_v53, %v244_v4 }
 0x115   :  { %3094 = vst [vmem:[#allocation18_spill] sm:$0xff] %v2094_v7  ;;  %v2097_v8 = vsel %vm3054_vm4, %v238_v60, %v240_v6  ;;  %v2100_v9 = vsel %vm3054_vm4, %v240_v6, %v242_v53  ;;  %vm3073_vm4 = vcmask 1039360  }
 0x116   :  { %3095 = vst [vmem:[#allocation19_spill] sm:$0xff] %v2100_v9 }
 0x119   :  { %732 = vrot.lane.b32.xlu0 %v1908_v18, %s1815_s26  ;;  %780 = vrot.lane.b32.xlu2 %v1908_v18, %s1813_s0 }
 0x11a   :  { %1242 = vrot.lane.b32.xlu1 %v1916_v21, %s1811_s15 }
 0x11b   :  { %v286_v10 = vpop.permute.xlu0 %285  ;;  %v333_v11 = vpop.permute.xlu2 %332 }
 0x11c   :  { %v288_v12 = vpop.permute.xlu1 %287  ;;  %v2109_v13 = vsel %vm3056_vm3, %v284_v61, %v286_v10 }
 0x11d   :  { %v2112_v14 = vsel %vm3056_vm3, %v288_v12, %v290_v5  ;;  %v2115_v15 = vsel %vm3056_vm3, %v286_v10, %v288_v12  ;;  %v1799_v12 = vunpack.i.l.bf16 %v2013_v33 }
 0x11e   :  { %3096 = vst [vmem:[#allocation20_spill] sm:$0xff] %v2112_v14 }
 0x11f   :  { %3097 = vst [vmem:[#allocation21_spill] sm:$0xff] %v2115_v15 }
 0x121   :  { %1196 = vrot.lane.b32.xlu0 %v1916_v21, %s1806_s4  ;;  %611 = vrot.lane.b32.xlu2 %v3046_v2, %s1817_s28 }
 0x122   :  { %782 = vrot.lane.b32.xlu1 %v3046_v2, %s1813_s0 }
 0x123   :  { %v335_v20 = vpop.permute.xlu0 %334  ;;  %v383_v28 = vpop.permute.xlu2 %382 }
 0x124   :  { %v331_v31 = vpop.permute.xlu1 %330  ;;  %v2125_v34 = vsel %vm3057_vm5, %v333_v11, %v335_v20 }
 0x125   :  { %3098 = vst [vmem:[#allocation22_spill] sm:$0xff] %v2125_v34  ;;  %v2128_v36 = vsel %vm3057_vm5, %v331_v31, %v333_v11  ;;  %v2131_v38 = vsel %vm3057_vm5, %v1784_v19, %v331_v31 }
 0x129   :  { %1147 = vrot.lane.b32.xlu0 %v1906_v17, %s1810_s5  ;;  %1194 = vrot.lane.b32.xlu2 %v1906_v17, %s1806_s4 }
 0x12a   :  { %1284 = vrot.lane.b32.xlu1 %v1904_v16, %s1812_s16 }
 0x12b   :  { %v379_v41 = vpop.permute.xlu0 %378  ;;  %v426_v45 = vpop.permute.xlu2 %425 }
 0x12c   :  { %v337_v46 = vpop.permute.xlu1 %336  ;;  %v2142_v47 = vsel %vm3062_vm6, %v1794_v40, %v426_v45  ;;  %v2145_v51 = vsel %vm3061_vm7, %v1789_v39, %v379_v41 }
 0x12d   :  { %v2148_v52 = vsel %vm3057_vm5, %v335_v20, %v337_v46 }
 0x12e   :  { %3099 = vst [vmem:[#allocation23_spill] sm:$0xff] %v2148_v52 }
 0x131   :  { %664 = vrot.lane.b32.xlu0 %v1916_v21, %s1816_s27  ;;  %734 = vrot.lane.b32.xlu2 %v3046_v2, %s1815_s26 }
 0x132   :  { %1149 = vrot.lane.b32.xlu1 %v1916_v21, %s1810_s5 }
 0x133   :  { %v385_v53 = vpop.permute.xlu0 %384  ;;  %v432_v54 = vpop.permute.xlu2 %431 }
 0x134   :  { %v381_v58 = vpop.permute.xlu1 %380  ;;  %v2157_v59 = vsel %vm3061_vm7, %v383_v28, %v385_v53  ;;  %v2215_v53 = vld [vmem:[%s3040_s3] ss:$8 sm:$0xf] }
 0x135   :  { %3100 = vst [vmem:[#allocation24_spill] sm:$0xff] %v2157_v59  ;;  %v2160_v60 = vsel %vm3061_vm7, %v379_v41, %v381_v58  ;;  %v2163_v61 = vsel %vm3061_vm7, %v381_v58, %v383_v28  ;;  %vm65_vm9 = vcmp.ge.s32.totalorder %v2215_v53, 0 }
 0x136   :  { %3101 = vst [vmem:[#allocation25_spill] sm:$0xff] %v2163_v61  ;;  %v2284_v15 = vsel %vm65_vm9, 1, %v3112_v32 }
 0x139   :  { %1192 = vrot.lane.b32.xlu0 %v1904_v16, %s1806_s4  ;;  %1238 = vrot.lane.b32.xlu2 %v1904_v16, %s1811_s15 }
 0x13a   :  { %1101 = vrot.lane.b32.xlu1 %v1906_v17, %s1808_s13 }
 0x13b   :  { %v428_v62 = vpop.permute.xlu0 %427  ;;  %v2171_v4 = vpop.permute.xlu2 %474 }
 0x13c   :  { %v430_v5 = vpop.permute.xlu1 %429  ;;  %v2174_v6 = vsel %vm3062_vm6, %v426_v45, %v428_v62 }
 0x13d   :  { %v2177_v10 = vsel %vm3062_vm6, %v430_v5, %v432_v54  ;;  %v2180_v11 = vsel %vm3062_vm6, %v428_v62, %v430_v5  ;;  %v2220_v54 = vld [vmem:[%s3040_s3 + $0x1] ss:$8 sm:$0xf]  ;;  %v2233_v5 = vld [vmem:[%s3040_s3 + $0x2] ss:$8 sm:$0xf] }
 0x13e   :  { %3102 = vst [vmem:[#allocation26_spill] sm:$0xff] %v2177_v10  ;;  %vm69_vm10 = vcmp.le.s32.totalorder %v2220_v54, 6  ;;  %vm70_vm12 = vcmp.ge.s32.totalorder %v2233_v5, 1  ;;  %vm71_vm14 = vcmp.le.s32.totalorder %v2233_v5, 6  ;;  %s1818_s3 = smov 119  }
 0x13f   :  { %3103 = vst [vmem:[#allocation27_spill] sm:$0xff] %v2180_v11  ;;  %vm2247_vm13 = vmand %vm65_vm9, %vm69_vm10 }
 0x140   :  { %3106 = vst [vmem:[#allocation30_spill] sm:$0xff] %v2220_v54  ;;  %vm759_vm15 = vmand %vm2247_vm13, %vm70_vm12 }
 0x141   :  { %666 = vrot.lane.b32.xlu0 %v1908_v18, %s1816_s27  ;;  %1103 = vrot.lane.b32.xlu2 %v1916_v21, %s1808_s13  ;;  %vm711_vm0 = vmand %vm65_vm9, %vm71_vm14  ;;  %v2275_v50 = vsel %vm759_vm15, 1, %v3112_v32  ;;  %vm3063_vm15 = vcmp.ge.s32.totalorder %v2220_v54, 1 }
 0x142   :  { %1290 = vrot.lane.b32.xlu1 %v1908_v18, %s1812_s16  ;;  %v2278_v55 = vsel %vm711_vm0, 1, %v3112_v32  ;;  %v762_v9 = vperm.slane %v2275_v50, 1  ;;  %vm643_vm1 = vmand %vm65_vm9, %vm70_vm12  ;;  %vm3072_vm0 = vcmask 990208   ;;  %v761_v30 = vperm.slane %v2275_v50, 0 }
 0x143   :  { %v477_v19 = vpop.permute.xlu0 %476  ;;  %v525_v20 = vpop.permute.xlu2 %524  ;;  %v714_v34 = vperm.slane %v2278_v55, 1  ;;  %vm2311_vm5 = vmand %vm65_vm9, %vm3063_vm15  ;;  %v713_v29 = vperm.slane %v2278_v55, 0 }
 0x144   :  { %v2189_v28 = vpop.permute.xlu1 %472  ;;  %v2193_v31 = vsel %vm3070_vm8, %v2171_v4, %v477_v19  ;;  %vm766_vm2 = vcmp.eq.s32.totalorder %v762_v9, 1  ;;  %vm596_vm7 = vmand %vm2311_vm5, %vm71_vm14  ;;  %vm765_vm15 = vcmp.eq.s32.totalorder %v761_v30, 1  ;;  %v2384_v49 = vsel %vm2311_vm5, 1, %v3112_v32 }
 0x145   :  { %3104 = vst [vmem:[#allocation28_spill] sm:$0xff] %v2193_v31  ;;  %v2197_v39 = vsel %vm3070_vm8, %v1799_v12, %v2189_v28  ;;  %v691_v31 = vperm.slane %v2284_v15, 1  ;;  %vm718_vm3 = vcmp.eq.s32.totalorder %v714_v34, 1  ;;  %v2337_v34 = vsel %vm596_vm7, 1, %v3112_v32 }
 0x146   :  { %v599_v30 = vperm.slane %v2337_v34, 1  ;;  %vm66_vm7 = vcmp.ge.s32.totalorder %v2215_v53, 1  ;;  %3120 = vst [vmem:[#allocation35_spill] sm:$0xff] %v2384_v49  ;;  %v552_v23 = vperm.slane %v2384_v49, 1 }
 0x149   :  { %1145 = vrot.lane.b32.xlu0 %v1904_v16, %s1810_s5  ;;  %617 = vrot.lane.b32.xlu2 %v1916_v21, %s1817_s28 }
 0x14a   :  { %1056 = vrot.lane.b32.xlu1 %v1906_v17, %s1804_s30 }
 0x14b   :  { %v2205_v40 = vpop.permute.xlu0 %520  ;;  %v2207_v41 = vpop.permute.xlu2 %566 }
 0x14c   :  { %v479_v45 = vpop.permute.xlu1 %478 }
 0x14d   :  { %v2210_v46 = vsel %vm3070_vm8, %v477_v19, %v479_v45  ;;  %v3108_v45 = vmov 0  ;;  %vm717_vm8 = vcmp.eq.s32.totalorder %v713_v29, 1 }
 0x14e   :  { %3105 = vst [vmem:[#allocation29_spill] sm:$0xff] %v2210_v46  ;;  %v3109_v45 = vsel %vm2247_vm13, 4294967295, %v3108_v45 }
 0x14f   :  { %3110 = vst [vmem:[#allocation32_spill] sm:$0xff] %v3109_v45 }
 0x151   :  { %619 = vrot.lane.b32.xlu0 %v1908_v18, %s1817_s28  ;;  %1058 = vrot.lane.b32.xlu2 %v1916_v21, %s1804_s30 }
 0x152   :  { %1244 = vrot.lane.b32.xlu1 %v1908_v18, %s1811_s15 }
 0x153   :  { %v527_v58 = vpop.permute.xlu0 %526  ;;  %v2228_v62 = vpop.permute.xlu2 %728 }
 0x154   :  { %v2237_v12 = vpop.permute.xlu1 %522  ;;  %v2240_v19 = vsel %vm3069_vm11, %v525_v20, %v527_v58 }
 0x155   :  { %3107 = vst [vmem:[#allocation31_spill] sm:$0xff] %v2240_v19  ;;  %v2253_v2 = vsel %vm3069_vm11, %v2237_v12, %v525_v20  ;;  %vm2373_vm11 = vmand %vm66_vm7, %vm69_vm10 }
 0x156   :  { %3111 = vst [vmem:[#allocation33_spill] sm:$0xff] %v2253_v2  ;;  %v2304_v2 = vsel %vm643_vm1, 1, %v3112_v32  ;;  %vm695_vm1 = vcmp.eq.s32.totalorder %v691_v31, 1 }
 0x157   :  { %v646_v9 = vperm.slane %v2304_v2, 1 }
 0x159   :  { %1099 = vrot.lane.b32.xlu0 %v1904_v16, %s1808_s13  ;;  %570 = vrot.lane.b32.xlu2 %v1916_v21, %s1814_s25  ;;  %vm650_vm6 = vcmp.eq.s32.totalorder %v646_v9, 1 }
 0x15a   :  { %1009 = vrot.lane.b32.xlu1 %v1906_v17, %s1807_s12 }
 0x15b   :  { %v777_v58 = vpop.permute.xlu0 %776  ;;  %v2266_v0 = vpop.permute.xlu2 %660 }
 0x15c   :  { %v2272_v20 = vpop.permute.xlu1 %564 }
 0x161   :  { %963 = vrot.lane.b32.xlu0 %v1906_v17, %s1805_s11  ;;  %1011 = vrot.lane.b32.xlu2 %v1916_v21, %s1807_s12 }
 0x162   :  { %1198 = vrot.lane.b32.xlu1 %v1908_v18, %s1806_s4  ;;  %s1819_s4 = smov 120  }
 0x163   :  { %v2298_v61 = vpop.permute.xlu0 %730  ;;  %v2300_v11 = vpop.permute.xlu2 %613 }
 0x164   :  { %v779_v24 = vpop.permute.xlu1 %778  ;;  %v738_v22 = vsel %vm3073_vm4, %v2228_v62, %v2298_v61 }
 0x165   :  { %v786_v27 = vsel %vm3072_vm0, %v777_v58, %v779_v24 }
 0x166   :  { %1655 = vmatpush.msk.msra.mxu2 %vm766_vm2, %v786_v27  ;;  %vm3068_vm2 = vcmask 7168  }
 0x168   :  { %1656 = vmatpush.msk.msra.mxu2 %vm718_vm3, %v738_v22  ;;  %vm3067_vm3 = vcmp.le.s32.totalorder %v2215_v53, 2 }
 0x169   :  { %1151 = vrot.lane.b32.xlu0 %v1908_v18, %s1810_s5  ;;  %572 = vrot.lane.b32.xlu2 %v1908_v18, %s1814_s25 }
 0x16a   :  { %965 = vrot.lane.b32.xlu1 %v1916_v21, %s1805_s11  ;;  %1657 = vmatpush.msk.msra.mxu2 %vm695_vm1, %v1906_v17  ;;  %vm2347_vm1 = vmand %vm3067_vm3, %vm69_vm10  ;;  %vm621_vm3 = vcmask 56320  }
 0x16b   :  { %v2332_v22 = vpop.permute.xlu0 %662  ;;  %v2334_v27 = vpop.permute.xlu2 %1288 }
 0x16c   :  { %3115 = vst [vmem:[#allocation34_spill] sm:$0xff] %v2334_v27  ;;  %v775_v31 = vpop.permute.xlu1 %774  ;;  %v670_v45 = vsel %vm3068_vm2, %v2266_v0, %v2332_v22  ;;  %vm603_vm2 = vcmp.eq.s32.totalorder %v599_v30, 1 }
 0x16d   :  { %v785_v42 = vsel %vm3072_vm0, %v775_v31, %v777_v58  ;;  %1658 = vmatpush.msk.msra.mxu2 %vm650_vm6, %v670_v45  ;;  %vm1269_vm6 = vmand %vm2347_vm1, %vm71_vm14 }
 0x16e   :  { %1628 = vmatpush.msk.msra.mxu0 %vm765_vm15, %v785_v42  ;;  %v690_v42 = vperm.slane %v2284_v15, 0  ;;  %vm503_vm15 = vmand %vm2311_vm5, %vm70_vm12  ;;  %v2390_v7 = vsel %vm1269_vm6, 1, %v3112_v32 }
 0x16f   :  { %v2395_v29 = vsel %vm503_vm15, 1, %v3112_v32  ;;  %vm455_vm5 = vmand %vm2373_vm11, %vm71_vm14  ;;  %v1272_v52 = vperm.slane %v2390_v7, 1  ;;  %vm556_vm15 = vcmp.eq.s32.totalorder %v552_v23, 1 }
 0x170   :  { %vm694_vm10 = vcmp.eq.s32.totalorder %v690_v42, 1  ;;  %vm361_vm6 = vmand %vm2373_vm11, %vm70_vm12 }
 0x171   :  { %1007 = vrot.lane.b32.xlu0 %v1904_v16, %s1807_s12  ;;  %1054 = vrot.lane.b32.xlu2 %v1904_v16, %s1804_s30  ;;  %v2450_v59 = vsel %vm361_vm6, 1, %v3112_v32  ;;  %vm3126_vm6 = vcmp.ge.s32.totalorder %v2220_v54, 1 }
 0x172   :  { %917 = vrot.lane.b32.xlu1 %v1906_v17, %s1803_s29 }
 0x173   :  { %v2377_v58 = vpop.permute.xlu0 %615  ;;  %v2379_v31 = vpop.permute.xlu2 %780 }
 0x174   :  { %v727_v3 = vpop.permute.xlu1 %726  ;;  %v623_v30 = vsel %vm621_vm3, %v2300_v11, %v2377_v58  ;;  %v2403_v26 = vsel %vm3072_vm0, %v779_v24, %v2379_v31 }
 0x175   :  { %v737_v14 = vsel %vm3073_vm4, %v727_v3, %v2228_v62  ;;  %1659 = vmatpush.msk.msra.mxu2 %vm603_vm2, %v623_v30  ;;  %3121 = vst [vmem:[#allocation36_spill] sm:$0xff] %v2403_v26  ;;  %vm408_vm2 = vmand %vm2373_vm11, %vm65_vm9  ;;  %v506_v3 = vperm.slane %v2395_v29, 1  ;;  %v2414_v62 = vsel %vm455_vm5, 1, %v3112_v32  ;;  %vm1276_vm5 = vcmp.eq.s32.totalorder %v1272_v52, 1 }
 0x176   :  { %1629 = vmatpush.msk.msra.mxu0 %vm717_vm8, %v737_v14  ;;  %vm2420_vm8 = vmand %vm66_vm7, %vm65_vm9  ;;  %v2435_v14 = vsel %vm408_vm2, 1, %v3112_v32  ;;  %v458_v26 = vperm.slane %v2414_v62, 1  ;;  %vm3124_vm2 = vcmask 449536   ;;  %vm3125_vm4 = vcmask 72704  }
 0x177   :  { %vm313_vm0 = vmand %vm2420_vm8, %vm71_vm14  ;;  %vm510_vm11 = vcmp.eq.s32.totalorder %v506_v3, 1  ;;  %v411_v10 = vperm.slane %v2435_v14, 1  ;;  %v530_v46 = vsel %vm3125_vm4, %v2205_v40, %v2237_v12  ;;  %v645_v3 = vperm.slane %v2304_v2, 0 }
 0x178   :  { %1630 = vmatpush.msk.msra.mxu0 %vm694_vm10, %v1904_v16  ;;  %vm3074_vm10 = vcmask 64512   ;;  %v2460_v19 = vsel %vm313_vm0, 1, %v3112_v32  ;;  %vm2477_vm4 = vmand %vm2420_vm8, %vm70_vm12  ;;  %v2492_v35 = vsel %vm2420_vm8, 1, %v3112_v32 }
 0x179   :  { %871 = vrot.lane.b32.xlu0 %v1916_v21, %s1818_s3  ;;  %919 = vrot.lane.b32.xlu2 %v1916_v21, %s1803_s29  ;;  %vm3131_vm0 = vmmov %vm3124_vm2  ;;  %vm649_vm8 = vcmp.eq.s32.totalorder %v645_v3, 1 }
 0x17a   :  { %1105 = vrot.lane.b32.xlu1 %v1908_v18, %s1808_s13  ;;  %v482_v12 = vsel %vm3131_vm0, %v2189_v28, %v2171_v4  ;;  %v2512_v28 = vsel %vm2477_vm4, 1, %v3112_v32  ;;  %vm3134_vm4 = vcmask 7168  }
 0x17b   :  { %v2437_v42 = vpop.permute.xlu0 %568  ;;  %v612_v30 = vpop.permute.xlu2 %611 }
 0x17c   :  { %v2444_v45 = vpop.permute.xlu1 %1286  ;;  %v576_v23 = vsel %vm3074_vm10, %v2207_v41, %v2437_v42  ;;  %vm462_vm10 = vcmp.eq.s32.totalorder %v458_v26, 1  ;;  %v316_v26 = vperm.slane %v2460_v19, 1 }
 0x17d   :  { %1660 = vmatpush.msk.msra.mxu2 %vm556_vm15, %v576_v23  ;;  %v1295_v52 = vsel %vm3124_vm2, %v2444_v45, %v2334_v27  ;;  %v364_v23 = vperm.slane %v2450_v59, 1  ;;  %vm2468_vm15 = vmand %vm66_vm7, %vm3126_vm6  ;;  %vm415_vm7 = vcmp.eq.s32.totalorder %v411_v10, 1 }
 0x17e   :  { %1671 = vmatpush.msk.msra.mxu3 %vm1276_vm5, %v1295_v52  ;;  %v598_v52 = vperm.slane %v2337_v34, 0  ;;  %vm1223_vm5 = vmand %vm2347_vm1, %vm65_vm9  ;;  %vm320_vm0 = vcmp.eq.s32.totalorder %v316_v26, 1  ;;  %v457_v26 = vperm.slane %v2414_v62, 0 }
 0x17f   :  { %1661 = vmatpush.msk.msra.mxu2 %vm510_vm11, %v530_v46  ;;  %vm172_vm11 = vmand %vm2468_vm15, %vm71_vm14  ;;  %vm368_vm2 = vcmp.eq.s32.totalorder %v364_v23, 1  ;;  %v2521_v54 = vsel %vm1223_vm5, 1, %v3112_v32  ;;  %v223_v46 = vperm.slane %v2512_v28, 1 }
 0x180   :  { %vm125_vm6 = vmand %vm2468_vm15, %vm65_vm9  ;;  %v2531_v23 = vsel %vm172_vm11, 1, %v3112_v32 }
 0x181   :  { %822 = vrot.lane.b32.xlu0 %v1906_v17, %s1819_s4  ;;  %869 = vrot.lane.b32.xlu2 %v1906_v17, %s1818_s3  ;;  %v551_v17 = vperm.slane %v2384_v49, 0  ;;  %v269_v49 = vperm.slane %v2492_v35, 1  ;;  %vm78_vm5 = vmand %vm2468_vm15, %vm70_vm12 }
 0x182   :  { %961 = vrot.lane.b32.xlu1 %v1904_v16, %s1805_s11  ;;  %1662 = vmatpush.msk.msra.mxu2 %vm462_vm10, %v482_v12  ;;  %vm2515_vm10 = vcmp.eq.s32.totalorder %v598_v52, 1  ;;  %vm2558_vm15 = vmand %vm2347_vm1, %vm70_vm12  ;;  %v2571_v27 = vsel %vm78_vm5, 1, %v3112_v32  ;;  %vm227_vm1 = vcmp.eq.s32.totalorder %v223_v46, 1  ;;  %vm3142_vm5 = vcmask 457728  }
 0x183   :  { %v2505_v4 = vpop.permute.xlu0 %1240  ;;  %v2507_v10 = vpop.permute.xlu2 %1194  ;;  %vm273_vm11 = vcmp.eq.s32.totalorder %v269_v49, 1  ;;  %v2589_v12 = vsel %vm2558_vm15, 1, %v3112_v32 }
 0x184   :  { %1663 = vmatpush.msk.msra.mxu2 %vm415_vm7, %v2174_v6  ;;  %v659_v24 = vpop.permute.xlu1 %658  ;;  %v505_v6 = vperm.slane %v2395_v29, 0  ;;  %vm2534_vm7 = vcmp.eq.s32.totalorder %v551_v17, 1  ;;  %v175_v17 = vperm.slane %v2531_v23, 1  ;;  %v1180_v46 = vperm.slane %v2589_v12, 1 }
 0x185   :  { %v669_v3 = vsel %vm3134_vm4, %v659_v24, %v2266_v0  ;;  %v622_v0 = vsel %vm621_vm3, %v612_v30, %v2300_v11  ;;  %v1226_v24 = vperm.slane %v2521_v54, 1 }
 0x186   :  { %1631 = vmatpush.msk.msra.mxu0 %vm649_vm8, %v669_v3  ;;  %1664 = vmatpush.msk.msra.mxu2 %vm368_vm2, %v2160_v60  ;;  %v2548_v60 = vsel %vm125_vm6, 1, %v3112_v32  ;;  %vm3139_vm8 = vcmask 64512   ;;  %vm509_vm2 = vcmp.eq.s32.totalorder %v505_v6, 1  ;;  %vm461_vm6 = vcmp.eq.s32.totalorder %v457_v26, 1 }
 0x187   :  { %v575_v49 = vsel %vm3139_vm8, %v2272_v20, %v2207_v41  ;;  %v128_v9 = vperm.slane %v2548_v60, 1  ;;  %vm1230_vm4 = vcmp.eq.s32.totalorder %v1226_v24, 1  ;;  %v81_v6 = vperm.slane %v2571_v27, 1 }
 0x188   :  { %1632 = vmatpush.msk.msra.mxu0 %vm2515_vm10, %v622_v0  ;;  %1665 = vmatpush.msk.msra.mxu2 %vm320_vm0, %v2128_v36  ;;  %v410_v36 = vperm.slane %v2435_v14, 0  ;;  %vm3140_vm10 = vcmask 72704   ;;  %vm179_vm0 = vcmp.eq.s32.totalorder %v175_v17, 1  ;;  %v1271_v26 = vperm.slane %v2390_v7, 0 }
 0x189   :  { %1013 = vrot.lane.b32.xlu0 %v1908_v18, %s1807_s12  ;;  %1060 = vrot.lane.b32.xlu2 %v1908_v18, %s1804_s30  ;;  %v529_v20 = vsel %vm3140_vm10, %v1982_v25, %v2205_v40  ;;  %vm132_vm15 = vcmp.eq.s32.totalorder %v128_v9, 1  ;;  %v315_v40 = vperm.slane %v2460_v19, 0  ;;  %vm1184_vm10 = vcmp.eq.s32.totalorder %v1180_v46, 1 }
 0x18a   :  { %824 = vrot.lane.b32.xlu1 %v1916_v21, %s1819_s4  ;;  %1633 = vmatpush.msk.msra.mxu0 %vm2534_vm7, %v575_v49  ;;  %vm3141_vm7 = vcmask 1039360   ;;  %v80_v24 = vperm.slane %v2571_v27, 0  ;;  %v716_v49 = vperm.slane %v2278_v55, 3 }
 0x18b   :  { %1666 = vmatpush.msk.msra.mxu2 %vm273_vm11, %v2109_v13  ;;  %v2579_v30 = vpop.permute.xlu0 %732  ;;  %v2581_v41 = vpop.permute.xlu2 %734  ;;  %v363_v13 = vperm.slane %v2450_v59, 0  ;;  %vm414_vm11 = vcmp.eq.s32.totalorder %v410_v36, 1 }
 0x18c   :  { %1634 = vmatpush.msk.msra.mxu0 %vm509_vm2, %v529_v20  ;;  %v2591_v3 = vpop.permute.xlu1 %1242  ;;  %v2598_v52 = vsel %vm3141_vm7, %v2298_v61, %v2579_v30  ;;  %vm85_vm2 = vcmp.eq.s32.totalorder %v81_v6, 1  ;;  %v2616_v61 = vld [vmem:[%s3041_s1] sm:$0xff]  ;;  %vm3144_vm7 = vcmp.le.s32.totalorder %v2215_v53, 2  ;;  %v693_v20 = vperm.slane %v2284_v15, 3 }
 0x18d   :  { %1667 = vmatpush.msk.msra.mxu2 %vm227_vm1, %v2097_v8  ;;  %v1249_v25 = vsel %vm3142_vm5, %v2505_v4, %v2591_v3  ;;  %vm367_vm8 = vcmp.eq.s32.totalorder %v363_v13, 1  ;;  %v268_v8 = vperm.slane %v2492_v35, 0  ;;  %vm319_vm1 = vcmp.eq.s32.totalorder %v315_v40, 1  ;;  %vm2638_vm5 = vmand %vm3144_vm7, %vm65_vm9 }
 0x18e   :  { %1635 = vmatpush.msk.msra.mxu0 %vm461_vm6, %v2197_v39  ;;  %1672 = vmatpush.msk.msra.mxu3 %vm1230_vm4, %v1249_v25  ;;  %vm3143_vm4 = vcmask 465920   ;;  %vm3149_vm7 = vcmask 990208   ;;  %v2693_v40 = vsel %vm2638_vm5, 1, %v3112_v32 }
 0x18f   :  { %1668 = vmatpush.msk.msra.mxu2 %vm179_vm0, %v2065_v56  ;;  %v222_v56 = vperm.slane %v2512_v28, 0  ;;  %vm272_vm6 = vcmp.eq.s32.totalorder %v268_v8, 1  ;;  %v1179_v8 = vperm.slane %v2589_v12, 0 }
 0x190   :  { %1636 = vmatpush.msk.msra.mxu0 %vm414_vm11, %v2142_v47 }
 0x191   :  { %1669 = vmatpush.msk.msra.mxu2 %vm132_vm15, %v2046_v48  ;;  %820 = vrot.lane.b32.xlu0 %v1904_v16, %s1819_s4  ;;  %vm226_vm0 = vcmp.eq.s32.totalorder %v222_v56, 1  ;;  %vm1130_vm15 = vmand %vm2638_vm5, %vm71_vm14  ;;  %v1087_v56 = vperm.slane %v2693_v40, 1 }
 0x192   :  { %915 = vrot.lane.b32.xlu2 %v1904_v16, %s1803_s29  ;;  %867 = vrot.lane.b32.xlu1 %v1904_v16, %s1818_s3  ;;  %v174_v16 = vperm.slane %v2531_v23, 0  ;;  %v2665_v36 = vsel %vm1130_vm15, 1, %v3112_v32  ;;  %vm3150_vm15 = vcmask 1039360  }
 0x193   :  { %1637 = vmatpush.msk.msra.mxu0 %vm367_vm8, %v2145_v51  ;;  %1670 = vmatpush.msk.msra.mxu2 %vm85_vm2, %v2034_v43  ;;  %v2625_v48 = vpop.permute.xlu0 %1196  ;;  %v1239_v47 = vpop.permute.xlu2 %1238  ;;  %v127_v51 = vperm.slane %v2548_v60, 0  ;;  %vm1275_vm2 = vcmp.eq.s32.totalorder %v1271_v26, 1  ;;  %v1133_v6 = vperm.slane %v2665_v36, 1 }
 0x194   :  { %1486 = vmatmul.f32.vlgmr.msra.gmra.mxu2 %v2616_v61  ;;  %v783_v39 = vpop.permute.xlu1 %782  ;;  %v1203_v0 = vsel %vm3143_vm4, %v2507_v10, %v2625_v48  ;;  %vm178_vm11 = vcmp.eq.s32.totalorder %v174_v16, 1  ;;  %v1274_v16 = vperm.slane %v2390_v7, 3 }
 0x195   :  { %1638 = vmatpush.msk.msra.mxu0 %vm319_vm1, %v2131_v38  ;;  %1673 = vmatpush.msk.msra.mxu3 %vm1184_vm10, %v1203_v0  ;;  %v1225_v38 = vperm.slane %v2521_v54, 0  ;;  %vm131_vm8 = vcmp.eq.s32.totalorder %v127_v51, 1  ;;  %vm84_vm1 = vcmp.eq.s32.totalorder %v80_v24, 1  ;;  %vm3147_vm10 = vcmask 449536  }
 0x196   :  { %v648_v0 = vperm.slane %v2304_v2, 3  ;;  %v1800_v51 = vunpack.i.h.bf16 %v2013_v33  ;;  %v1132_v33 = vperm.slane %v2665_v36, 0 }
 0x197   :  { %1639 = vmatpush.msk.msra.mxu0 %vm272_vm6, %v2079_v63  ;;  %v764_v63 = vperm.slane %v2275_v50, 3  ;;  %vm1229_vm6 = vcmp.eq.s32.totalorder %v1225_v38, 1 }
 0x199   :  { %1640 = vmatpush.msk.msra.mxu0 %vm226_vm0, %v2082_v1  ;;  %826 = vrot.lane.b32.xlu0 %v1908_v18, %s1819_s4  ;;  %vm768_vm4 = vcmp.eq.s32.totalorder %v764_v63, 1  ;;  %vm3148_vm0 = vcmask 457728  }
 0x19a   :  { %967 = vrot.lane.b32.xlu2 %v1908_v18, %s1805_s11  ;;  %921 = vrot.lane.b32.xlu1 %v1908_v18, %s1803_s29  ;;  %v1248_v13 = vsel %vm3148_vm0, %v1239_v47, %v2505_v4  ;;  %vm3154_vm0 = vcmask 465920  }
 0x19b   :  { %1641 = vmatpush.msk.msra.mxu0 %vm178_vm11, %v2068_v57  ;;  %v2659_v1 = vpop.permute.xlu0 %1147  ;;  %v2661_v17 = vpop.permute.xlu2 %1103  ;;  %v1420_v57 = vld [vmem:[%s3042_s2] sm:$0xff]  ;;  %vm720_vm11 = vcmp.eq.s32.totalorder %v716_v49, 1 }
 0x19c   :  { %v1285_v11 = vpop.permute.xlu1 %1284 }
 0x19d   :  { %1642 = vmatpush.msk.msra.mxu0 %vm131_vm8, %v2021_v37  ;;  %v1294_v9 = vsel %vm3147_vm10, %v1285_v11, %v2444_v45  ;;  %v788_v37 = vsel %vm3149_vm7, %v2379_v31, %v783_v39  ;;  %v740_v45 = vsel %vm3150_vm15, %v2579_v30, %v2581_v41  ;;  %vm697_vm8 = vcmp.eq.s32.totalorder %v693_v20, 1 }
 0x19e   :  { %1644 = vmatpush.msk.msra.mxu1 %vm1275_vm2, %v1294_v9  ;;  %vm1137_vm2 = vcmp.eq.s32.totalorder %v1133_v6, 1  ;;  %vm3153_vm10 = vcmask 515072   ;;  %vm3155_vm7 = vcmask 523264   ;;  %vm652_vm15 = vcmp.eq.s32.totalorder %v648_v0, 1 }
 0x19f   :  { %1643 = vmatpush.msk.msra.mxu0 %vm84_vm1, %v2037_v44  ;;  %v3151_v44 = vmov 0.0   ;;  %vm3152_vm1 = vcmask 7168   ;;  %v601_v6 = vperm.slane %v2337_v34, 3 }
 0x1a0   :  { %1446 = vmatmul.f32.vlgmr.msra.gmra.mxu0 %v2616_v61  ;;  %1645 = vmatpush.msk.msra.mxu1 %vm1229_vm6, %v1248_v13  ;;  %vm1183_vm6 = vcmp.eq.s32.totalorder %v1179_v8, 1  ;;  %v3167_v8 = vld [vmem:[#allocation12_spill] sm:$0xff] }
 0x1a1   :  { %1709 = vmatpush.msk.msrb.mxu0 %vm768_vm4, %v788_v37  ;;  %1423 = vperm.xlu0 %1755, %v1420_v57   ;;  %vm1091_vm4 = vcmp.eq.s32.totalorder %v1087_v56, 1  ;;  %v3161_v37 = vld [vmem:[#allocation30_spill] sm:$0xff]  ;;  %v1795_v56 = vunpack.i.h.bf16 %v3167_v8 }
 0x1a2   :  { %873 = vrot.lane.b32.xlu2 %v1908_v18, %s1818_s3  ;;  %875 = vrot.lane.b32.xlu1 %v3151_v44, %s1818_s3 }
 0x1a3   :  { %1710 = vmatpush.msk.msrb.mxu0 %vm720_vm11, %v740_v45  ;;  %v665_v4 = vpop.permute.xlu0 %664  ;;  %v618_v25 = vpop.permute.xlu2 %617  ;;  %vm1039_vm11 = vmand %vm2638_vm5, %vm70_vm12  ;;  %vm3158_vm5 = vcmask 449536  }
 0x1a4   :  { %v2688_v31 = vpop.permute.xlu1 %1149  ;;  %v2697_v30 = vsel %vm3152_vm1, %v2332_v22, %v665_v4  ;;  %v2701_v41 = vsel %vm621_vm3, %v2377_v58, %v618_v25  ;;  %v2731_v63 = vsel %vm1039_vm11, 1, %v3112_v32  ;;  %vm3163_vm11 = vcmp.le.s32.totalorder %v2215_v53, 2 }
 0x1a5   :  { %1711 = vmatpush.msk.msrb.mxu0 %vm697_vm8, %v1908_v18  ;;  %v1156_v46 = vsel %vm3153_vm10, %v2659_v1, %v2688_v31  ;;  %vm1278_vm8 = vcmp.eq.s32.totalorder %v1274_v16, 1  ;;  %v1042_v49 = vperm.slane %v2731_v63, 1  ;;  %vm1136_vm10 = vcmp.eq.s32.totalorder %v1132_v33, 1 }
 0x1a6   :  { %1674 = vmatpush.msk.msra.mxu3 %vm1137_vm2, %v1156_v46  ;;  %vm3156_vm2 = vmmov %vm3152_vm1  ;;  %vm3157_vm1 = vcmask 64512   ;;  %v460_v16 = vperm.slane %v2414_v62, 3  ;;  %v413_v33 = vperm.slane %v2435_v14, 3  ;;  %v83_v53 = vperm.slane %v2571_v27, 3 }
 0x1aa   :  { %828 = vrot.lane.b32.xlu2 %v3151_v44, %s1819_s4  ;;  %v1228_v44 = vperm.slane %v2521_v54, 3 }
 0x1ab   :  { %v1193_v22 = vpop.permute.xlu0 %1192  ;;  %v2711_v47 = vpop.permute.xlu2 %1058 }
 0x1ac   :  { %v2713_v58 = vpop.permute.xlu1 %1101  ;;  %v1202_v18 = vsel %vm3154_vm0, %v1193_v22, %v2507_v10  ;;  %vm3160_vm0 = vcmask 531456  }
 0x1ad   :  { %1646 = vmatpush.msk.msra.mxu1 %vm1183_vm6, %v1202_v18  ;;  %v1110_v39 = vsel %vm3155_vm7, %v2713_v58, %v2661_v17  ;;  %vm1046_vm6 = vcmp.eq.s32.totalorder %v1042_v49, 1  ;;  %vm3162_vm7 = vcmp.ge.s32.totalorder %v3161_v37, 1  ;;  %v1041_v49 = vperm.slane %v2731_v63, 0  ;;  %v3171_v37 = vld [vmem:[#allocation29_spill] sm:$0xff] }
 0x1ae   :  { %1675 = vmatpush.msk.msra.mxu3 %vm1091_vm4, %v1110_v39  ;;  %vm3159_vm4 = vcmask 515072  }
 0x1b3   :  { %v667_v26 = vpop.permute.xlu0 %666  ;;  %v571_v10 = vpop.permute.xlu2 %570 }
 0x1b4   :  { %v2727_v24 = vpop.permute.xlu1 %1290  ;;  %v672_v38 = vsel %vm3156_vm2, %v665_v4, %v667_v26  ;;  %v2735_v11 = vsel %vm3157_vm1, %v2437_v42, %v571_v10  ;;  %v3166_v4 = vld [vmem:[#allocation35_spill] sm:$0xff]  ;;  %vm605_vm2 = vcmp.eq.s32.totalorder %v601_v6, 1  ;;  %vm1232_vm1 = vcmp.eq.s32.totalorder %v1228_v44, 1 }
 0x1b5   :  { %1712 = vmatpush.msk.msrb.mxu0 %vm652_vm15, %v672_v38  ;;  %v1297_v43 = vsel %vm3158_vm5, %v2727_v24, %v1800_v51  ;;  %vm2752_vm15 = vmand %vm3163_vm11, %vm3162_vm7  ;;  %v554_v46 = vperm.slane %v3166_v4, 3  ;;  %vm417_vm7 = vcmp.eq.s32.totalorder %v413_v33, 1 }
 0x1b6   :  { %1725 = vmatpush.msk.msrb.mxu2 %vm1278_vm8, %v1297_v43  ;;  %vm992_vm8 = vmand %vm2752_vm15, %vm71_vm14  ;;  %v1086_v43 = vperm.slane %v2693_v40, 0 }
 0x1b7   :  { %vm558_vm5 = vcmp.eq.s32.totalorder %v554_v46, 1  ;;  %v2769_v51 = vsel %vm992_vm8, 1, %v3112_v32  ;;  %vm3172_vm8 = vcmask 523264  }
 0x1bb   :  { %v1146_v9 = vpop.permute.xlu0 %1145  ;;  %v2741_v57 = vpop.permute.xlu2 %1011 }
 0x1bc   :  { %v1057_v20 = vpop.permute.xlu1 %1056  ;;  %v1155_v13 = vsel %vm3159_vm4, %v1146_v9, %v2659_v1  ;;  %v508_v1 = vperm.slane %v2395_v29, 3  ;;  %v366_v9 = vperm.slane %v2450_v59, 3 }
 0x1bd   :  { %1647 = vmatpush.msk.msra.mxu1 %vm1136_vm10, %v1155_v13  ;;  %v1065_v42 = vsel %vm3160_vm0, %v1057_v20, %v2711_v47  ;;  %vm3168_vm10 = vcmask 457728   ;;  %v3170_v13 = vld [vmem:[#allocation31_spill] sm:$0xff]  ;;  %vm1090_vm0 = vcmp.eq.s32.totalorder %v1086_v43, 1 }
 0x1be   :  { %1676 = vmatpush.msk.msra.mxu3 %vm1046_vm6, %v1065_v42  ;;  %vm3169_vm6 = vcmask 64512   ;;  %vm512_vm4 = vcmp.eq.s32.totalorder %v508_v1, 1  ;;  %v318_v42 = vperm.slane %v2460_v19, 3  ;;  %v271_v1 = vperm.slane %v2492_v35, 3 }
 0x1c3   :  { %v620_v22 = vpop.permute.xlu0 %619  ;;  %v573_v18 = vpop.permute.xlu2 %572 }
 0x1c4   :  { %v2764_v39 = vpop.permute.xlu1 %1244  ;;  %v625_v0 = vsel %vm621_vm3, %v618_v25, %v620_v22  ;;  %v578_v38 = vsel %vm3169_vm6, %v571_v10, %v573_v18  ;;  %v995_v25 = vperm.slane %v2769_v51, 1  ;;  %vm464_vm3 = vcmp.eq.s32.totalorder %v460_v16, 1 }
 0x1c5   :  { %1713 = vmatpush.msk.msrb.mxu0 %vm605_vm2, %v625_v0  ;;  %v1251_v26 = vsel %vm3168_vm10, %v2764_v39, %v1795_v56  ;;  %vm1045_vm2 = vcmp.eq.s32.totalorder %v1041_v49, 1  ;;  %v3174_v56 = vld [vmem:[#allocation26_spill] sm:$0xff]  ;;  %vm3175_vm10 = vcmask 531456   ;;  %vm322_vm6 = vcmp.eq.s32.totalorder %v318_v42, 1  ;;  %v3176_v0 = vld [vmem:[#allocation24_spill] sm:$0xff] }
 0x1c6   :  { %1726 = vmatpush.msk.msrb.mxu2 %vm1232_vm1, %v1251_v26  ;;  %vm999_vm11 = vcmp.eq.s32.totalorder %v995_v25, 1  ;;  %vm370_vm1 = vcmp.eq.s32.totalorder %v366_v9, 1  ;;  %v225_v18 = vperm.slane %v2512_v28, 3  ;;  %v177_v16 = vperm.slane %v2531_v23, 3  ;;  %v3177_v26 = vld [vmem:[#allocation23_spill] sm:$0xff]  ;;  %v3179_v49 = vld [vmem:[#allocation20_spill] sm:$0xff] }
 0x1c7   :  { %1714 = vmatpush.msk.msrb.mxu0 %vm558_vm5, %v578_v38  ;;  %vm3173_vm5 = vcmask 580608   ;;  %v3178_v38 = vld [vmem:[#allocation5_spill] sm:$0xff]  ;;  %v3180_v42 = vld [vmem:[#allocation18_spill] sm:$0xff] }
 0x1c8   :  { %v1790_v43 = vunpack.i.h.bf16 %v3178_v38 }
 0x1c9   :  { %1715 = vmatpush.msk.msrb.mxu0 %vm512_vm4, %v3170_v13  ;;  %vm275_vm4 = vcmp.eq.s32.totalorder %v271_v1, 1  ;;  %v3183_v1 = vld [vmem:[#allocation14_spill] sm:$0xff] }
 0x1cb   :  { %v1100_v10 = vpop.permute.xlu0 %1099  ;;  %v1055_v6 = vpop.permute.xlu2 %1054  ;;  %1716 = vmatpush.msk.msrb.mxu0 %vm464_vm3, %v3171_v37  ;;  %vm946_vm3 = vmand %vm2752_vm15, %vm65_vm9  ;;  %vm3181_vm9 = vcmask 465920   ;;  %v3182_v37 = vld [vmem:[#allocation17_spill] sm:$0xff] }
 0x1cc   :  { %v1010_v44 = vpop.permute.xlu1 %1009  ;;  %v1109_v46 = vsel %vm3172_vm8, %v1100_v10, %v2713_v58  ;;  %v1064_v22 = vsel %vm3175_vm10, %v1055_v6, %v1057_v20  ;;  %v1182_v58 = vperm.slane %v2589_v12, 3  ;;  %v130_v20 = vperm.slane %v2548_v60, 3 }
 0x1cd   :  { %1648 = vmatpush.msk.msra.mxu1 %vm1090_vm0, %v1109_v46  ;;  %v1018_v8 = vsel %vm3173_vm5, %v1010_v44, %v2741_v57  ;;  %1717 = vmatpush.msk.msrb.mxu0 %vm417_vm7, %v3174_v56  ;;  %vm229_vm0 = vcmp.eq.s32.totalorder %v225_v18, 1  ;;  %v2809_v13 = vsel %vm946_vm3, 1, %v3112_v32  ;;  %v1135_v6 = vperm.slane %v2665_v36, 3  ;;  %v3185_v18 = vld [vmem:[#allocation13_spill] sm:$0xff] }
 0x1ce   :  { %1677 = vmatpush.msk.msra.mxu3 %vm999_vm11, %v1018_v8  ;;  %vm1186_vm7 = vcmp.eq.s32.totalorder %v1182_v58, 1  ;;  %vm181_vm11 = vcmp.eq.s32.totalorder %v177_v16, 1  ;;  %vm134_vm8 = vcmp.eq.s32.totalorder %v130_v20, 1  ;;  %v949_v46 = vperm.slane %v2809_v13, 1  ;;  %v3184_v8 = vld [vmem:[#allocation9_spill] sm:$0xff] }
 0x1cf   :  { %1649 = vmatpush.msk.msra.mxu1 %vm1045_vm2, %v1064_v22  ;;  %1718 = vmatpush.msk.msrb.mxu0 %vm370_vm1, %v3176_v0  ;;  %vm87_vm2 = vcmp.eq.s32.totalorder %v83_v53, 1  ;;  %vm900_vm1 = vmand %vm2752_vm15, %vm70_vm12  ;;  %v1785_v56 = vunpack.i.h.bf16 %v3184_v8  ;;  %vm1139_vm5 = vcmp.eq.s32.totalorder %v1135_v6, 1  ;;  %vm3187_vm12 = vcmask 588800   ;;  %v3191_v8 = vld [vmem:[#allocation10_spill] sm:$0xff] }
 0x1d0   :  { %vm953_vm10 = vcmp.eq.s32.totalorder %v949_v46, 1  ;;  %v2832_v16 = vsel %vm900_vm1, 1, %v3112_v32  ;;  %v994_v20 = vperm.slane %v2769_v51, 0  ;;  %vm852_vm15 = vmand %vm2247_vm13, %vm71_vm14  ;;  %v1089_v46 = vperm.slane %v2693_v40, 3 }
 0x1d1   :  { %1719 = vmatpush.msk.msrb.mxu0 %vm322_vm6, %v3177_v26  ;;  %vm3186_vm6 = vcmask 515072   ;;  %v903_v38 = vperm.slane %v2832_v16, 1  ;;  %v2846_v53 = vsel %vm852_vm15, 1, %v3112_v32  ;;  %vm877_vm14 = vcmask 973824  }
 0x1d2   :  { %vm3194_vm1 = vcmask 531456  }
 0x1d3   :  { %v2800_v33 = vpop.permute.xlu0 %963  ;;  %v2802_v25 = vpop.permute.xlu2 %919  ;;  %1720 = vmatpush.msk.msrb.mxu0 %vm275_vm4, %v3179_v49  ;;  %vm998_vm4 = vcmp.eq.s32.totalorder %v994_v20, 1  ;;  %vm907_vm3 = vcmp.eq.s32.totalorder %v903_v38, 1 }
 0x1d4   :  { %v2805_v9 = vpop.permute.xlu1 %1198 }
 0x1d5   :  { %1721 = vmatpush.msk.msrb.mxu0 %vm229_vm0, %v3180_v42  ;;  %v1205_v10 = vsel %vm3181_vm9, %v2805_v9, %v1790_v43  ;;  %vm3189_vm0 = vcmask 580608   ;;  %vm1093_vm9 = vcmp.eq.s32.totalorder %v1089_v46, 1 }
 0x1d6   :  { %1727 = vmatpush.msk.msrb.mxu2 %vm1186_vm7, %v1205_v10  ;;  %vm3190_vm7 = vcmask 596992  }
 0x1d7   :  { %1722 = vmatpush.msk.msrb.mxu0 %vm181_vm11, %v3182_v37  ;;  %v855_v37 = vperm.slane %v2846_v53, 1 }
 0x1d9   :  { %1723 = vmatpush.msk.msrb.mxu0 %vm134_vm8, %v3183_v1  ;;  %v1044_v1 = vperm.slane %v2731_v63, 3  ;;  %vm859_vm11 = vcmp.eq.s32.totalorder %v855_v37, 1  ;;  %vm3193_vm8 = vcmask 523264   ;;  %v902_v37 = vperm.slane %v2832_v16, 0 }
 0x1db   :  { %v2823_v22 = vpop.permute.xlu0 %1151  ;;  %1724 = vmatpush.msk.msrb.mxu0 %vm87_vm2, %v3185_v18  ;;  %v2834_v45 = vpop.permute.xlu2 %869  ;;  %vm1048_vm2 = vcmp.eq.s32.totalorder %v1044_v1, 1 }
 0x1dc   :  { %v2826_v0 = vpop.permute.xlu1 %965  ;;  %1566 = vmatmul.f32.vlgmr.msrb.gmra.mxu0 %v2616_v61  ;;  %v1158_v58 = vsel %vm3186_vm6, %v2823_v22, %v1785_v56  ;;  %v1780_v56 = vunpack.i.h.bf16 %v3191_v8  ;;  %vm906_vm6 = vcmp.eq.s32.totalorder %v902_v37, 1  ;;  %v1227_v37 = vperm.slane %v2521_v54, 2 }
 0x1dd   :  { %v972_v26 = vsel %vm3187_vm12, %v2800_v33, %v2826_v0  ;;  %1728 = vmatpush.msk.msrb.mxu2 %vm1139_vm5, %v1158_v58  ;;  %v1181_v54 = vperm.slane %v2589_v12, 2  ;;  %v1088_v12 = vperm.slane %v2693_v40, 2 }
 0x1de   :  { %1678 = vmatpush.msk.msra.mxu3 %vm953_vm10, %v972_v26  ;;  %v3192_v26 = vld [vmem:[#allocation4_spill] sm:$0xff]  ;;  %vm3195_vm10 = vmmov %vm3187_vm12 }
 0x1df   :  { %v1775_v20 = vunpack.i.h.bf16 %v3192_v26  ;;  %vm3196_vm12 = vmmov %vm3190_vm7 }
 0x1e3   :  { %v1008_v49 = vpop.permute.xlu0 %1007  ;;  %v2852_v5 = vpop.permute.xlu2 %1060 }
 0x1e4   :  { %v918_v42 = vpop.permute.xlu1 %917  ;;  %v1017_v10 = vsel %vm3189_vm0, %v1008_v49, %v1010_v44  ;;  %v1067_v49 = vsel %vm3194_vm1, %v2852_v5, %v1775_v20  ;;  %vm3203_vm1 = vcmask 457728  }
 0x1e5   :  { %1650 = vmatpush.msk.msra.mxu1 %vm998_vm4, %v1017_v10  ;;  %v926_v6 = vsel %vm3190_vm7, %v918_v42, %v2802_v25  ;;  %v948_v10 = vperm.slane %v2809_v13, 0 }
 0x1e6   :  { %1679 = vmatpush.msk.msra.mxu3 %vm907_vm3, %v926_v6  ;;  %vm3199_vm3 = vmmov %vm3189_vm0  ;;  %vm1426_vm0 = vcmask 719872  }
 0x1e7   :  { %vm952_vm5 = vcmp.eq.s32.totalorder %v948_v10, 1  ;;  %v3197_v10 = vld [vmem:[#allocation7_spill] sm:$0xff] }
 0x1e8   :  { %v1770_v43 = vunpack.i.h.bf16 %v3197_v10 }
 0x1eb   :  { %v2857_v18 = vpop.permute.xlu0 %871 }
 0x1ec   :  { %v2859_v44 = vpop.permute.xlu1 %1105  ;;  %v879_v58 = vsel %vm877_vm14, %v2834_v45, %v2857_v18  ;;  %v916_v6 = vpop.permute.xlu2 %915 }
 0x1ed   :  { %1680 = vmatpush.msk.msra.mxu3 %vm859_vm11, %v879_v58  ;;  %v1112_v38 = vsel %vm3193_vm8, %v2859_v44, %v1780_v56  ;;  %v2876_v58 = vsel %vm2247_vm13, 1, %v3112_v32  ;;  %v997_v56 = vperm.slane %v2769_v51, 3  ;;  %v925_v26 = vsel %vm3196_vm12, %v916_v6, %v918_v42 }
 0x1ee   :  { %1729 = vmatpush.msk.msrb.mxu2 %vm1093_vm9, %v1112_v38  ;;  %v808_v20 = vperm.slane %v2876_v58, 1  ;;  %v951_v38 = vperm.slane %v2809_v13, 3  ;;  %vm830_vm13 = vcmask 982016   ;;  %vm3200_vm9 = vmmov %vm3195_vm10  ;;  %vm3202_vm8 = vcmask 449536  }
 0x1ef   :  { %vm1001_vm15 = vcmp.eq.s32.totalorder %v997_v56, 1 }
 0x1f0   :  { %1730 = vmatpush.msk.msrb.mxu2 %vm1048_vm2, %v1067_v49  ;;  %v1273_v49 = vperm.slane %v2390_v7, 2  ;;  %vm812_vm4 = vcmp.eq.s32.totalorder %v808_v20, 1  ;;  %v2899_v7 = vld [vmem:[%s3041_s1 + $0x8] sm:$0xff]  ;;  %vm955_vm7 = vcmp.eq.s32.totalorder %v951_v38, 1  ;;  %v3201_v20 = vld [vmem:[#allocation34_spill] sm:$0xff]  ;;  %vm1231_vm2 = vcmp.eq.s32.totalorder %v1227_v37, 1 }
 0x1f1   :  { %v1296_v10 = vsel %vm3202_vm8, %v3201_v20, %v2727_v24  ;;  %v1134_v38 = vperm.slane %v2665_v36, 2  ;;  %v1043_v36 = vperm.slane %v2731_v63, 2  ;;  %vm3209_vm8 = vcmask 531456  }
 0x1f2   :  { %vm1277_vm11 = vcmp.eq.s32.totalorder %v1273_v49, 1  ;;  %v1250_v49 = vsel %vm3203_vm1, %v2591_v3, %v2764_v39  ;;  %v809_v20 = vperm.slane %v2876_v58, 2 }
 0x1f3   :  { %v2871_v46 = vpop.permute.xlu0 %822 }
 0x1f4   :  { %v962_v8 = vpop.permute.xlu1 %961  ;;  %v2886_v32 = vpop.permute.xlu2 %967 }
 0x1f5   :  { %v971_v1 = vsel %vm3195_vm10, %v962_v8, %v2800_v33  ;;  %v3198_v8 = vld [vmem:[#allocation8_spill] sm:$0xff]  ;;  %vm3204_vm10 = vcmask 465920  }
 0x1f6   :  { %1651 = vmatpush.msk.msra.mxu1 %vm952_vm5, %v971_v1  ;;  %v1765_v42 = vunpack.i.h.bf16 %v3198_v8  ;;  %vm1185_vm5 = vcmp.eq.s32.totalorder %v1181_v54, 1  ;;  %v807_v8 = vperm.slane %v2876_v58, 0  ;;  %v1204_v24 = vsel %vm3204_vm10, %v2625_v48, %v2805_v9 }
 0x1f7   :  { %v996_v48 = vperm.slane %v2769_v51, 2  ;;  %v692_v9 = vperm.slane %v2284_v15, 2  ;;  %v905_v51 = vperm.slane %v2832_v16, 3  ;;  %v1066_v15 = vsel %vm3209_vm8, %v2711_v47, %v2852_v5 }
 0x1f8   :  { %1652 = vmatpush.msk.msra.mxu1 %vm906_vm6, %v925_v26  ;;  %v974_v26 = vsel %vm3200_vm9, %v2886_v32, %v1765_v42  ;;  %v763_v42 = vperm.slane %v2275_v50, 2  ;;  %vm1138_vm6 = vcmp.eq.s32.totalorder %v1134_v38, 1  ;;  %v715_v50 = vperm.slane %v2278_v55, 2 }
 0x1f9   :  { %vm1047_vm9 = vcmp.eq.s32.totalorder %v1043_v36, 1  ;;  %v950_v55 = vperm.slane %v2809_v13, 2  ;;  %vm1000_vm1 = vcmp.eq.s32.totalorder %v996_v48, 1  ;;  %v3211_v13 = vld [vmem:[#allocation36_spill] sm:$0xff]  ;;  %vm3214_vm10 = vcmask 580608  }
 0x1fa   :  { %v600_v47 = vperm.slane %v2337_v34, 2  ;;  %v856_v5 = vperm.slane %v2846_v53, 2  ;;  %v224_v38 = vperm.slane %v2512_v28, 2  ;;  %v3228_v28 = vld [vmem:[#allocation15_spill] sm:$0xff] }
 0x1fb   :  { %v2888_v33 = vpop.permute.xlu0 %1013 }
 0x1fc   :  { %v2892_v6 = vpop.permute.xlu1 %824  ;;  %v1020_v1 = vsel %vm3199_vm3, %v2888_v33, %v1770_v43  ;;  %v854_v43 = vperm.slane %v2846_v53, 0  ;;  %vm811_vm3 = vcmp.eq.s32.totalorder %v807_v8, 1  ;;  %vm860_vm8 = vcmp.eq.s32.totalorder %v856_v5, 1  ;;  %v3225_v8 = vld [vmem:[#allocation21_spill] sm:$0xff] }
 0x1fd   :  { %v832_v56 = vsel %vm830_vm13, %v2871_v46, %v2892_v6  ;;  %1731 = vmatpush.msk.msrb.mxu2 %vm1001_vm15, %v1020_v1  ;;  %vm3205_vm15 = vcmask 515072   ;;  %v904_v1 = vperm.slane %v2832_v16, 2  ;;  %v1019_v16 = vsel %vm3214_vm10, %v2741_v57, %v2888_v33 }
 0x1fe   :  { %1681 = vmatpush.msk.msra.mxu3 %vm812_vm4, %v832_v56  ;;  %vm858_vm12 = vcmp.eq.s32.totalorder %v854_v43, 1  ;;  %v1157_v3 = vsel %vm3205_vm15, %v2688_v31, %v2823_v22  ;;  %vm1092_vm4 = vcmp.eq.s32.totalorder %v1088_v12, 1  ;;  %v874_v56 = vpop.permute.xlu2 %873  ;;  %v3223_v43 = vld [vmem:[#allocation25_spill] sm:$0xff]  ;;  %v176_v12 = vperm.slane %v2531_v23, 2 }
 0x1ff   :  { %1625 = vmatmul.msk.f32.vlgmr.msra.gmra.mxu3 %vm1426_vm0, %v2899_v7  ;;  %1732 = vmatpush.msk.msrb.mxu2 %vm955_vm7, %v974_v26  ;;  %vm2931_vm7 = vcmp.eq.s32.totalorder %v763_v42, 1  ;;  %v553_v26 = vperm.slane %v3166_v4, 2  ;;  %v857_v4 = vperm.slane %v2846_v53, 3  ;;  %v3227_v42 = vld [vmem:[#allocation16_spill] sm:$0xff] }
 0x200   :  { %1698 = vmatpush.msk.msrb.mxu3 %vm1277_vm11, %v1296_v10  ;;  %vm3208_vm11 = vcmask 523264  }
 0x201   :  { %v1111_v31 = vsel %vm3208_vm11, %v2661_v17, %v2859_v44  ;;  %v3210_v17 = vld [vmem:[#allocation6_spill] sm:$0xff]  ;;  %vm861_vm10 = vcmp.eq.s32.totalorder %v857_v4, 1 }
 0x202   :  { %1699 = vmatpush.msk.msrb.mxu3 %vm1231_vm2, %v1250_v49  ;;  %vm719_vm2 = vcmp.eq.s32.totalorder %v715_v50, 1  ;;  %v1760_v44 = vunpack.i.h.bf16 %v3210_v17  ;;  %v129_v49 = vperm.slane %v2548_v60, 2 }
 0x203   :  { %v821_v40 = vpop.permute.xlu0 %820 }
 0x204   :  { %1700 = vmatpush.msk.msrb.mxu3 %vm1185_vm5, %v1204_v24  ;;  %v868_v37 = vpop.permute.xlu1 %867  ;;  %v831_v22 = vsel %vm830_vm13, %v821_v40, %v2871_v46  ;;  %vm2954_vm5 = vcmp.eq.s32.totalorder %v692_v9, 1  ;;  %v3229_v24 = vld [vmem:[#allocation11_spill] sm:$0xff] }
 0x205   :  { %v878_v39 = vsel %vm877_vm14, %v868_v37, %v2834_v45  ;;  %v647_v45 = vperm.slane %v2304_v2, 2 }
 0x206   :  { %1701 = vmatpush.msk.msrb.mxu3 %vm1138_vm6, %v1157_v3  ;;  %1653 = vmatpush.msk.msra.mxu1 %vm858_vm12, %v878_v39  ;;  %vm2961_vm6 = vcmp.eq.s32.totalorder %v950_v55, 1  ;;  %vm909_vm12 = vcmp.eq.s32.totalorder %v905_v51, 1  ;;  %v829_v53 = vpop.permute.xlu2 %828 }
 0x207   :  { %vm651_vm15 = vcmp.eq.s32.totalorder %v647_v45, 1 }
 0x208   :  { %1702 = vmatpush.msk.msrb.mxu3 %vm1092_vm4, %v1111_v31  ;;  %1654 = vmatpush.msk.msra.mxu1 %vm811_vm3, %v831_v22  ;;  %vm908_vm4 = vcmp.eq.s32.totalorder %v904_v1, 1  ;;  %vm3217_vm3 = vcmask 588800  }
 0x209   :  { %1624 = vmatmul.msk.f32.vlgmr.msra.gmra.mxu1 %vm1426_vm0, %v2899_v7  ;;  %v973_v57 = vsel %vm3217_vm3, %v2826_v0, %v2886_v32  ;;  %v810_v32 = vperm.slane %v2876_v58, 3  ;;  %vm228_vm3 = vcmp.eq.s32.totalorder %v224_v38, 1 }
 0x20a   :  { %1682 = vmatpush.msk.msrb.mxu1 %vm2931_vm7, %v3211_v13  ;;  %1703 = vmatpush.msk.msrb.mxu3 %vm1047_vm9, %v1066_v15  ;;  %vm3218_vm7 = vcmask 596992   ;;  %vm604_vm9 = vcmp.eq.s32.totalorder %v600_v47, 1 }
 0x20b   :  { %vm3219_vm11 = vmmov %vm3218_vm7  ;;  %v827_v0 = vpop.permute.xlu0 %826 }
 0x20c   :  { %1683 = vmatpush.msk.msrb.mxu1 %vm719_vm2, %v2598_v52  ;;  %1704 = vmatpush.msk.msrb.mxu3 %vm1000_vm1, %v1019_v16  ;;  %v922_v54 = vpop.permute.xlu1 %921  ;;  %v507_v52 = vperm.slane %v2395_v29, 2  ;;  %vm557_vm2 = vcmp.eq.s32.totalorder %v553_v26, 1  ;;  %vm813_vm1 = vcmp.eq.s32.totalorder %v809_v20, 1  ;;  %v833_v29 = vsel %vm830_vm13, %v2892_v6, %v827_v0  ;;  %v3222_v6 = vld [vmem:[#allocation27_spill] sm:$0xff] }
 0x20d   :  { %v928_v33 = vsel %vm3218_vm7, %v922_v54, %v1760_v44  ;;  %v927_v34 = vsel %vm3219_vm11, %v2802_v25, %v922_v54  ;;  %v880_v25 = vsel %vm877_vm14, %v2857_v18, %v874_v56  ;;  %v834_v58 = vsel %vm830_vm13, %v827_v0, %v829_v53 }
 0x20e   :  { %1684 = vmatpush.msk.msrb.mxu1 %vm2954_vm5, %v1916_v21  ;;  %1705 = vmatpush.msk.msrb.mxu3 %vm2961_vm6, %v973_v57  ;;  %v459_v21 = vperm.slane %v2414_v62, 2  ;;  %vm511_vm5 = vcmp.eq.s32.totalorder %v507_v52, 1  ;;  %v365_v62 = vperm.slane %v2450_v59, 2  ;;  %v270_v59 = vperm.slane %v2492_v35, 2 }
 0x20f   :  { %1733 = vmatpush.msk.msrb.mxu2 %vm909_vm12, %v928_v33  ;;  %vm814_vm12 = vcmp.eq.s32.totalorder %v810_v32, 1  ;;  %v82_v35 = vperm.slane %v2571_v27, 2  ;;  %vm133_vm7 = vcmp.eq.s32.totalorder %v129_v49, 1 }
 0x210   :  { %1685 = vmatpush.msk.msrb.mxu1 %vm651_vm15, %v2697_v30  ;;  %1706 = vmatpush.msk.msrb.mxu3 %vm908_vm4, %v927_v34  ;;  %v412_v30 = vperm.slane %v2435_v14, 2  ;;  %vm463_vm6 = vcmp.eq.s32.totalorder %v459_v21, 1  ;;  %v317_v14 = vperm.slane %v2460_v19, 2  ;;  %vm274_vm13 = vcmp.eq.s32.totalorder %v270_v59, 1  ;;  %v3224_v19 = vld [vmem:[#allocation22_spill] sm:$0xff] }
 0x211   :  { %vm86_vm11 = vcmp.eq.s32.totalorder %v82_v35, 1 }
 0x212   :  { %1686 = vmatpush.msk.msrb.mxu1 %vm604_vm9, %v2701_v41  ;;  %1707 = vmatpush.msk.msrb.mxu3 %vm860_vm8, %v880_v25  ;;  %v3220_v41 = vld [vmem:[#allocation33_spill] sm:$0xff]  ;;  %vm416_vm15 = vcmp.eq.s32.totalorder %v412_v30, 1  ;;  %vm321_vm4 = vcmp.eq.s32.totalorder %v317_v14, 1  ;;  %vm3230_vm9 = vcmask 7168  }
 0x213   :  { %v1424_v36 = vpop.permute.xlu0 %1423  ;;  %vm3231_vm8 = vmmov %vm3230_vm9 }
 0x214   :  { %1687 = vmatpush.msk.msrb.mxu1 %vm557_vm2, %v2735_v11  ;;  %1708 = vmatpush.msk.msrb.mxu3 %vm813_vm1, %v833_v29  ;;  %v876_v18 = vpop.permute.xlu1 %875  ;;  %v3221_v11 = vld [vmem:[#allocation28_spill] sm:$0xff] }
 0x215   :  { %v881_v10 = vsel %vm877_vm14, %v874_v56, %v876_v18  ;;  %1626 = vmatmul.msk.f32.vlgmr.msrb.gmra.mxu3 %vm1426_vm0, %v2899_v7  ;;  %vm369_vm14 = vcmp.eq.s32.totalorder %v365_v62, 1 }
 0x216   :  { %1688 = vmatpush.msk.msrb.mxu1 %vm511_vm5, %v3220_v41  ;;  %1734 = vmatpush.msk.msrb.mxu2 %vm861_vm10, %v881_v10 }
 0x217   :  { %v1487_v23 = vpop.f32.mrf.mxu2 }
 0x218   :  { %1689 = vmatpush.msk.msrb.mxu1 %vm463_vm6, %v3221_v11  ;;  %1735 = vmatpush.msk.msrb.mxu2 %vm814_vm12, %v834_v58  ;;  %v1488_v60 = vadd.f32 %v1487_v23, %v1424_v36 }
 0x219   :  { %1627 = vmatmul.msk.f32.vlgmr.msrb.gmra.mxu2 %vm1426_vm0, %v2899_v7  ;;  %vm180_vm0 = vcmp.eq.s32.totalorder %v176_v12, 1  ;;  %v3226_v7 = vld [vmem:[#allocation19_spill] sm:$0xff] }
 0x21a   :  { %1690 = vmatpush.msk.msrb.mxu1 %vm416_vm15, %v3222_v6 }
 0x21c   :  { %1691 = vmatpush.msk.msrb.mxu1 %vm369_vm14, %v3223_v43 }
 0x21d   :  { %v1447_v40 = vpop.f32.mrf.mxu0 }
 0x21e   :  { %1692 = vmatpush.msk.msrb.mxu1 %vm321_vm4, %v3224_v19  ;;  %v1448_v39 = vadd.f32 %v1447_v40, %v1424_v36 }
 0x220   :  { %1693 = vmatpush.msk.msrb.mxu1 %vm274_vm13, %v3225_v8 }
 0x222   :  { %1694 = vmatpush.msk.msrb.mxu1 %vm228_vm3, %v3226_v7 }
 0x224   :  { %1695 = vmatpush.msk.msrb.mxu1 %vm180_vm0, %v3227_v42 }
 0x226   :  { %1696 = vmatpush.msk.msrb.mxu1 %vm133_vm7, %v3228_v28 }
 0x228   :  { %1697 = vmatpush.msk.msrb.mxu1 %vm86_vm11, %v3229_v24 }
 0x229   :  { %1526 = vmatmul.f32.vlgmr.msrb.gmra.mxu1 %v2616_v61 }
 0x259   :  { %v1567_v48 = vpop.f32.mrf.mxu0 }
 0x25a   :  { %v1568_v63 = vadd.f32 %v1567_v48, %v1424_v36 }
 0x282   :  { %v1507_v37 = vpop.f32.mrf.mxu3 }
 0x283   :  { %v1508_v3 = vadd.f32 %v1507_v37, %v1488_v60 }
 0x285   :  { %1591 = vst [vmem:[%s3043_s6 + $0x8] sm:$0xff] %v1508_v3  ;;  %v1601_v45 = vmul.f32 %v1508_v3, %v1508_v3 }
 0x286   :  { %v1467_v27 = vpop.f32.mrf.mxu1 }
 0x287   :  { %v1468_v50 = vadd.f32 %v1467_v27, %v1448_v39 }
 0x289   :  { %1590 = vst [vmem:[%s3043_s6] sm:$0xff] %v1468_v50  ;;  %v1600_v55 = vmul.f32 %v1468_v50, %v1468_v50  ;;  %v1594_v1 = vadd.f32 %v1508_v3, %v1468_v50 }
 0x28b   :  { %v1604_v13 = vadd.f32 %v1601_v45, %v1600_v55 }
 0x298   :  { %v1547_v22 = vpop.f32.mrf.mxu3 }
 0x29c   :  { %v1587_v61 = vpop.f32.mrf.mxu2 }
 0x29d   :  { %v1588_v9 = vadd.f32 %v1587_v61, %v1568_v63 }
 0x29f   :  { %1593 = vst [vmem:[%s3043_s6 + $0x18] sm:$0xff] %v1588_v9  ;;  %v1603_v16 = vmul.f32 %v1588_v9, %v1588_v9 }
 0x2a6   :  { %v1527_v31 = vpop.f32.mrf.mxu1 }
 0x2a7   :  { %v1528_v51 = vadd.f32 %v1527_v31, %v1424_v36 }
 0x2a9   :  { %v1548_v15 = vadd.f32 %v1547_v22, %v1528_v51 }
 0x2ab   :  { %1592 = vst [vmem:[%s3043_s6 + $0x10] sm:$0xff] %v1548_v15  ;;  %v1602_v17 = vmul.f32 %v1548_v15, %v1548_v15  ;;  %v1595_v44 = vadd.f32 %v1594_v1, %v1548_v15 }
 0x2ad   :  { %v1596_v2 = vadd.f32 %v1595_v44, %v1588_v9  ;;  %v1605_v46 = vadd.f32 %v1604_v13, %v1602_v17 }
 0x2af   :  { %1597 = vadd.xlane.f32.xlu1 %v1596_v2  ;;  %v1606_v47 = vadd.f32 %v1605_v46, %v1603_v16 }
 0x2b1   :  { %1607 = vadd.xlane.f32.xlu2 %v1606_v47 }
 0x322   :  { %v1598_v5 = vpop.xlane.xlu1 %1597 }
 0x323   :  { %1599 = vst.msk [vmem:[%s3044_s7] sm:$0xff] %vm3230_vm9, %v1598_v5 }
 0x324   :  { %v1608_v56 = vpop.xlane.xlu2 %1607 }
 0x325   :  { %1609 = vst.msk [vmem:[%s3045_s8] sm:$0xff] %vm3231_vm8, %v1608_v56 }

</bundles_post_ra>
